<compile_context>
chip_gen: v7x
topology: tpu7x:2x2x1
jax: 0.10.0
libtpu: 0.0.40
codegen_flags: <defaults>
</compile_context>

<pallas_src>
import functools

import jax
import jax.numpy as jnp
from jax.experimental import pallas as pl
from jax.experimental.pallas import tpu as pltpu


# -----------------------------------------------------------------------------
# Fused Pallas kernel
# -----------------------------------------------------------------------------
def _fused_deconv_block_kernel(
        x_ref, xpre_ref, w1_ref, w2_ref, g1_ref, b1_ref, g2_ref, b2_ref, o_ref,
        *, B, H, W, Cin, Cout, eps, mxu_dtype):
    """Whole Deconv2dBlock forward in one invocation (single grid point, all in VMEM).

    Phase p = 2*py + px; phase (py, px) holds the output pixels (2m+py, 2n+px).

      x_ref    : (B, H, W, Cin)        f32  low-res input, NHWC
      xpre_ref : (4*B, H, W, Cout)     f32  skip input, phase-major
      w1_ref   : (4*Cin, 4*Cout)       mxu  packed deconv taps; rows = 2x2 input window
                                            (dh, dw), cols = (py, px, c)
      w2_ref   : (16*2*Cout, 4*Cout)   mxu  packed conv taps; rows = 4x4 cat patch (u, v)
                                            x [y, x_pre] channels, cols = (py, px, c)
      g*/b*    : (1, Cout)             f32  BN affine parameters
      o_ref    : (B*H, W*4*Cout)       f32  output, minor dim = (n, py, px, c)
    """
    f32 = jnp.float32
    M = B * H * W
    C2 = 2 * Cout
    dn2d = (((1,), (0,)), ((), ()))                 # contract lhs dim 1 with rhs dim 0

    def matmul(lhs, w_ref):
        # One fused MXU call per conv: bf16 operands, f32 accumulation.
        return jax.lax.dot_general(lhs.astype(mxu_dtype), w_ref[...],
                                   dimension_numbers=dn2d,
                                   preferred_element_type=f32)

    def bn_relu(v, g, b):
        # Training-mode BatchNorm2d over all N*(2H)*(2W) positions (= rows x 4 phase
        # column blocks), biased variance, eps inside rsqrt -- matches PyTorch.
        # Single pass: per-column sum & sum-of-squares, then fold the 4 phase blocks.
        s = jnp.sum(v, axis=0, keepdims=True)          # (1, 4*Cout)
        q = jnp.sum(v * v, axis=0, keepdims=True)      # (1, 4*Cout)
        s_c, q_c = s[:, :Cout], q[:, :Cout]
        for p in range(1, 4):
            s_c = s_c + s[:, p * Cout:(p + 1) * Cout]
            q_c = q_c + q[:, p * Cout:(p + 1) * Cout]
        n = 4.0 * M
        mean = s_c / n
        var = jnp.maximum(q_c / n - mean * mean, 0.0)
        scale = jax.lax.rsqrt(var + eps) * g            # (1, Cout)
        shift = b - mean * scale
        scale4 = jnp.concatenate([scale] * 4, axis=1)   # hoisted once, reused by all phases
        shift4 = jnp.concatenate([shift] * 4, axis=1)
        return jnp.maximum(v * scale4 + shift4, 0.0)

    # ---- stage 1: polyphase transposed conv, all 4 phases in ONE matmul -------------
    # ConvTranspose2d(k=3, s=2, p=1, op=1): output pixel (2m+py, 2n+px) only reads the
    # 2x2 input window x[m..m+1, n..n+1] (x zero-padded by one row/col at bottom/right);
    # the per-(window, phase) taps were packed into w1 on the host.
    xv = x_ref[...]
    xp = jnp.concatenate([xv, jnp.zeros((B, 1, W, Cin), f32)], axis=1)
    xp = jnp.concatenate([xp, jnp.zeros((B, H + 1, 1, Cin), f32)], axis=2)
    lhs1 = jnp.concatenate(
        [xp[:, dh:dh + H, dw:dw + W, :] for dh in range(2) for dw in range(2)],
        axis=-1).reshape(M, 4 * Cin)
    y = bn_relu(matmul(lhs1, w1_ref), g1_ref[...], b1_ref[...])      # (M, 4*Cout) f32

    # ---- stage 2: 3x3 conv over concat(y, x_pre), all 4 phases in ONE matmul --------
    # The "concat" is a value-level channel concat per phase; the conv's zero padding is
    # a 1-pixel zero halo (in phase space) around each per-phase cat value.
    zrow = jnp.zeros((B, 1, W, C2), f32)
    zcol = jnp.zeros((B, H + 2, 1, C2), f32)
    cat_pads = []
    for p in range(4):
        c = jnp.concatenate(
            [y[:, p * Cout:(p + 1) * Cout].reshape(B, H, W, Cout),
             xpre_ref[p * B:(p + 1) * B, :, :, :]], axis=-1)          # (B, H, W, 2*Cout)
        c = jnp.concatenate([zrow, c, zrow], axis=1)
        c = jnp.concatenate([zcol, c, zcol], axis=2)                  # (B, H+2, W+2, 2*Cout)
        cat_pads.append(c)

    # All 4 output phases at (m, n) read the shared 4x4 patch cat[2m-1:2m+3, 2n-1:2n+3];
    # patch offset (u, v) lives in phase (u%2, v%2) at phase-space offset (u//2, v//2).
    # im2col over the 16 patch positions -> K = 16*2*Cout; per-phase zero weight blocks
    # in w2 drop the 7 taps each phase does not use.
    patches = []
    for u in range(-1, 3):
        qy, ty = u % 2, u // 2
        for v in range(-1, 3):
            qx, tx = v % 2, v // 2
            patches.append(
                cat_pads[2 * qy + qx][:, 1 + ty:1 + ty + H, 1 + tx:1 + tx + W, :])
    lhs2 = jnp.concatenate(patches, axis=-1).reshape(M, 16 * C2)
    z = bn_relu(matmul(lhs2, w2_ref), g2_ref[...], b2_ref[...])       # (M, 4*Cout) f32

    # ---- lane-dense output store: fold (n, phase, channel) into the minor dim -------
    z3 = z.reshape(B * H, W, 4 * Cout)
    o_ref[...] = jnp.concatenate(
        [z3[:, n:n + 1, :] for n in range(W)], axis=-1).reshape(B * H, W * 4 * Cout)


# -----------------------------------------------------------------------------
# Host wrapper
# -----------------------------------------------------------------------------
def deconv2d_block_forward(x_pre_nchw, x_nchw, params, *, eps=1e-5,
                           matmul_dtype=jnp.bfloat16):
    """Deconv2dBlock.forward.  External interface is NCHW (PyTorch convention)."""
    B, Cin, H, W = x_nchw.shape
    Cout = params["w_deconv"].shape[1]
    C2 = 2 * Cout
    assert x_pre_nchw.shape == (B, Cout, 2 * H, 2 * W), x_pre_nchw.shape

    # ---- layout glue (NCHW -> NHWC, x_pre subpixel-phase split); host-side, tiny ----
    x_nhwc = jnp.transpose(x_nchw, (0, 2, 3, 1)).astype(jnp.float32)
    x_pre = jnp.transpose(x_pre_nchw, (0, 2, 3, 1))
    x_pre_ph = (x_pre.reshape(B, H, 2, W, 2, Cout)
                .transpose(2, 4, 0, 1, 3, 5)
                .reshape(4 * B, H, W, Cout)).astype(jnp.float32)

    # ---- pack conv taps into the two fused matmul RHS matrices (host, one-off) ------
    # Deconv: output phase (py,px) at (m,n) uses input window (dh,dw) with kernel tap
    # (kh,kw) iff 2m+py = 2(m+dh) + kh - 1 (pad=1, stride=2), same for the px axis.
    w_dc = jnp.transpose(params["w_deconv"], (2, 3, 0, 1))            # (3,3,Cin,Cout)
    taps = ([(0, 1)], [(0, 2), (1, 0)])                               # (d, k) per parity
    w1 = jnp.zeros((4 * Cin, 4 * Cout), jnp.float32)
    for py in range(2):
        for px in range(2):
            p = 2 * py + px
            for dh, kh in taps[py]:
                for dw, kw in taps[px]:
                    widx = 2 * dh + dw
                    w1 = w1.at[widx * Cin:(widx + 1) * Cin,
                               p * Cout:(p + 1) * Cout].set(w_dc[kh, kw])
    # Second conv: output phase (py,px), tap (a,b) reads cat patch offset
    # (u, v) = (py+a-1, px+b-1); patch index = 4*(u+1) + (v+1).
    w2_hwio = jnp.transpose(params["w_conv"], (2, 3, 1, 0))           # (3,3,2*Cout,Cout)
    w2 = jnp.zeros((16 * C2, 4 * Cout), jnp.float32)
    for py in range(2):
        for px in range(2):
            p = 2 * py + px
            for a in range(3):
                for b in range(3):
                    patch = 4 * (py + a) + (px + b)
                    w2 = w2.at[patch * C2:(patch + 1) * C2,
                               p * Cout:(p + 1) * Cout].set(w2_hwio[a, b])
    w1 = w1.astype(matmul_dtype)
    w2 = w2.astype(matmul_dtype)
    g1 = params["gamma1"].reshape(1, Cout).astype(jnp.float32)
    b1 = params["beta1"].reshape(1, Cout).astype(jnp.float32)
    g2 = params["gamma2"].reshape(1, Cout).astype(jnp.float32)
    b2 = params["beta2"].reshape(1, Cout).astype(jnp.float32)

    kernel = functools.partial(
        _fused_deconv_block_kernel,
        B=B, H=H, W=W, Cin=Cin, Cout=Cout, eps=eps, mxu_dtype=matmul_dtype)

    # Single grid point: the whole problem fits in VMEM at these sizes, so the default
    # whole-array BlockSpecs (one contiguous DMA per operand) are used.
    out2d = pl.pallas_call(
        kernel,
        out_shape=jax.ShapeDtypeStruct((B * H, W * 4 * Cout), jnp.float32),
        compiler_params=pltpu.CompilerParams(vmem_limit_bytes=32 * 1024 * 1024),
    )(x_nhwc, x_pre_ph, w1, w2, g1, b1, g2, b2)

    # ---- reassemble flat (b, m, n, py, px, c) -> NCHW (host-side, a few KiB) --------
    out = (out2d.reshape(B, H, W, 2, 2, Cout)
           .transpose(0, 5, 1, 3, 2, 4)                               # (B, C, H, py, W, px)
           .reshape(B, Cout, 2 * H, 2 * W))
    return out


# -----------------------------------------------------------------------------
# Pure-JAX/XLA reference (mirrors PyTorch semantics) used only for verification
# -----------------------------------------------------------------------------
def _reference_forward(x_pre_nchw, x_nchw, params, eps=1e-5):
    w_t = params["w_deconv"]                       # (Cin, Cout, 3, 3)
    B, Cin, H, W = x_nchw.shape

    # ConvTranspose2d(k=3, s=2, p=1, op=1) == lhs-dilated conv with the flipped kernel.
    w_eq = jnp.transpose(w_t, (1, 0, 2, 3))[:, :, ::-1, ::-1]         # (Cout, Cin, 3, 3)
    y = jax.lax.conv_general_dilated(
        x_nchw, w_eq, window_strides=(1, 1), padding=((1, 2), (1, 2)),
        lhs_dilation=(2, 2), dimension_numbers=("NCHW", "OIHW", "NCHW"),
        precision=jax.lax.Precision.HIGHEST)
    y = y[:, :, :2 * H, :2 * W]                    # PyTorch crop (no-op here)

    def bn_relu(t, g, b):
        mean = jnp.mean(t, axis=(0, 2, 3), keepdims=True)
        var = jnp.mean((t - mean) ** 2, axis=(0, 2, 3), keepdims=True)
        t = (t - mean) * jax.lax.rsqrt(var + eps)
        t = t * g.reshape(1, -1, 1, 1) + b.reshape(1, -1, 1, 1)
        return jnp.maximum(t, 0.0)

    y = bn_relu(y, params["gamma1"], params["beta1"])
    cat = jnp.concatenate([y, x_pre_nchw], axis=1)
    z = jax.lax.conv_general_dilated(
        cat, params["w_conv"], window_strides=(1, 1), padding=((1, 1), (1, 1)),
        dimension_numbers=("NCHW", "OIHW", "NCHW"),
        precision=jax.lax.Precision.HIGHEST)
    return bn_relu(z, params["gamma2"], params["beta2"])


# -----------------------------------------------------------------------------
# Main
# -----------------------------------------------------------------------------
if __name__ == "__main__":
    B, in_channels, out_channels = 2, 8, 4
    H = W = 8                                   # low-res input; x_pre / output are 2H x 2W

    key = jax.random.PRNGKey(0)
    ks = jax.random.split(key, 8)
    params = {
        # ConvTranspose2d weight: (in_channels, out_channels, 3, 3), bias=False
        "w_deconv": 0.1 * jax.random.normal(ks[0], (in_channels, out_channels, 3, 3), jnp.float32),
        "gamma1": 1.0 + 0.1 * jax.random.normal(ks[1], (out_channels,), jnp.float32),
        "beta1": 0.1 * jax.random.normal(ks[2], (out_channels,), jnp.float32),
        # Conv2d weight: (out_channels, 2*out_channels, 3, 3), bias=False
        "w_conv": 0.1 * jax.random.normal(ks[3], (out_channels, 2 * out_channels, 3, 3), jnp.float32),
        "gamma2": 1.0 + 0.1 * jax.random.normal(ks[4], (out_channels,), jnp.float32),
        "beta2": 0.1 * jax.random.normal(ks[5], (out_channels,), jnp.float32),
    }
    x = jax.random.normal(ks[6], (B, in_channels, H, W), jnp.float32)
    x_pre = jax.random.normal(ks[7], (B, out_channels, 2 * H, 2 * W), jnp.float32)

    ref = _reference_forward(x_pre, x, params)

    # f32-MXU variant: tight numerical check of the fused polyphase / fused-K math.
    fwd_f32 = jax.jit(functools.partial(deconv2d_block_forward, matmul_dtype=jnp.float32))
    out_f32 = jax.block_until_ready(fwd_f32(x_pre, x, params))
    assert out_f32.shape == (B, out_channels, 2 * H, 2 * W), out_f32.shape
    err_f32 = float(jnp.max(jnp.abs(out_f32 - ref)))
    assert err_f32 < 5e-3, f"f32 kernel mismatch vs reference: {err_f32}"

    # bf16-MXU variant (default): configuration intended for v5e / v6e / v7x.
    fwd = jax.jit(deconv2d_block_forward)
    out = jax.block_until_ready(fwd(x_pre, x, params))
    assert out.shape == (B, out_channels, 2 * H, 2 * W), out.shape
    assert out.dtype == jnp.float32
    assert bool(jnp.all(jnp.isfinite(out)))
    assert bool(jnp.all(out >= 0.0))            # ReLU epilogue
    err_bf16 = float(jnp.max(jnp.abs(out - ref)))
    assert err_bf16 < 0.25, f"bf16 kernel mismatch vs reference: {err_bf16}"

    print("KERNEL_OK")
</pallas_src>

<mosaic_0001>
module attributes {stable_mosaic.version = 11 : i64} {
  func.func @_fused_deconv_block_kernel(%arg0: memref<2x8x8x8xf32, #tpu.memory_space<vmem>>, %arg1: memref<8x8x8x4xf32, #tpu.memory_space<vmem>>, %arg2: memref<32x16xf32, #tpu.memory_space<vmem>>, %arg3: memref<128x16xf32, #tpu.memory_space<vmem>>, %arg4: memref<1x4xf32, #tpu.memory_space<vmem>>, %arg5: memref<1x4xf32, #tpu.memory_space<vmem>>, %arg6: memref<1x4xf32, #tpu.memory_space<vmem>>, %arg7: memref<1x4xf32, #tpu.memory_space<vmem>>, %arg8: memref<16x128xf32, #tpu.memory_space<vmem>>) attributes {dimension_semantics = [], scalar_prefetch = 0 : i64, scratch_operands = 0 : i64, tpu.core_type = #tpu.core_type<tc>} {
    %c0 = arith.constant 0 : index
    %c0_0 = arith.constant 0 : index
    %c0_1 = arith.constant 0 : index
    %c0_2 = arith.constant 0 : index
    %0 = vector.load %arg0[%c0, %c0_0, %c0_1, %c0_2] : memref<2x8x8x8xf32, #tpu.memory_space<vmem>>, vector<2x8x8x8xf32>
    %cst = arith.constant 0.000000e+00 : f32
    %1 = vector.broadcast %cst : f32 to vector<2x1x8x8xf32>
    %2 = tpu.concatenate %0, %1 in 1 : vector<2x8x8x8xf32>, vector<2x1x8x8xf32> -> vector<2x9x8x8xf32>
    %cst_3 = arith.constant 0.000000e+00 : f32
    %3 = vector.broadcast %cst_3 : f32 to vector<2x9x1x8xf32>
    %4 = tpu.concatenate %2, %3 in 2 : vector<2x9x8x8xf32>, vector<2x9x1x8xf32> -> vector<2x9x9x8xf32>
    %5 = vector.extract_strided_slice %4 {offsets = [0, 0, 0, 0], sizes = [2, 8, 8, 8], strides = [1, 1, 1, 1]} : vector<2x9x9x8xf32> to vector<2x8x8x8xf32>
    %6 = vector.extract_strided_slice %4 {offsets = [0, 0, 1, 0], sizes = [2, 8, 8, 8], strides = [1, 1, 1, 1]} : vector<2x9x9x8xf32> to vector<2x8x8x8xf32>
    %7 = vector.extract_strided_slice %4 {offsets = [0, 1, 0, 0], sizes = [2, 8, 8, 8], strides = [1, 1, 1, 1]} : vector<2x9x9x8xf32> to vector<2x8x8x8xf32>
    %8 = vector.extract_strided_slice %4 {offsets = [0, 1, 1, 0], sizes = [2, 8, 8, 8], strides = [1, 1, 1, 1]} : vector<2x9x9x8xf32> to vector<2x8x8x8xf32>
    %9 = tpu.concatenate %5, %6, %7, %8 in 3 : vector<2x8x8x8xf32>, vector<2x8x8x8xf32>, vector<2x8x8x8xf32>, vector<2x8x8x8xf32> -> vector<2x8x8x32xf32>
    %10 = vector.shape_cast %9 : vector<2x8x8x32xf32> to vector<128x32xf32>
    %c0_4 = arith.constant 0 : index
    %c0_5 = arith.constant 0 : index
    %11 = vector.load %arg2[%c0_4, %c0_5] : memref<32x16xf32, #tpu.memory_space<vmem>>, vector<32x16xf32>
    %cst_6 = arith.constant dense<0.000000e+00> : vector<128x16xf32>
    %12 = tpu.matmul %10, %11, %cst_6 {dimension_numbers = #tpu.dot_dimension_numbers<[1], [0], [0], [1], [0, 0, 1, 1], [], []>} : vector<128x32xf32>, vector<32x16xf32>, vector<128x16xf32> -> vector<128x16xf32>
    %c0_7 = arith.constant 0 : index
    %c0_8 = arith.constant 0 : index
    %13 = vector.load %arg4[%c0_7, %c0_8] : memref<1x4xf32, #tpu.memory_space<vmem>>, vector<1x4xf32>
    %c0_9 = arith.constant 0 : index
    %c0_10 = arith.constant 0 : index
    %14 = vector.load %arg5[%c0_9, %c0_10] : memref<1x4xf32, #tpu.memory_space<vmem>>, vector<1x4xf32>
    %cst_11 = arith.constant dense<0.000000e+00> : vector<16xf32>
    %15 = vector.multi_reduction <add>, %12, %cst_11 [0] : vector<128x16xf32> to vector<16xf32>
    %16 = vector.shape_cast %15 : vector<16xf32> to vector<1x16xf32>
    %17 = arith.mulf %12, %12 : vector<128x16xf32>
    %cst_12 = arith.constant dense<0.000000e+00> : vector<16xf32>
    %18 = vector.multi_reduction <add>, %17, %cst_12 [0] : vector<128x16xf32> to vector<16xf32>
    %19 = vector.shape_cast %18 : vector<16xf32> to vector<1x16xf32>
    %20 = vector.extract_strided_slice %16 {offsets = [0, 0], sizes = [1, 4], strides = [1, 1]} : vector<1x16xf32> to vector<1x4xf32>
    %21 = vector.extract_strided_slice %19 {offsets = [0, 0], sizes = [1, 4], strides = [1, 1]} : vector<1x16xf32> to vector<1x4xf32>
    %22 = vector.extract_strided_slice %16 {offsets = [0, 4], sizes = [1, 4], strides = [1, 1]} : vector<1x16xf32> to vector<1x4xf32>
    %23 = arith.addf %20, %22 : vector<1x4xf32>
    %24 = vector.extract_strided_slice %19 {offsets = [0, 4], sizes = [1, 4], strides = [1, 1]} : vector<1x16xf32> to vector<1x4xf32>
    %25 = arith.addf %21, %24 : vector<1x4xf32>
    %26 = vector.extract_strided_slice %16 {offsets = [0, 8], sizes = [1, 4], strides = [1, 1]} : vector<1x16xf32> to vector<1x4xf32>
    %27 = arith.addf %23, %26 : vector<1x4xf32>
    %28 = vector.extract_strided_slice %19 {offsets = [0, 8], sizes = [1, 4], strides = [1, 1]} : vector<1x16xf32> to vector<1x4xf32>
    %29 = arith.addf %25, %28 : vector<1x4xf32>
    %30 = vector.extract_strided_slice %16 {offsets = [0, 12], sizes = [1, 4], strides = [1, 1]} : vector<1x16xf32> to vector<1x4xf32>
    %31 = arith.addf %27, %30 : vector<1x4xf32>
    %32 = vector.extract_strided_slice %19 {offsets = [0, 12], sizes = [1, 4], strides = [1, 1]} : vector<1x16xf32> to vector<1x4xf32>
    %33 = arith.addf %29, %32 : vector<1x4xf32>
    %cst_13 = arith.constant 5.120000e+02 : f32
    %34 = vector.broadcast %cst_13 : f32 to vector<1x4xf32>
    %35 = arith.divf %31, %34 : vector<1x4xf32>
    %cst_14 = arith.constant 5.120000e+02 : f32
    %36 = vector.broadcast %cst_14 : f32 to vector<1x4xf32>
    %37 = arith.divf %33, %36 : vector<1x4xf32>
    %38 = arith.mulf %35, %35 : vector<1x4xf32>
    %39 = arith.subf %37, %38 : vector<1x4xf32>
    %cst_15 = arith.constant 0.000000e+00 : f32
    %40 = vector.broadcast %cst_15 : f32 to vector<1x4xf32>
    %41 = arith.maximumf %39, %40 : vector<1x4xf32>
    %cst_16 = arith.constant 9.99999974E-6 : f32
    %42 = vector.broadcast %cst_16 : f32 to vector<1x4xf32>
    %43 = arith.addf %41, %42 : vector<1x4xf32>
    %44 = math.rsqrt %43 : vector<1x4xf32>
    %45 = arith.mulf %44, %13 : vector<1x4xf32>
    %46 = arith.mulf %35, %45 : vector<1x4xf32>
    %47 = arith.subf %14, %46 : vector<1x4xf32>
    %48 = tpu.concatenate %45, %45, %45, %45 in 1 : vector<1x4xf32>, vector<1x4xf32>, vector<1x4xf32>, vector<1x4xf32> -> vector<1x16xf32>
    %49 = tpu.concatenate %47, %47, %47, %47 in 1 : vector<1x4xf32>, vector<1x4xf32>, vector<1x4xf32>, vector<1x4xf32> -> vector<1x16xf32>
    %50 = vector.broadcast %48 : vector<1x16xf32> to vector<128x16xf32>
    %51 = arith.mulf %12, %50 : vector<128x16xf32>
    %52 = vector.broadcast %49 : vector<1x16xf32> to vector<128x16xf32>
    %53 = arith.addf %51, %52 : vector<128x16xf32>
    %cst_17 = arith.constant 0.000000e+00 : f32
    %54 = vector.broadcast %cst_17 : f32 to vector<128x16xf32>
    %55 = arith.maximumf %53, %54 : vector<128x16xf32>
    %cst_18 = arith.constant 0.000000e+00 : f32
    %56 = vector.broadcast %cst_18 : f32 to vector<2x1x8x8xf32>
    %cst_19 = arith.constant 0.000000e+00 : f32
    %57 = vector.broadcast %cst_19 : f32 to vector<2x10x1x8xf32>
    %58 = vector.extract_strided_slice %55 {offsets = [0, 0], sizes = [128, 4], strides = [1, 1]} : vector<128x16xf32> to vector<128x4xf32>
    %59 = vector.shape_cast %58 : vector<128x4xf32> to vector<2x8x8x4xf32>
    %c0_20 = arith.constant 0 : index
    %c0_21 = arith.constant 0 : index
    %c0_22 = arith.constant 0 : index
    %c0_23 = arith.constant 0 : index
    %60 = vector.load %arg1[%c0_20, %c0_21, %c0_22, %c0_23] : memref<8x8x8x4xf32, #tpu.memory_space<vmem>>, vector<2x8x8x4xf32>
    %61 = tpu.concatenate %59, %60 in 3 : vector<2x8x8x4xf32>, vector<2x8x8x4xf32> -> vector<2x8x8x8xf32>
    %62 = tpu.concatenate %56, %61, %56 in 1 : vector<2x1x8x8xf32>, vector<2x8x8x8xf32>, vector<2x1x8x8xf32> -> vector<2x10x8x8xf32>
    %63 = tpu.concatenate %57, %62, %57 in 2 : vector<2x10x1x8xf32>, vector<2x10x8x8xf32>, vector<2x10x1x8xf32> -> vector<2x10x10x8xf32>
    %64 = vector.extract_strided_slice %55 {offsets = [0, 4], sizes = [128, 4], strides = [1, 1]} : vector<128x16xf32> to vector<128x4xf32>
    %65 = vector.shape_cast %64 : vector<128x4xf32> to vector<2x8x8x4xf32>
    %c2 = arith.constant 2 : index
    %c0_24 = arith.constant 0 : index
    %c0_25 = arith.constant 0 : index
    %c0_26 = arith.constant 0 : index
    %66 = vector.load %arg1[%c2, %c0_24, %c0_25, %c0_26] : memref<8x8x8x4xf32, #tpu.memory_space<vmem>>, vector<2x8x8x4xf32>
    %67 = tpu.concatenate %65, %66 in 3 : vector<2x8x8x4xf32>, vector<2x8x8x4xf32> -> vector<2x8x8x8xf32>
    %68 = tpu.concatenate %56, %67, %56 in 1 : vector<2x1x8x8xf32>, vector<2x8x8x8xf32>, vector<2x1x8x8xf32> -> vector<2x10x8x8xf32>
    %69 = tpu.concatenate %57, %68, %57 in 2 : vector<2x10x1x8xf32>, vector<2x10x8x8xf32>, vector<2x10x1x8xf32> -> vector<2x10x10x8xf32>
    %70 = vector.extract_strided_slice %55 {offsets = [0, 8], sizes = [128, 4], strides = [1, 1]} : vector<128x16xf32> to vector<128x4xf32>
    %71 = vector.shape_cast %70 : vector<128x4xf32> to vector<2x8x8x4xf32>
    %c4 = arith.constant 4 : index
    %c0_27 = arith.constant 0 : index
    %c0_28 = arith.constant 0 : index
    %c0_29 = arith.constant 0 : index
    %72 = vector.load %arg1[%c4, %c0_27, %c0_28, %c0_29] : memref<8x8x8x4xf32, #tpu.memory_space<vmem>>, vector<2x8x8x4xf32>
    %73 = tpu.concatenate %71, %72 in 3 : vector<2x8x8x4xf32>, vector<2x8x8x4xf32> -> vector<2x8x8x8xf32>
    %74 = tpu.concatenate %56, %73, %56 in 1 : vector<2x1x8x8xf32>, vector<2x8x8x8xf32>, vector<2x1x8x8xf32> -> vector<2x10x8x8xf32>
    %75 = tpu.concatenate %57, %74, %57 in 2 : vector<2x10x1x8xf32>, vector<2x10x8x8xf32>, vector<2x10x1x8xf32> -> vector<2x10x10x8xf32>
    %76 = vector.extract_strided_slice %55 {offsets = [0, 12], sizes = [128, 4], strides = [1, 1]} : vector<128x16xf32> to vector<128x4xf32>
    %77 = vector.shape_cast %76 : vector<128x4xf32> to vector<2x8x8x4xf32>
    %c6 = arith.constant 6 : index
    %c0_30 = arith.constant 0 : index
    %c0_31 = arith.constant 0 : index
    %c0_32 = arith.constant 0 : index
    %78 = vector.load %arg1[%c6, %c0_30, %c0_31, %c0_32] : memref<8x8x8x4xf32, #tpu.memory_space<vmem>>, vector<2x8x8x4xf32>
    %79 = tpu.concatenate %77, %78 in 3 : vector<2x8x8x4xf32>, vector<2x8x8x4xf32> -> vector<2x8x8x8xf32>
    %80 = tpu.concatenate %56, %79, %56 in 1 : vector<2x1x8x8xf32>, vector<2x8x8x8xf32>, vector<2x1x8x8xf32> -> vector<2x10x8x8xf32>
    %81 = tpu.concatenate %57, %80, %57 in 2 : vector<2x10x1x8xf32>, vector<2x10x8x8xf32>, vector<2x10x1x8xf32> -> vector<2x10x10x8xf32>
    %82 = vector.extract_strided_slice %81 {offsets = [0, 0, 0, 0], sizes = [2, 8, 8, 8], strides = [1, 1, 1, 1]} : vector<2x10x10x8xf32> to vector<2x8x8x8xf32>
    %83 = vector.extract_strided_slice %75 {offsets = [0, 0, 1, 0], sizes = [2, 8, 8, 8], strides = [1, 1, 1, 1]} : vector<2x10x10x8xf32> to vector<2x8x8x8xf32>
    %84 = vector.extract_strided_slice %81 {offsets = [0, 0, 1, 0], sizes = [2, 8, 8, 8], strides = [1, 1, 1, 1]} : vector<2x10x10x8xf32> to vector<2x8x8x8xf32>
    %85 = vector.extract_strided_slice %75 {offsets = [0, 0, 2, 0], sizes = [2, 8, 8, 8], strides = [1, 1, 1, 1]} : vector<2x10x10x8xf32> to vector<2x8x8x8xf32>
    %86 = vector.extract_strided_slice %69 {offsets = [0, 1, 0, 0], sizes = [2, 8, 8, 8], strides = [1, 1, 1, 1]} : vector<2x10x10x8xf32> to vector<2x8x8x8xf32>
    %87 = vector.extract_strided_slice %63 {offsets = [0, 1, 1, 0], sizes = [2, 8, 8, 8], strides = [1, 1, 1, 1]} : vector<2x10x10x8xf32> to vector<2x8x8x8xf32>
    %88 = vector.extract_strided_slice %69 {offsets = [0, 1, 1, 0], sizes = [2, 8, 8, 8], strides = [1, 1, 1, 1]} : vector<2x10x10x8xf32> to vector<2x8x8x8xf32>
    %89 = vector.extract_strided_slice %63 {offsets = [0, 1, 2, 0], sizes = [2, 8, 8, 8], strides = [1, 1, 1, 1]} : vector<2x10x10x8xf32> to vector<2x8x8x8xf32>
    %90 = vector.extract_strided_slice %81 {offsets = [0, 1, 0, 0], sizes = [2, 8, 8, 8], strides = [1, 1, 1, 1]} : vector<2x10x10x8xf32> to vector<2x8x8x8xf32>
    %91 = vector.extract_strided_slice %75 {offsets = [0, 1, 1, 0], sizes = [2, 8, 8, 8], strides = [1, 1, 1, 1]} : vector<2x10x10x8xf32> to vector<2x8x8x8xf32>
    %92 = vector.extract_strided_slice %81 {offsets = [0, 1, 1, 0], sizes = [2, 8, 8, 8], strides = [1, 1, 1, 1]} : vector<2x10x10x8xf32> to vector<2x8x8x8xf32>
    %93 = vector.extract_strided_slice %75 {offsets = [0, 1, 2, 0], sizes = [2, 8, 8, 8], strides = [1, 1, 1, 1]} : vector<2x10x10x8xf32> to vector<2x8x8x8xf32>
    %94 = vector.extract_strided_slice %69 {offsets = [0, 2, 0, 0], sizes = [2, 8, 8, 8], strides = [1, 1, 1, 1]} : vector<2x10x10x8xf32> to vector<2x8x8x8xf32>
    %95 = vector.extract_strided_slice %63 {offsets = [0, 2, 1, 0], sizes = [2, 8, 8, 8], strides = [1, 1, 1, 1]} : vector<2x10x10x8xf32> to vector<2x8x8x8xf32>
    %96 = vector.extract_strided_slice %69 {offsets = [0, 2, 1, 0], sizes = [2, 8, 8, 8], strides = [1, 1, 1, 1]} : vector<2x10x10x8xf32> to vector<2x8x8x8xf32>
    %97 = vector.extract_strided_slice %63 {offsets = [0, 2, 2, 0], sizes = [2, 8, 8, 8], strides = [1, 1, 1, 1]} : vector<2x10x10x8xf32> to vector<2x8x8x8xf32>
    %98 = tpu.concatenate %82, %83, %84, %85, %86, %87, %88, %89, %90, %91, %92, %93, %94, %95, %96, %97 in 3 : vector<2x8x8x8xf32>, vector<2x8x8x8xf32>, vector<2x8x8x8xf32>, vector<2x8x8x8xf32>, vector<2x8x8x8xf32>, vector<2x8x8x8xf32>, vector<2x8x8x8xf32>, vector<2x8x8x8xf32>, vector<2x8x8x8xf32>, vector<2x8x8x8xf32>, vector<2x8x8x8xf32>, vector<2x8x8x8xf32>, vector<2x8x8x8xf32>, vector<2x8x8x8xf32>, vector<2x8x8x8xf32>, vector<2x8x8x8xf32> -> vector<2x8x8x128xf32>
    %99 = vector.shape_cast %98 : vector<2x8x8x128xf32> to vector<128x128xf32>
    %c0_33 = arith.constant 0 : index
    %c0_34 = arith.constant 0 : index
    %100 = vector.load %arg3[%c0_33, %c0_34] : memref<128x16xf32, #tpu.memory_space<vmem>>, vector<128x16xf32>
    %cst_35 = arith.constant dense<0.000000e+00> : vector<128x16xf32>
    %101 = tpu.matmul %99, %100, %cst_35 {dimension_numbers = #tpu.dot_dimension_numbers<[1], [0], [0], [1], [0, 0, 1, 1], [], []>} : vector<128x128xf32>, vector<128x16xf32>, vector<128x16xf32> -> vector<128x16xf32>
    %c0_36 = arith.constant 0 : index
    %c0_37 = arith.constant 0 : index
    %102 = vector.load %arg6[%c0_36, %c0_37] : memref<1x4xf32, #tpu.memory_space<vmem>>, vector<1x4xf32>
    %c0_38 = arith.constant 0 : index
    %c0_39 = arith.constant 0 : index
    %103 = vector.load %arg7[%c0_38, %c0_39] : memref<1x4xf32, #tpu.memory_space<vmem>>, vector<1x4xf32>
    %cst_40 = arith.constant dense<0.000000e+00> : vector<16xf32>
    %104 = vector.multi_reduction <add>, %101, %cst_40 [0] : vector<128x16xf32> to vector<16xf32>
    %105 = vector.shape_cast %104 : vector<16xf32> to vector<1x16xf32>
    %106 = arith.mulf %101, %101 : vector<128x16xf32>
    %cst_41 = arith.constant dense<0.000000e+00> : vector<16xf32>
    %107 = vector.multi_reduction <add>, %106, %cst_41 [0] : vector<128x16xf32> to vector<16xf32>
    %108 = vector.shape_cast %107 : vector<16xf32> to vector<1x16xf32>
    %109 = vector.extract_strided_slice %105 {offsets = [0, 0], sizes = [1, 4], strides = [1, 1]} : vector<1x16xf32> to vector<1x4xf32>
    %110 = vector.extract_strided_slice %108 {offsets = [0, 0], sizes = [1, 4], strides = [1, 1]} : vector<1x16xf32> to vector<1x4xf32>
    %111 = vector.extract_strided_slice %105 {offsets = [0, 4], sizes = [1, 4], strides = [1, 1]} : vector<1x16xf32> to vector<1x4xf32>
    %112 = arith.addf %109, %111 : vector<1x4xf32>
    %113 = vector.extract_strided_slice %108 {offsets = [0, 4], sizes = [1, 4], strides = [1, 1]} : vector<1x16xf32> to vector<1x4xf32>
    %114 = arith.addf %110, %113 : vector<1x4xf32>
    %115 = vector.extract_strided_slice %105 {offsets = [0, 8], sizes = [1, 4], strides = [1, 1]} : vector<1x16xf32> to vector<1x4xf32>
    %116 = arith.addf %112, %115 : vector<1x4xf32>
    %117 = vector.extract_strided_slice %108 {offsets = [0, 8], sizes = [1, 4], strides = [1, 1]} : vector<1x16xf32> to vector<1x4xf32>
    %118 = arith.addf %114, %117 : vector<1x4xf32>
    %119 = vector.extract_strided_slice %105 {offsets = [0, 12], sizes = [1, 4], strides = [1, 1]} : vector<1x16xf32> to vector<1x4xf32>
    %120 = arith.addf %116, %119 : vector<1x4xf32>
    %121 = vector.extract_strided_slice %108 {offsets = [0, 12], sizes = [1, 4], strides = [1, 1]} : vector<1x16xf32> to vector<1x4xf32>
    %122 = arith.addf %118, %121 : vector<1x4xf32>
    %cst_42 = arith.constant 5.120000e+02 : f32
    %123 = vector.broadcast %cst_42 : f32 to vector<1x4xf32>
    %124 = arith.divf %120, %123 : vector<1x4xf32>
    %cst_43 = arith.constant 5.120000e+02 : f32
    %125 = vector.broadcast %cst_43 : f32 to vector<1x4xf32>
    %126 = arith.divf %122, %125 : vector<1x4xf32>
    %127 = arith.mulf %124, %124 : vector<1x4xf32>
    %128 = arith.subf %126, %127 : vector<1x4xf32>
    %cst_44 = arith.constant 0.000000e+00 : f32
    %129 = vector.broadcast %cst_44 : f32 to vector<1x4xf32>
    %130 = arith.maximumf %128, %129 : vector<1x4xf32>
    %cst_45 = arith.constant 9.99999974E-6 : f32
    %131 = vector.broadcast %cst_45 : f32 to vector<1x4xf32>
    %132 = arith.addf %130, %131 : vector<1x4xf32>
    %133 = math.rsqrt %132 : vector<1x4xf32>
    %134 = arith.mulf %133, %102 : vector<1x4xf32>
    %135 = arith.mulf %124, %134 : vector<1x4xf32>
    %136 = arith.subf %103, %135 : vector<1x4xf32>
    %137 = tpu.concatenate %134, %134, %134, %134 in 1 : vector<1x4xf32>, vector<1x4xf32>, vector<1x4xf32>, vector<1x4xf32> -> vector<1x16xf32>
    %138 = tpu.concatenate %136, %136, %136, %136 in 1 : vector<1x4xf32>, vector<1x4xf32>, vector<1x4xf32>, vector<1x4xf32> -> vector<1x16xf32>
    %139 = vector.broadcast %137 : vector<1x16xf32> to vector<128x16xf32>
    %140 = arith.mulf %101, %139 : vector<128x16xf32>
    %141 = vector.broadcast %138 : vector<1x16xf32> to vector<128x16xf32>
    %142 = arith.addf %140, %141 : vector<128x16xf32>
    %cst_46 = arith.constant 0.000000e+00 : f32
    %143 = vector.broadcast %cst_46 : f32 to vector<128x16xf32>
    %144 = arith.maximumf %142, %143 : vector<128x16xf32>
    %145 = vector.shape_cast %144 : vector<128x16xf32> to vector<16x8x16xf32>
    %146 = vector.extract_strided_slice %145 {offsets = [0, 0, 0], sizes = [16, 1, 16], strides = [1, 1, 1]} : vector<16x8x16xf32> to vector<16x1x16xf32>
    %147 = vector.extract_strided_slice %145 {offsets = [0, 1, 0], sizes = [16, 1, 16], strides = [1, 1, 1]} : vector<16x8x16xf32> to vector<16x1x16xf32>
    %148 = vector.extract_strided_slice %145 {offsets = [0, 2, 0], sizes = [16, 1, 16], strides = [1, 1, 1]} : vector<16x8x16xf32> to vector<16x1x16xf32>
    %149 = vector.extract_strided_slice %145 {offsets = [0, 3, 0], sizes = [16, 1, 16], strides = [1, 1, 1]} : vector<16x8x16xf32> to vector<16x1x16xf32>
    %150 = vector.extract_strided_slice %145 {offsets = [0, 4, 0], sizes = [16, 1, 16], strides = [1, 1, 1]} : vector<16x8x16xf32> to vector<16x1x16xf32>
    %151 = vector.extract_strided_slice %145 {offsets = [0, 5, 0], sizes = [16, 1, 16], strides = [1, 1, 1]} : vector<16x8x16xf32> to vector<16x1x16xf32>
    %152 = vector.extract_strided_slice %145 {offsets = [0, 6, 0], sizes = [16, 1, 16], strides = [1, 1, 1]} : vector<16x8x16xf32> to vector<16x1x16xf32>
    %153 = vector.extract_strided_slice %145 {offsets = [0, 7, 0], sizes = [16, 1, 16], strides = [1, 1, 1]} : vector<16x8x16xf32> to vector<16x1x16xf32>
    %154 = tpu.concatenate %146, %147, %148, %149, %150, %151, %152, %153 in 2 : vector<16x1x16xf32>, vector<16x1x16xf32>, vector<16x1x16xf32>, vector<16x1x16xf32>, vector<16x1x16xf32>, vector<16x1x16xf32>, vector<16x1x16xf32>, vector<16x1x16xf32> -> vector<16x1x128xf32>
    %155 = vector.shape_cast %154 : vector<16x1x128xf32> to vector<16x128xf32>
    %c0_47 = arith.constant 0 : index
    %c0_48 = arith.constant 0 : index
    %156 = vector.load %arg8[%c0_47, %c0_48] : memref<16x128xf32, #tpu.memory_space<vmem>>, vector<16x128xf32>
    tpu.vector_store %arg8[%c0_47, %c0_48], %155 {strides = array<i32>} : memref<16x128xf32, #tpu.memory_space<vmem>>, vector<16x128xf32>,
    return
  }
}

</mosaic_0001>

<bundles_post_ra>
// kernel: deconv2d_block_forward.1
= control target key start
LH: loop header
LB: loop body
LE: loop exit
PB: predicated region body
PF: predicated region fallthrough
CT: control target
= control target key end

     0   :  { %vm62_vm0 = vcmask 1046528   ;;  %v9411_v2 = vmov 0.0   ;;  %s5085_s11 = smov 16   ;;  %s5086_s14 = smov 8   ;;  %vm235_vm1 = vcmask 64512   ;;  %vm252_vm2 = vcmask 130048   ;;  %s9402_s0 = inlined_call_operand.vmem [shape: f32[2,8,8,8], index: 0, kind: input, shape index: {}]   ;;  %s9403_s2 = inlined_call_operand.vmem [shape: f32[32,16], index: 2, kind: input, shape index: {}]   ;;  %s9404_s1 = inlined_call_operand.vmem [shape: f32[8,8,8,4], index: 1, kind: input, shape index: {}]   ;;  %s9405_s4 = inlined_call_operand.vmem [shape: f32[1,4], index: 4, kind: input, shape index: {}]   ;;  %s9406_s5 = inlined_call_operand.vmem [shape: f32[1,4], index: 5, kind: input, shape index: {}]   ;;  %s9407_s3 = inlined_call_operand.vmem [shape: f32[128,16], index: 3, kind: input, shape index: {}]   ;;  %s9408_s6 = inlined_call_operand.vmem [shape: f32[1,4], index: 6, kind: input, shape index: {}]   ;;  %s9409_s7 = inlined_call_operand.vmem [shape: f32[1,4], index: 7, kind: input, shape index: {}]   ;;  %s9410_s8 = inlined_call_operand.vmem [shape: f32[16,128], index: 8, kind: output, shape index: {}]  }
   0x1   :  { %v5152_v0 = vld [vmem:[%s9402_s0 + $0x8] sm:$0xff]  ;;  %v5157_v1 = vld [vmem:[%s9402_s0] sm:$0xff]  ;;  %v5160_v3 = vrot.slane %v9411_v2, 1  ;;  %v5165_v4 = vld [vmem:[%s9402_s0 + $0x10] sm:$0xff]  ;;  %s5087_s23 = smov 24   ;;  %vm269_vm3 = vcmask 195584  }
   0x2   :  { %144 = vrot.lane.b32.xlu1 %v5152_v0, %s5085_s11  ;;  %v66_v5 = vrot.slane %v5152_v0, 1  ;;  %v63_v6 = vrot.slane %v5157_v1, 1  ;;  %v68_v7 = vrot.slane %v5165_v4, 1  ;;  %v5177_v9 = vld [vmem:[%s9402_s0 + $0x18] sm:$0xff]  ;;  %v286_v11 = vld [vmem:[%s9403_s2] sm:$0xff]  ;;  %v287_v14 = vld [vmem:[%s9403_s2 + $0x8] sm:$0xff] }
   0x3   :  { %v70_v13 = vrot.slane %v5177_v9, 1  ;;  %v288_v15 = vld [vmem:[%s9403_s2 + $0x10] sm:$0xff]  ;;  %v289_v16 = vld [vmem:[%s9403_s2 + $0x18] sm:$0xff]  ;;  %v4159_v17 = vpack.c.bf16 %v287_v14, %v286_v11  ;;  %v5206_v20 = vld [vmem:[%s9402_s0 + $0x20] sm:$0xff]  ;;  %vm290_vm4 = vcmask 261120   ;;  %s5088_s30 = smov 4  }
   0x4   :  { %v65_v8 = vsel %vm62_vm0, %v63_v6, %v5160_v3  ;;  %v67_v10 = vsel %vm62_vm0, %v66_v5, %v5160_v3  ;;  %v69_v12 = vsel %vm62_vm0, %v68_v7, %v5160_v3  ;;  %v4163_v18 = vpack.c.bf16 %v289_v16, %v288_v15  ;;  %v5214_v22 = vld [vmem:[%s9402_s0 + $0x28] sm:$0xff]  ;;  %v5230_v26 = vld [vmem:[%s9402_s0 + $0x30] sm:$0xff]  ;;  %v5238_v28 = vld [vmem:[%s9402_s0 + $0x38] sm:$0xff]  ;;  %s5090_s15 = smov 120   ;;  %s5091_s16 = smov 116  }
   0x5   :  { %96 = vrot.lane.b32.xlu0 %v65_v8, %s5086_s14  ;;  %v71_v19 = vsel %vm62_vm0, %v70_v13, %v5160_v3  ;;  %4160 = vmatprep.subr.bf16.mxu0 %v4159_v17  ;;  %v72_v21 = vrot.slane %v5206_v20, 1  ;;  %v74_v24 = vrot.slane %v5214_v22, 1  ;;  %v76_v27 = vrot.slane %v5230_v26, 1  ;;  %v5256_v32 = vld [vmem:[%s9402_s0 + $0x48] sm:$0xff]  ;;  %v5265_v34 = vld [vmem:[%s9402_s0 + $0x40] sm:$0xff]  ;;  %v5277_v37 = vld [vmem:[%s9402_s0 + $0x50] sm:$0xff] }
   0x6   :  { %146 = vrot.lane.b32.xlu1 %v5165_v4, %s5085_s11  ;;  %4162 = vmatpush3.bf16.msra.mxu0 %v4159_v17  ;;  %v78_v30 = vrot.slane %v5238_v28, 1  ;;  %v82_v33 = vrot.slane %v5256_v32, 1  ;;  %v80_v35 = vrot.slane %v5265_v34, 1  ;;  %v84_v39 = vrot.slane %v5277_v37, 1  ;;  %v5287_v40 = vld [vmem:[%s9402_s0 + $0x58] sm:$0xff]  ;;  %v5303_v44 = vld [vmem:[%s9402_s0 + $0x60] sm:$0xff] }
   0x7   :  { %4164 = vmatprep.subr.bf16.mxu0 %v4163_v18  ;;  %v73_v23 = vsel %vm62_vm0, %v72_v21, %v5160_v3  ;;  %v75_v25 = vsel %vm62_vm0, %v74_v24, %v5160_v3  ;;  %v77_v29 = vsel %vm62_vm0, %v76_v27, %v5160_v3  ;;  %v86_v42 = vrot.slane %v5287_v40, 1  ;;  %v5311_v46 = vld [vmem:[%s9402_s0 + $0x68] sm:$0xff]  ;;  %v5327_v50 = vld [vmem:[%s9402_s0 + $0x70] sm:$0xff]  ;;  %v5335_v52 = vld [vmem:[%s9402_s0 + $0x78] sm:$0xff]  ;;  %s5092_s21 = smov 12   ;;  %s5095_s22 = smov 104  }
   0x8   :  { %v79_v31 = vsel %vm62_vm0, %v78_v30, %v5160_v3  ;;  %v83_v36 = vsel %vm62_vm0, %v82_v33, %v5160_v3  ;;  %v81_v38 = vsel %vm62_vm0, %v80_v35, %v5160_v3  ;;  %v85_v41 = vsel %vm62_vm0, %v84_v39, %v5160_v3  ;;  %s5096_s24 = smov 32   ;;  %s5097_s25 = smov 64  }
   0x9   :  { %98 = vrot.lane.b32.xlu0 %v67_v10, %s5086_s14  ;;  %v87_v43 = vsel %vm62_vm0, %v86_v42, %v5160_v3  ;;  %v88_v45 = vrot.slane %v5303_v44, 1  ;;  %v90_v48 = vrot.slane %v5311_v46, 1  ;;  %v92_v51 = vrot.slane %v5327_v50, 1  ;;  %s5098_s2 = smov 96   ;;  %s5099_s17 = smov 48  }
   0xa   :  { %192 = vrot.lane.b32.xlu1 %v69_v12, %s5087_s23  ;;  %4166 = vmatpush3.bf16.msra.mxu0 %v4163_v18  ;;  %v94_v54 = vrot.slane %v5335_v52, 1  ;;  %vm623_vm5 = vcmask 31744   ;;  %vm9574_vm6 = vcmask 97280   ;;  %vm847_vm7 = vcmask 1040384   ;;  %s5101_s28 = smov 80   ;;  %s5103_s29 = smov 112  }
   0xb   :  { %v89_v47 = vsel %vm62_vm0, %v88_v45, %v5160_v3  ;;  %v91_v49 = vsel %vm62_vm0, %v90_v48, %v5160_v3  ;;  %v93_v53 = vsel %vm62_vm0, %v92_v51, %v5160_v3  ;;  %vm1808_vm8 = vcmask 1045504  }
   0xc   :  { %v95_v55 = vsel %vm62_vm0, %v94_v54, %v5160_v3  ;;  %vm2758_vm9 = vcmask 326656   ;;  %vm2775_vm10 = vcmask 392192   ;;  %vm2792_vm11 = vcmask 457728  }
   0xd   :  { %190 = vrot.lane.b32.xlu0 %v67_v10, %s5087_s23  ;;  %vm2809_vm12 = vcmask 523264   ;;  %vm2826_vm13 = vcmask 588800   ;;  %vm2843_vm14 = vcmask 654336   ;;  %vm2860_vm15 = vcmask 719872  }
   0xe   :  { %102 = vrot.lane.b32.xlu1 %v71_v19, %s5086_s14 }
  0x11   :  { %100 = vrot.lane.b32.xlu0 %v69_v12, %s5086_s14 }
  0x12   :  { %150 = vrot.lane.b32.xlu1 %v5206_v20, %s5085_s11 }
  0x15   :  { %148 = vrot.lane.b32.xlu0 %v5177_v9, %s5085_s11 }
  0x16   :  { %196 = vrot.lane.b32.xlu1 %v73_v23, %s5087_s23 }
  0x19   :  { %194 = vrot.lane.b32.xlu0 %v71_v19, %s5087_s23 }
  0x1a   :  { %106 = vrot.lane.b32.xlu1 %v75_v25, %s5086_s14 }
  0x1d   :  { %104 = vrot.lane.b32.xlu0 %v73_v23, %s5086_s14 }
  0x1e   :  { %154 = vrot.lane.b32.xlu1 %v5230_v26, %s5085_s11 }
  0x21   :  { %152 = vrot.lane.b32.xlu0 %v5214_v22, %s5085_s11 }
  0x22   :  { %200 = vrot.lane.b32.xlu1 %v77_v29, %s5087_s23 }
  0x25   :  { %198 = vrot.lane.b32.xlu0 %v75_v25, %s5087_s23 }
  0x26   :  { %110 = vrot.lane.b32.xlu1 %v79_v31, %s5086_s14 }
  0x29   :  { %108 = vrot.lane.b32.xlu0 %v77_v29, %s5086_s14 }
  0x2a   :  { %158 = vrot.lane.b32.xlu1 %v9411_v2, %s5085_s11 }
  0x2d   :  { %156 = vrot.lane.b32.xlu0 %v5238_v28, %s5085_s11 }
  0x2e   :  { %204 = vrot.lane.b32.xlu1 %v5160_v3, %s5087_s23 }
  0x31   :  { %202 = vrot.lane.b32.xlu0 %v79_v31, %s5087_s23 }
  0x32   :  { %114 = vrot.lane.b32.xlu1 %v83_v36, %s5086_s14 }
  0x35   :  { %112 = vrot.lane.b32.xlu0 %v81_v38, %s5086_s14 }
  0x36   :  { %162 = vrot.lane.b32.xlu1 %v5277_v37, %s5085_s11 }
  0x39   :  { %160 = vrot.lane.b32.xlu0 %v5256_v32, %s5085_s11 }
  0x3a   :  { %208 = vrot.lane.b32.xlu1 %v85_v41, %s5087_s23 }
  0x3d   :  { %206 = vrot.lane.b32.xlu0 %v83_v36, %s5087_s23 }
  0x3e   :  { %118 = vrot.lane.b32.xlu1 %v87_v43, %s5086_s14 }
  0x41   :  { %116 = vrot.lane.b32.xlu0 %v85_v41, %s5086_s14 }
  0x42   :  { %166 = vrot.lane.b32.xlu1 %v5303_v44, %s5085_s11 }
  0x45   :  { %164 = vrot.lane.b32.xlu0 %v5287_v40, %s5085_s11 }
  0x46   :  { %212 = vrot.lane.b32.xlu1 %v89_v47, %s5087_s23 }
  0x49   :  { %210 = vrot.lane.b32.xlu0 %v87_v43, %s5087_s23 }
  0x4a   :  { %122 = vrot.lane.b32.xlu1 %v91_v49, %s5086_s14 }
  0x4d   :  { %120 = vrot.lane.b32.xlu0 %v89_v47, %s5086_s14 }
  0x4e   :  { %170 = vrot.lane.b32.xlu1 %v5327_v50, %s5085_s11 }
  0x51   :  { %168 = vrot.lane.b32.xlu0 %v5311_v46, %s5085_s11 }
  0x52   :  { %216 = vrot.lane.b32.xlu1 %v93_v53, %s5087_s23 }
  0x55   :  { %214 = vrot.lane.b32.xlu0 %v91_v49, %s5087_s23 }
  0x56   :  { %126 = vrot.lane.b32.xlu1 %v95_v55, %s5086_s14 }
  0x59   :  { %124 = vrot.lane.b32.xlu0 %v93_v53, %s5086_s14 }
  0x5a   :  { %218 = vrot.lane.b32.xlu1 %v95_v55, %s5087_s23 }
  0x5d   :  { %172 = vrot.lane.b32.xlu0 %v5335_v52, %s5085_s11 }
  0x74   :  { %v145_v56 = vpop.permute.xlu1 %144 }
  0x77   :  { %v97_v57 = vpop.permute.xlu0 %96 }
  0x78   :  { %v147_v58 = vpop.permute.xlu1 %146  ;;  %v236_v60 = vsel %vm235_vm1, %v5157_v1, %v97_v57 }
  0x79   :  { %v253_v5 = vsel %vm252_vm2, %v236_v60, %v145_v56 }
  0x7b   :  { %v99_v59 = vpop.permute.xlu0 %98 }
  0x7c   :  { %v237_v61 = vsel %vm235_vm1, %v5152_v0, %v99_v59  ;;  %v193_v62 = vpop.permute.xlu1 %192 }
  0x7d   :  { %v254_v63 = vsel %vm252_vm2, %v237_v61, %v147_v58 }
  0x7e   :  { %v271_v8 = vsel %vm269_vm3, %v254_v63, %v193_v62 }
  0x7f   :  { %v191_v3 = vpop.permute.xlu0 %190 }
  0x80   :  { %v103_v6 = vpop.permute.xlu1 %102  ;;  %v270_v7 = vsel %vm269_vm3, %v253_v5, %v191_v3 }
  0x81   :  { %4079 = vmatprep.mubr.msk.f32.mxu0 %vm290_vm4, %v270_v7  ;;  %v239_v12 = vsel %vm235_vm1, %v5177_v9, %v103_v6 }
  0x82   :  { %4080 = vmatmul.mubr.msk.f32.vlgmr.msra.gmra.mrb[0].mxu0 %vm290_vm4, %v271_v8 }
  0x83   :  { %v101_v1 = vpop.permute.xlu0 %100 }
  0x84   :  { %v151_v0 = vpop.permute.xlu1 %150  ;;  %v238_v13 = vsel %vm235_vm1, %v5165_v4, %v101_v1 }
  0x85   :  { %v256_v16 = vsel %vm252_vm2, %v239_v12, %v151_v0 }
  0x87   :  { %v149_v10 = vpop.permute.xlu0 %148 }
  0x88   :  { %v197_v11 = vpop.permute.xlu1 %196  ;;  %v255_v14 = vsel %vm252_vm2, %v238_v13, %v149_v10 }
  0x89   :  { %v273_v19 = vsel %vm269_vm3, %v256_v16, %v197_v11 }
  0x8b   :  { %v195_v15 = vpop.permute.xlu0 %194 }
  0x8c   :  { %v272_v17 = vsel %vm269_vm3, %v255_v14, %v195_v15  ;;  %v107_v18 = vpop.permute.xlu1 %106 }
  0x8d   :  { %4082 = vmatprep.mubr.msk.f32.mxu0 %vm290_vm4, %v272_v17  ;;  %v241_v4 = vsel %vm235_vm1, %v5214_v22, %v107_v18 }
  0x8e   :  { %4083 = vmatmul.mubr.msk.f32.gmra.mrb[2].mxu0 %vm290_vm4, %v273_v19 }
  0x8f   :  { %v105_v21 = vpop.permute.xlu0 %104 }
  0x90   :  { %v155_v23 = vpop.permute.xlu1 %154  ;;  %v240_v25 = vsel %vm235_vm1, %v5206_v20, %v105_v21 }
  0x91   :  { %v258_v30 = vsel %vm252_vm2, %v241_v4, %v155_v23 }
  0x93   :  { %v153_v9 = vpop.permute.xlu0 %152 }
  0x94   :  { %v201_v24 = vpop.permute.xlu1 %200  ;;  %v257_v27 = vsel %vm252_vm2, %v240_v25, %v153_v9 }
  0x95   :  { %v275_v35 = vsel %vm269_vm3, %v258_v30, %v201_v24 }
  0x97   :  { %v199_v29 = vpop.permute.xlu0 %198 }
  0x98   :  { %v274_v31 = vsel %vm269_vm3, %v257_v27, %v199_v29  ;;  %v111_v33 = vpop.permute.xlu1 %110 }
  0x99   :  { %4085 = vmatprep.mubr.msk.f32.mxu0 %vm290_vm4, %v274_v31  ;;  %v243_v20 = vsel %vm235_vm1, %v5238_v28, %v111_v33  ;;  %v703_v31 = vld [vmem:[%s9404_s1 + $0x10] sm:$0xff]  ;;  %v704_v33 = vld [vmem:[%s9404_s1 + $0x18] sm:$0xff] }
  0x9a   :  { %4086 = vmatmul.mubr.msk.f32.gmra.mrb[4].mxu0 %vm290_vm4, %v275_v35  ;;  %v4240_v35 = vpack.i.bf16 %v704_v33, %v703_v31  ;;  %v3999_v31 = vld [vmem:[%s9404_s1 + $0x160] sm:$0xff]  ;;  %v4000_v33 = vld [vmem:[%s9404_s1 + $0x168] sm:$0xff] }
  0x9b   :  { %v109_v36 = vpop.permute.xlu0 %108 }
  0x9c   :  { %v159_v38 = vpop.permute.xlu1 %158  ;;  %v242_v41 = vsel %vm235_vm1, %v5230_v26, %v109_v36  ;;  %v705_v36 = vld [vmem:[%s9404_s1 + $0x20] sm:$0xff]  ;;  %4241 = vrot.lane.b32.xlu1 %v4240_v35, %s5088_s30  ;;  %v4345_v35 = vpack.i.bf16 %v4000_v33, %v3999_v31 }
  0x9d   :  { %v260_v45 = vsel %vm252_vm2, %v243_v20, %v159_v38  ;;  %v708_v20 = vld [vmem:[%s9404_s1 + $0x38] sm:$0xff] }
  0x9f   :  { %v157_v22 = vpop.permute.xlu0 %156 }
  0xa0   :  { %v5384_v39 = vpop.permute.xlu1 %204  ;;  %v259_v42 = vsel %vm252_vm2, %v242_v41, %v157_v22 }
  0xa1   :  { %v277_v49 = vsel %vm269_vm3, %v260_v45, %v5384_v39  ;;  %v711_v45 = vld [vmem:[%s9404_s1 + $0x50] sm:$0xff] }
  0xa3   :  { %v203_v43 = vpop.permute.xlu0 %202 }
  0xa4   :  { %v276_v47 = vsel %vm269_vm3, %v259_v42, %v203_v43  ;;  %v115_v48 = vpop.permute.xlu1 %114  ;;  %v709_v42 = vld [vmem:[%s9404_s1 + $0x40] sm:$0xff]  ;;  %v710_v43 = vld [vmem:[%s9404_s1 + $0x48] sm:$0xff] }
  0xa5   :  { %4088 = vmatprep.mubr.msk.f32.mxu0 %vm290_vm4, %v276_v47  ;;  %v245_v26 = vsel %vm235_vm1, %v5256_v32, %v115_v48  ;;  %v4255_v47 = vpack.i.bf16 %v710_v43, %v709_v42  ;;  %v712_v48 = vld [vmem:[%s9404_s1 + $0x58] sm:$0xff]  ;;  %v4005_v42 = vld [vmem:[%s9404_s1 + $0x190] sm:$0xff] }
  0xa6   :  { %4089 = vmatmul.mubr.msk.f32.gmra.mrb[6].mxu0 %vm290_vm4, %v277_v49  ;;  %v713_v49 = vld [vmem:[%s9404_s1 + $0x60] sm:$0xff]  ;;  %v4006_v43 = vld [vmem:[%s9404_s1 + $0x198] sm:$0xff] }
  0xa7   :  { %v113_v51 = vpop.permute.xlu0 %112 }
  0xa8   :  { %v163_v28 = vpop.permute.xlu1 %162  ;;  %v244_v55 = vsel %vm235_vm1, %v5265_v34, %v113_v51  ;;  %v714_v51 = vld [vmem:[%s9404_s1 + $0x68] sm:$0xff] }
  0xa9   :  { %v262_v58 = vsel %vm252_vm2, %v245_v26, %v163_v28  ;;  %v4260_v28 = vpack.i.bf16 %v712_v48, %v711_v45  ;;  %v716_v26 = vld [vmem:[%s9404_s1 + $0x78] sm:$0xff]  ;;  %v4360_v45 = vpack.i.bf16 %v4006_v43, %v4005_v42  ;;  %v4008_v48 = vld [vmem:[%s9404_s1 + $0x1a8] sm:$0xff] }
  0xab   :  { %v161_v53 = vpop.permute.xlu0 %160 }
  0xac   :  { %v209_v54 = vpop.permute.xlu1 %208  ;;  %v261_v56 = vsel %vm252_vm2, %v244_v55, %v161_v53  ;;  %v4265_v53 = vpack.i.bf16 %v714_v51, %v713_v49  ;;  %v4009_v51 = vld [vmem:[%s9404_s1 + $0x1b0] sm:$0xff] }
  0xad   :  { %v279_v61 = vsel %vm269_vm3, %v262_v58, %v209_v54  ;;  %v715_v54 = vld [vmem:[%s9404_s1 + $0x70] sm:$0xff] }
  0xae   :  { %v4270_v55 = vpack.i.bf16 %v716_v26, %v715_v54  ;;  %v4011_v54 = vld [vmem:[%s9404_s1 + $0x1c0] sm:$0xff]  ;;  %v4012_v26 = vld [vmem:[%s9404_s1 + $0x1c8] sm:$0xff] }
  0xaf   :  { %v207_v57 = vpop.permute.xlu0 %206 }
  0xb0   :  { %v278_v59 = vsel %vm269_vm3, %v261_v56, %v207_v57  ;;  %v119_v60 = vpop.permute.xlu1 %118  ;;  %v3971_v56 = vld [vmem:[%s9404_s1 + $0x80] sm:$0xff]  ;;  %v3972_v57 = vld [vmem:[%s9404_s1 + $0x88] sm:$0xff] }
  0xb1   :  { %4091 = vmatprep.mubr.msk.f32.mxu0 %vm290_vm4, %v278_v59  ;;  %v247_v34 = vsel %vm235_vm1, %v5287_v40, %v119_v60  ;;  %v4275_v58 = vpack.i.bf16 %v3972_v57, %v3971_v56  ;;  %v3973_v59 = vld [vmem:[%s9404_s1 + $0x90] sm:$0xff]  ;;  %v3974_v60 = vld [vmem:[%s9404_s1 + $0x98] sm:$0xff] }
  0xb2   :  { %4092 = vmatmul.mubr.msk.f32.gmra.mrb[8].mxu0 %vm290_vm4, %v279_v61  ;;  %v4280_v61 = vpack.i.bf16 %v3974_v60, %v3973_v59  ;;  %v4013_v56 = vld [vmem:[%s9404_s1 + $0x1d0] sm:$0xff]  ;;  %v4014_v57 = vld [vmem:[%s9404_s1 + $0x1d8] sm:$0xff]  ;;  %v4015_v59 = vld [vmem:[%s9404_s1 + $0x1e0] sm:$0xff] }
  0xb3   :  { %v117_v62 = vpop.permute.xlu0 %116  ;;  %v4016_v60 = vld [vmem:[%s9404_s1 + $0x1e8] sm:$0xff] }
  0xb4   :  { %v167_v63 = vpop.permute.xlu1 %166  ;;  %v246_v5 = vsel %vm235_vm1, %v5277_v37, %v117_v62  ;;  %v3975_v62 = vld [vmem:[%s9404_s1 + $0xa0] sm:$0xff] }
  0xb5   :  { %v264_v8 = vsel %vm252_vm2, %v247_v34, %v167_v63  ;;  %v3976_v63 = vld [vmem:[%s9404_s1 + $0xa8] sm:$0xff]  ;;  %v3978_v34 = vld [vmem:[%s9404_s1 + $0xb8] sm:$0xff] }
  0xb7   :  { %v165_v32 = vpop.permute.xlu0 %164 }
  0xb8   :  { %v213_v3 = vpop.permute.xlu1 %212  ;;  %v263_v6 = vsel %vm252_vm2, %v246_v5, %v165_v32  ;;  %v3977_v32 = vld [vmem:[%s9404_s1 + $0xb0] sm:$0xff]  ;;  %v3979_v5 = vld [vmem:[%s9404_s1 + $0xc0] sm:$0xff] }
  0xb9   :  { %v281_v10 = vsel %vm269_vm3, %v264_v8, %v213_v3  ;;  %v4285_v3 = vpack.i.bf16 %v3976_v63, %v3975_v62  ;;  %v4385_v62 = vpack.i.bf16 %v4016_v60, %v4015_v59  ;;  %v4018_v63 = vld [vmem:[%s9404_s1 + $0x1f8] sm:$0xff] }
  0xbb   :  { %v211_v7 = vpop.permute.xlu0 %210 }
  0xbc   :  { %v280_v1 = vsel %vm269_vm3, %v263_v6, %v211_v7  ;;  %v123_v0 = vpop.permute.xlu1 %122  ;;  %v3980_v6 = vld [vmem:[%s9404_s1 + $0xc8] sm:$0xff]  ;;  %v4290_v7 = vpack.i.bf16 %v3978_v34, %v3977_v32 }
  0xbd   :  { %4094 = vmatprep.mubr.msk.f32.mxu0 %vm290_vm4, %v280_v1  ;;  %v249_v37 = vsel %vm235_vm1, %v5311_v46, %v123_v0  ;;  %v4295_v8 = vpack.i.bf16 %v3980_v6, %v3979_v5  ;;  %v3981_v1 = vld [vmem:[%s9404_s1 + $0xd0] sm:$0xff]  ;;  %v3982_v0 = vld [vmem:[%s9404_s1 + $0xd8] sm:$0xff] }
  0xbe   :  { %4095 = vmatmul.mubr.msk.f32.gmra.mrb[10].mxu0 %vm290_vm4, %v281_v10  ;;  %v4300_v10 = vpack.i.bf16 %v3982_v0, %v3981_v1 }
  0xbf   :  { %v121_v11 = vpop.permute.xlu0 %120 }
  0xc0   :  { %v171_v12 = vpop.permute.xlu1 %170  ;;  %v248_v14 = vsel %vm235_vm1, %v5303_v44, %v121_v11  ;;  %v3983_v11 = vld [vmem:[%s9404_s1 + $0xe0] sm:$0xff] }
  0xc1   :  { %v266_v17 = vsel %vm252_vm2, %v249_v37, %v171_v12  ;;  %v3984_v12 = vld [vmem:[%s9404_s1 + $0xe8] sm:$0xff]  ;;  %v3986_v37 = vld [vmem:[%s9404_s1 + $0xf8] sm:$0xff] }
  0xc3   :  { %v169_v40 = vpop.permute.xlu0 %168 }
  0xc4   :  { %v217_v13 = vpop.permute.xlu1 %216  ;;  %v265_v15 = vsel %vm252_vm2, %v248_v14, %v169_v40  ;;  %v4305_v40 = vpack.i.bf16 %v3984_v12, %v3983_v11 }
  0xc5   :  { %v283_v19 = vsel %vm269_vm3, %v266_v17, %v217_v13  ;;  %v3985_v13 = vld [vmem:[%s9404_s1 + $0xf0] sm:$0xff] }
  0xc6   :  { %v4310_v14 = vpack.i.bf16 %v3986_v37, %v3985_v13  ;;  %v3989_v17 = vld [vmem:[%s9404_s1 + $0x110] sm:$0xff] }
  0xc7   :  { %v215_v16 = vpop.permute.xlu0 %214 }
  0xc8   :  { %v282_v18 = vsel %vm269_vm3, %v265_v15, %v215_v16  ;;  %v127_v21 = vpop.permute.xlu1 %126  ;;  %v3987_v15 = vld [vmem:[%s9404_s1 + $0x100] sm:$0xff]  ;;  %v3988_v16 = vld [vmem:[%s9404_s1 + $0x108] sm:$0xff] }
  0xc9   :  { %4097 = vmatprep.mubr.msk.f32.mxu0 %vm290_vm4, %v282_v18  ;;  %v251_v46 = vsel %vm235_vm1, %v5335_v52, %v127_v21  ;;  %v701_v52 = vld [vmem:[%s9404_s1] sm:$0xff]  ;;  %v4315_v18 = vpack.i.bf16 %v3988_v16, %v3987_v15 }
  0xca   :  { %4098 = vmatmul.mubr.msk.f32.gmra.mrb[12].mxu0 %vm290_vm4, %v283_v19  ;;  %v268_v44 = vsel %vm252_vm2, %v251_v46, %v159_v38  ;;  %v706_v38 = vld [vmem:[%s9404_s1 + $0x28] sm:$0xff]  ;;  %v3990_v19 = vld [vmem:[%s9404_s1 + $0x118] sm:$0xff]  ;;  %v3991_v21 = vld [vmem:[%s9404_s1 + $0x120] sm:$0xff] }
  0xcb   :  { %v125_v23 = vpop.permute.xlu0 %124  ;;  %v285_v29 = vsel %vm269_vm3, %v268_v44, %v5384_v39  ;;  %v4245_v22 = vpack.i.bf16 %v706_v38, %v705_v36  ;;  %v707_v39 = vld [vmem:[%s9404_s1 + $0x30] sm:$0xff]  ;;  %v4320_v46 = vpack.i.bf16 %v3990_v19, %v3989_v17  ;;  %v4002_v38 = vld [vmem:[%s9404_s1 + $0x178] sm:$0xff] }
  0xcc   :  { %v219_v9 = vpop.permute.xlu1 %218  ;;  %v250_v24 = vsel %vm235_vm1, %v5327_v50, %v125_v23  ;;  %v702_v50 = vld [vmem:[%s9404_s1 + $0x8] sm:$0xff]  ;;  %v4250_v41 = vpack.i.bf16 %v708_v20, %v707_v39  ;;  %v3993_v44 = vld [vmem:[%s9404_s1 + $0x130] sm:$0xff]  ;;  %v4003_v39 = vld [vmem:[%s9404_s1 + $0x180] sm:$0xff] }
  0xcd   :  { %v4235_v30 = vpack.i.bf16 %v702_v50, %v701_v52  ;;  %v3992_v23 = vld [vmem:[%s9404_s1 + $0x128] sm:$0xff]  ;;  %v3997_v52 = vld [vmem:[%s9404_s1 + $0x150] sm:$0xff]  ;;  %v3998_v50 = vld [vmem:[%s9404_s1 + $0x158] sm:$0xff] }
  0xce   :  { %4251 = vrot.lane.b32.xlu1 %v4250_v41, %s5088_s30  ;;  %v4001_v36 = vld [vmem:[%s9404_s1 + $0x170] sm:$0xff]  ;;  %v4004_v20 = vld [vmem:[%s9404_s1 + $0x188] sm:$0xff] }
  0xcf   :  { %v173_v4 = vpop.permute.xlu0 %172  ;;  %4236 = vrot.lane.b32.xlu0 %v4235_v30, %s5088_s30  ;;  %v4340_v30 = vpack.i.bf16 %v3998_v50, %v3997_v52  ;;  %v4355_v41 = vpack.i.bf16 %v4004_v20, %v4003_v39 }
  0xd0   :  { %v267_v25 = vsel %vm252_vm2, %v250_v24, %v173_v4  ;;  %v3994_v24 = vld [vmem:[%s9404_s1 + $0x138] sm:$0xff] }
  0xd1   :  { %v284_v27 = vsel %vm269_vm3, %v267_v25, %v219_v9  ;;  %v4325_v9 = vpack.i.bf16 %v3992_v23, %v3991_v21  ;;  %v4330_v4 = vpack.i.bf16 %v3994_v24, %v3993_v44  ;;  %v3995_v25 = vld [vmem:[%s9404_s1 + $0x140] sm:$0xff] }
  0xd2   :  { %4100 = vmatprep.mubr.msk.f32.mxu0 %vm290_vm4, %v284_v27  ;;  %4261 = vrot.lane.b32.xlu1 %v4260_v28, %s5088_s30  ;;  %v3996_v27 = vld [vmem:[%s9404_s1 + $0x148] sm:$0xff]  ;;  %v4010_v28 = vld [vmem:[%s9404_s1 + $0x1b8] sm:$0xff] }
  0xd3   :  { %4101 = vmatmul.mubr.msk.f32.gmra.mrb[14].mxu0 %vm290_vm4, %v285_v29  ;;  %4246 = vrot.lane.b32.xlu0 %v4245_v22, %s5088_s30  ;;  %v4335_v29 = vpack.i.bf16 %v3996_v27, %v3995_v25  ;;  %v4350_v22 = vpack.i.bf16 %v4002_v38, %v4001_v36 }
  0xd6   :  { %4271 = vrot.lane.b32.xlu1 %v4270_v55, %s5088_s30  ;;  %v4375_v55 = vpack.i.bf16 %v4012_v26, %v4011_v54 }
  0xd7   :  { %4256 = vrot.lane.b32.xlu0 %v4255_v47, %s5088_s30  ;;  %v4007_v47 = vld [vmem:[%s9404_s1 + $0x1a0] sm:$0xff] }
  0xd8   :  { %v4365_v49 = vpack.i.bf16 %v4008_v48, %v4007_v47 }
  0xda   :  { %4281 = vrot.lane.b32.xlu1 %v4280_v61, %s5088_s30  ;;  %v4017_v61 = vld [vmem:[%s9404_s1 + $0x1f0] sm:$0xff]  ;;  %s5089_s1 = smov 124  }
  0xdb   :  { %4266 = vrot.lane.b32.xlu0 %v4265_v53, %s5088_s30  ;;  %v4370_v53 = vpack.i.bf16 %v4010_v28, %v4009_v51  ;;  %v4390_v32 = vpack.i.bf16 %v4018_v63, %v4017_v61 }
  0xde   :  { %4291 = vrot.lane.b32.xlu1 %v4290_v7, %s5088_s30 }
  0xdf   :  { %4276 = vrot.lane.b32.xlu0 %v4275_v58, %s5088_s30  ;;  %v4380_v58 = vpack.i.bf16 %v4014_v57, %v4013_v56 }
  0xe2   :  { %4301 = vrot.lane.b32.xlu1 %v4300_v10, %s5088_s30 }
  0xe3   :  { %4286 = vrot.lane.b32.xlu0 %v4285_v3, %s5088_s30 }
  0xe6   :  { %4311 = vrot.lane.b32.xlu1 %v4310_v14, %s5088_s30 }
  0xe7   :  { %4296 = vrot.lane.b32.xlu0 %v4295_v8, %s5088_s30 }
  0xea   :  { %4321 = vrot.lane.b32.xlu1 %v4320_v46, %s5088_s30 }
  0xeb   :  { %4306 = vrot.lane.b32.xlu0 %v4305_v40, %s5088_s30 }
  0xee   :  { %4331 = vrot.lane.b32.xlu1 %v4330_v4, %s5088_s30 }
  0xef   :  { %4316 = vrot.lane.b32.xlu0 %v4315_v18, %s5088_s30 }
  0xf2   :  { %4341 = vrot.lane.b32.xlu1 %v4340_v30, %s5088_s30 }
  0xf3   :  { %4326 = vrot.lane.b32.xlu0 %v4325_v9, %s5088_s30 }
  0xf6   :  { %4351 = vrot.lane.b32.xlu1 %v4350_v22, %s5088_s30 }
  0xf7   :  { %4336 = vrot.lane.b32.xlu0 %v4335_v29, %s5088_s30 }
  0xfa   :  { %4361 = vrot.lane.b32.xlu1 %v4360_v45, %s5088_s30 }
  0xfb   :  { %4346 = vrot.lane.b32.xlu0 %v4345_v35, %s5088_s30 }
  0xfe   :  { %4371 = vrot.lane.b32.xlu1 %v4370_v53, %s5088_s30 }
  0xff   :  { %4356 = vrot.lane.b32.xlu0 %v4355_v41, %s5088_s30 }
 0x102   :  { %4381 = vrot.lane.b32.xlu1 %v4380_v58, %s5088_s30 }
 0x103   :  { %4366 = vrot.lane.b32.xlu0 %v4365_v49, %s5088_s30 }
 0x106   :  { %4391 = vrot.lane.b32.xlu1 %v4390_v32, %s5088_s30 }
 0x107   :  { %4376 = vrot.lane.b32.xlu0 %v4375_v55, %s5088_s30 }
 0x10b   :  { %4386 = vrot.lane.b32.xlu0 %v4385_v62, %s5088_s30 }
 0x155   :  { %v5662_v3 = vpop.f32.mrb[0].mxu0 }
 0x156   :  { %v487_v34 = vsel %vm252_vm2, %v5662_v3, 0.0  ;;  %v524_v5 = vmul.f32 %v5662_v3, %v5662_v3  ;;  %v5668_v6 = vpop.f32.mrb[1].mxu0 }
 0x157   :  { %v486_v7 = vsel %vm252_vm2, %v5668_v6, 0.0  ;;  %v523_v8 = vmul.f32 %v5668_v6, %v5668_v6 }
 0x158   :  { %v540_v1 = vsel %vm252_vm2, %v524_v5, 0.0  ;;  %v488_v0 = vadd.f32 %v487_v34, %v486_v7 }
 0x159   :  { %v539_v10 = vsel %vm252_vm2, %v523_v8, 0.0 }
 0x15a   :  { %v541_v11 = vadd.f32 %v540_v1, %v539_v10 }
 0x161   :  { %v5676_v12 = vpop.f32.mrb[2].mxu0 }
 0x162   :  { %v5678_v40 = vpop.f32.mrb[3].mxu0  ;;  %v526_v13 = vmul.f32 %v5676_v12, %v5676_v12  ;;  %v491_v16 = vsel %vm252_vm2, %v5676_v12, 0.0 }
 0x163   :  { %v489_v37 = vsel %vm252_vm2, %v5678_v40, 0.0  ;;  %v525_v14 = vmul.f32 %v5678_v40, %v5678_v40 }
 0x164   :  { %v490_v15 = vadd.f32 %v489_v37, %v488_v0  ;;  %v544_v21 = vsel %vm252_vm2, %v526_v13, 0.0 }
 0x165   :  { %v542_v17 = vsel %vm252_vm2, %v525_v14, 0.0 }
 0x166   :  { %v543_v18 = vadd.f32 %v542_v17, %v541_v11  ;;  %v492_v19 = vadd.f32 %v491_v16, %v490_v15 }
 0x168   :  { %v545_v23 = vadd.f32 %v544_v21, %v543_v18 }
 0x16d   :  { %v5690_v46 = vpop.f32.mrb[4].mxu0 }
 0x16e   :  { %v5692_v9 = vpop.f32.mrb[5].mxu0  ;;  %v528_v44 = vmul.f32 %v5690_v46, %v5690_v46  ;;  %v495_v27 = vsel %vm252_vm2, %v5690_v46, 0.0 }
 0x16f   :  { %v493_v24 = vsel %vm252_vm2, %v5692_v9, 0.0  ;;  %v527_v4 = vmul.f32 %v5692_v9, %v5692_v9 }
 0x170   :  { %v494_v25 = vadd.f32 %v493_v24, %v492_v19  ;;  %v548_v30 = vsel %vm252_vm2, %v528_v44, 0.0 }
 0x171   :  { %v546_v29 = vsel %vm252_vm2, %v527_v4, 0.0 }
 0x172   :  { %v547_v52 = vadd.f32 %v546_v29, %v545_v23  ;;  %v496_v50 = vadd.f32 %v495_v27, %v494_v25 }
 0x174   :  { %v549_v31 = vadd.f32 %v548_v30, %v547_v52 }
 0x179   :  { %v5704_v33 = vpop.f32.mrb[6].mxu0 }
 0x17a   :  { %v5706_v35 = vpop.f32.mrb[7].mxu0  ;;  %v530_v36 = vmul.f32 %v5704_v33, %v5704_v33  ;;  %v499_v20 = vsel %vm252_vm2, %v5704_v33, 0.0 }
 0x17b   :  { %v497_v38 = vsel %vm252_vm2, %v5706_v35, 0.0  ;;  %v529_v22 = vmul.f32 %v5706_v35, %v5706_v35 }
 0x17c   :  { %v498_v39 = vadd.f32 %v497_v38, %v496_v50  ;;  %v552_v45 = vsel %vm252_vm2, %v530_v36, 0.0 }
 0x17d   :  { %v550_v41 = vsel %vm252_vm2, %v529_v22, 0.0 }
 0x17e   :  { %v551_v42 = vadd.f32 %v550_v41, %v549_v31  ;;  %v500_v43 = vadd.f32 %v499_v20, %v498_v39 }
 0x180   :  { %v553_v47 = vadd.f32 %v552_v45, %v551_v42 }
 0x185   :  { %v5718_v48 = vpop.f32.mrb[8].mxu0 }
 0x186   :  { %v5720_v49 = vpop.f32.mrb[9].mxu0  ;;  %v532_v51 = vmul.f32 %v5718_v48, %v5718_v48  ;;  %v503_v26 = vsel %vm252_vm2, %v5718_v48, 0.0 }
 0x187   :  { %v501_v28 = vsel %vm252_vm2, %v5720_v49, 0.0  ;;  %v531_v53 = vmul.f32 %v5720_v49, %v5720_v49 }
 0x188   :  { %v502_v54 = vadd.f32 %v501_v28, %v500_v43  ;;  %v556_v58 = vsel %vm252_vm2, %v532_v51, 0.0 }
 0x189   :  { %v554_v55 = vsel %vm252_vm2, %v531_v53, 0.0 }
 0x18a   :  { %v555_v56 = vadd.f32 %v554_v55, %v553_v47  ;;  %v504_v57 = vadd.f32 %v503_v26, %v502_v54  ;;  %v5780_v55 = vpop.permute.xlu0 %4236 }
 0x18c   :  { %v557_v59 = vadd.f32 %v556_v58, %v555_v56  ;;  %v5782_v56 = vpop.permute.xlu1 %4241 }
 0x190   :  { %v5786_v58 = vpop.permute.xlu1 %4251 }
 0x191   :  { %v5732_v60 = vpop.f32.mrb[10].mxu0 }
 0x192   :  { %v5734_v61 = vpop.f32.mrb[11].mxu0  ;;  %v534_v62 = vmul.f32 %v5732_v60, %v5732_v60  ;;  %v507_v5 = vsel %vm252_vm2, %v5732_v60, 0.0 }
 0x193   :  { %v505_v63 = vsel %vm252_vm2, %v5734_v61, 0.0  ;;  %v533_v32 = vmul.f32 %v5734_v61, %v5734_v61 }
 0x194   :  { %v506_v34 = vadd.f32 %v505_v63, %v504_v57  ;;  %v560_v0 = vsel %vm252_vm2, %v534_v62, 0.0  ;;  %v5784_v57 = vpop.permute.xlu0 %4246  ;;  %v5790_v62 = vpop.permute.xlu1 %4261 }
 0x195   :  { %v558_v7 = vsel %vm252_vm2, %v533_v32, 0.0 }
 0x196   :  { %v559_v8 = vadd.f32 %v558_v7, %v557_v59  ;;  %v508_v1 = vadd.f32 %v507_v5, %v506_v34 }
 0x198   :  { %v561_v10 = vadd.f32 %v560_v0, %v559_v8  ;;  %v5788_v59 = vpop.permute.xlu0 %4256  ;;  %v5794_v32 = vpop.permute.xlu1 %4271 }
 0x19c   :  { %v5792_v63 = vpop.permute.xlu0 %4266  ;;  %v5798_v5 = vpop.permute.xlu1 %4281 }
 0x19d   :  { %v5746_v11 = vpop.f32.mrb[12].mxu0  ;;  %9575 = vst [vmem:[#allocation2_spill] sm:$0xff] %v5798_v5 }
 0x19e   :  { %v5748_v13 = vpop.f32.mrb[13].mxu0  ;;  %v536_v37 = vmul.f32 %v5746_v11, %v5746_v11  ;;  %v511_v17 = vsel %vm252_vm2, %v5746_v11, 0.0 }
 0x19f   :  { %v509_v14 = vsel %vm252_vm2, %v5748_v13, 0.0  ;;  %v535_v15 = vmul.f32 %v5748_v13, %v5748_v13 }
 0x1a0   :  { %v510_v16 = vadd.f32 %v509_v14, %v508_v1  ;;  %v564_v23 = vsel %vm252_vm2, %v536_v37, 0.0  ;;  %v5796_v34 = vpop.permute.xlu0 %4276  ;;  %v5802_v8 = vpop.permute.xlu1 %4291 }
 0x1a1   :  { %v562_v18 = vsel %vm252_vm2, %v535_v15, 0.0  ;;  %9576 = vst [vmem:[#allocation3_spill] sm:$0xff] %v5802_v8 }
 0x1a2   :  { %v563_v19 = vadd.f32 %v562_v18, %v561_v10  ;;  %v512_v21 = vadd.f32 %v511_v17, %v510_v16 }
 0x1a4   :  { %v565_v44 = vadd.f32 %v564_v23, %v563_v19  ;;  %v5800_v7 = vpop.permute.xlu0 %4286  ;;  %v5806_v0 = vpop.permute.xlu1 %4301 }
 0x1a5   :  { %9577 = vst [vmem:[#allocation4_spill] sm:$0xff] %v5806_v0  ;;  %v9619_v0 = vunpack.i.h.bf16 %v5792_v63 }
 0x1a6   :  { %v5760_v24 = vpop.f32.mrb[14].mxu0 }
 0x1a7   :  { %v5762_v4 = vpop.f32.mrb[15].mxu0  ;;  %v538_v25 = vmul.f32 %v5760_v24, %v5760_v24  ;;  %v515_v50 = vsel %vm252_vm2, %v5760_v24, 0.0 }
 0x1a8   :  { %v513_v27 = vsel %vm252_vm2, %v5762_v4, 0.0  ;;  %v537_v29 = vmul.f32 %v5762_v4, %v5762_v4  ;;  %v5804_v1 = vpop.permute.xlu0 %4296  ;;  %v5810_v37 = vpop.permute.xlu1 %4311 }
 0x1a9   :  { %v514_v52 = vadd.f32 %v513_v27, %v512_v21  ;;  %v568_v38 = vsel %vm252_vm2, %v538_v25, 0.0  ;;  %9579 = vst [vmem:[#allocation6_spill] sm:$0xff] %v5810_v37 }
 0x1aa   :  { %v566_v30 = vsel %vm252_vm2, %v537_v29, 0.0 }
 0x1ab   :  { %v516_v31 = vadd.f32 %v515_v50, %v514_v52  ;;  %v567_v36 = vadd.f32 %v566_v30, %v565_v44 }
 0x1ac   :  { %v5808_v10 = vpop.permute.xlu0 %4306  ;;  %v5814_v15 = vpop.permute.xlu1 %4321 }
 0x1ad   :  { %v517_v22 = vrot.slane %v516_v31, 4  ;;  %v569_v39 = vadd.f32 %v568_v38, %v567_v36  ;;  %9578 = vst [vmem:[#allocation5_spill] sm:$0xff] %v5808_v10  ;;  %9581 = vst [vmem:[#allocation8_spill] sm:$0xff] %v5814_v15 }
 0x1af   :  { %v518_v20 = vadd.f32 %v517_v22, %v516_v31  ;;  %v570_v41 = vrot.slane %v569_v39, 4 }
 0x1b0   :  { %v5812_v14 = vpop.permute.xlu0 %4316  ;;  %v5818_v17 = vpop.permute.xlu1 %4331 }
 0x1b1   :  { %v519_v42 = vrot.slane %v518_v20, 2  ;;  %v571_v43 = vadd.f32 %v570_v41, %v569_v39  ;;  %9580 = vst [vmem:[#allocation7_spill] sm:$0xff] %v5812_v14  ;;  %9583 = vst [vmem:[#allocation10_spill] sm:$0xff] %v5818_v17 }
 0x1b3   :  { %v520_v45 = vadd.f32 %v519_v42, %v518_v20  ;;  %v572_v47 = vrot.slane %v571_v43, 2 }
 0x1b4   :  { %v5816_v16 = vpop.permute.xlu0 %4326  ;;  %v5822_v19 = vpop.permute.xlu1 %4341 }
 0x1b5   :  { %v521_v51 = vrot.slane %v520_v45, 1  ;;  %v573_v28 = vadd.f32 %v572_v47, %v571_v43  ;;  %9582 = vst [vmem:[#allocation9_spill] sm:$0xff] %v5816_v16  ;;  %9585 = vst [vmem:[#allocation12_spill] sm:$0xff] %v5822_v19 }
 0x1b7   :  { %v522_v53 = vadd.f32 %v521_v51, %v520_v45  ;;  %v574_v54 = vrot.slane %v573_v28, 1 }
 0x1b8   :  { %v5820_v18 = vpop.permute.xlu0 %4336  ;;  %v5826_v23 = vpop.permute.xlu1 %4351 }
 0x1b9   :  { %577 = vrot.lane.b32.xlu0 %v522_v53, %s5089_s1  ;;  %v575_v26 = vadd.f32 %v574_v54, %v573_v28  ;;  %9584 = vst [vmem:[#allocation11_spill] sm:$0xff] %v5820_v18  ;;  %9587 = vst [vmem:[#allocation14_spill] sm:$0xff] %v5826_v23 }
 0x1bb   :  { %582 = vrot.lane.b32.xlu1 %v575_v26, %s5089_s1 }
 0x1bc   :  { %v5824_v21 = vpop.permute.xlu0 %4346  ;;  %v5830_v25 = vpop.permute.xlu1 %4361 }
 0x1bd   :  { %586 = vrot.lane.b32.xlu0 %v522_v53, %s5090_s15  ;;  %9586 = vst [vmem:[#allocation13_spill] sm:$0xff] %v5824_v21  ;;  %9589 = vst [vmem:[#allocation16_spill] sm:$0xff] %v5830_v25 }
 0x1bf   :  { %590 = vrot.lane.b32.xlu1 %v575_v26, %s5090_s15 }
 0x1c0   :  { %v5828_v44 = vpop.permute.xlu0 %4356  ;;  %v5834_v29 = vpop.permute.xlu1 %4371 }
 0x1c1   :  { %594 = vrot.lane.b32.xlu0 %v522_v53, %s5091_s16  ;;  %9588 = vst [vmem:[#allocation15_spill] sm:$0xff] %v5828_v44  ;;  %9591 = vst [vmem:[#allocation18_spill] sm:$0xff] %v5834_v29 }
 0x1c3   :  { %598 = vrot.lane.b32.xlu1 %v575_v26, %s5091_s16 }
 0x1c4   :  { %v5832_v27 = vpop.permute.xlu0 %4366  ;;  %v5838_v50 = vpop.permute.xlu1 %4381 }
 0x1c5   :  { %9590 = vst [vmem:[#allocation17_spill] sm:$0xff] %v5832_v27  ;;  %9593 = vst [vmem:[#allocation20_spill] sm:$0xff] %v5838_v50 }
 0x1c8   :  { %v5836_v52 = vpop.permute.xlu0 %4376  ;;  %v5842_v31 = vpop.permute.xlu1 %4391 }
 0x1c9   :  { %9592 = vst [vmem:[#allocation19_spill] sm:$0xff] %v5836_v52  ;;  %9595 = vst [vmem:[#allocation22_spill] sm:$0xff] %v5842_v31  ;;  %v629_v31 = vlaneseq }
 0x1cc   :  { %v5840_v30 = vpop.permute.xlu0 %4386 }
 0x1cd   :  { %9594 = vst [vmem:[#allocation21_spill] sm:$0xff] %v5840_v30 }
 0x22b   :  { %v578_v36 = vpop.permute.xlu0 %577 }
 0x22c   :  { %v580_v39 = vadd.f32 %v578_v36, %v522_v53  ;;  %v484_v53 = vld [vmem:[%s9405_s4] sm:$0x1]  ;;  %v630_v36 = vshrl.u32 %v629_v31, 7  ;;  %s5093_s4 = smov 40  }
 0x22d   :  { %v583_v38 = vpop.permute.xlu1 %582 }
 0x22e   :  { %v585_v41 = vadd.f32 %v583_v38, %v575_v26 }
 0x22f   :  { %v587_v22 = vpop.permute.xlu0 %586 }
 0x230   :  { %v589_v42 = vadd.f32 %v587_v22, %v580_v39  ;;  %v485_v22 = vld [vmem:[%s9406_s5] sm:$0x1]  ;;  %s5094_s5 = smov 56  }
 0x231   :  { %v591_v20 = vpop.permute.xlu1 %590 }
 0x232   :  { %v593_v45 = vadd.f32 %v591_v20, %v585_v41 }
 0x233   :  { %v595_v43 = vpop.permute.xlu0 %594 }
 0x234   :  { %v597_v47 = vadd.f32 %v595_v43, %v589_v42 }
 0x235   :  { %v599_v51 = vpop.permute.xlu1 %598 }
 0x236   :  { %v603_v28 = vmul.f32 0.001953125, %v597_v47  ;;  %v601_v54 = vadd.f32 %v599_v51, %v593_v45  ;;  %v4244_v45 = vunpack.i.h.bf16 %v5782_v56  ;;  %v4243_v47 = vunpack.i.l.bf16 %v5782_v56 }
 0x237   :  { %v9600_v56 = vunpack.i.h.bf16 %v5786_v58 }
 0x238   :  { %v605_v2 = vmul.f32 %v603_v28, %v603_v28  ;;  %v604_v52 = vmul.f32 0.001953125, %v601_v54 }
 0x23a   :  { %v606_v50 = vsub.f32 %v604_v52, %v605_v2  ;;  %v5852_v52 = vsub.s32 0, %v630_v36 }
 0x23c   :  { %v607_v29 = vmax.f32 %v606_v50, 0.0  ;;  %9596 = vst [vmem:[#allocation23_spill] sm:$0xff] %v5852_v52 }
 0x23e   :  { %v608_v30 = vadd.f32 1e-05, %v607_v29 }
 0x240   :  { %5080 = vrsqrt.f32 %v608_v30 }
 0x24a   :  { %v5081_v26 = vpop.eup %5080 }
 0x24b   :  { %v610_v38 = vmul.f32 %v5081_v26, %v484_v53 }
 0x24d   :  { %617 = vrot.lane.b32.xlu1 %v610_v38, %s5086_s14  ;;  %614 = vrot.lane.b32.xlu0 %v610_v38, %s5088_s30  ;;  %v611_v2 = vmul.f32 %v610_v38, %v603_v28 }
 0x24f   :  { %v612_v29 = vsub.f32 %v485_v22, %v611_v2 }
 0x251   :  { %620 = vrot.lane.b32.xlu0 %v610_v38, %s5092_s21  ;;  %v632_v50 = vrot.slane %v612_v29, %v5852_v52 }
 0x253   :  { %633 = vrot.lane.b32.xlu1 %v632_v50, %s5088_s30 }
 0x255   :  { %636 = vrot.lane.b32.xlu0 %v632_v50, %s5086_s14 }
 0x257   :  { %639 = vrot.lane.b32.xlu1 %v632_v50, %s5092_s21 }
 0x2bf   :  { %v615_v30 = vpop.permute.xlu0 %614  ;;  %v618_v31 = vpop.permute.xlu1 %617 }
 0x2c0   :  { %v624_v39 = vsel %vm623_vm5, %v610_v38, %v615_v30 }
 0x2c1   :  { %v625_v41 = vsel %vm235_vm1, %v624_v39, %v618_v31 }
 0x2c3   :  { %v621_v42 = vpop.permute.xlu0 %620 }
 0x2c4   :  { %v627_v51 = vsel %vm9574_vm6, %v625_v41, %v621_v42 }
 0x2c5   :  { %v648_v36 = vrot.slane %v627_v51, %v5852_v52  ;;  %v634_v26 = vpop.permute.xlu1 %633 }
 0x2c6   :  { %v642_v50 = vsel %vm623_vm5, %v612_v29, %v634_v26 }
 0x2c7   :  { %v637_v42 = vpop.permute.xlu0 %636  ;;  %v651_v54 = vmul.f32 %v648_v36, %v5678_v40  ;;  %v652_v22 = vmul.f32 %v5676_v12, %v648_v36  ;;  %v649_v29 = vmul.f32 %v648_v36, %v5668_v6  ;;  %v650_v26 = vmul.f32 %v5662_v3, %v648_v36 }
 0x2c8   :  { %v643_v28 = vsel %vm235_vm1, %v642_v50, %v637_v42  ;;  %v655_v30 = vmul.f32 %v648_v36, %v5706_v35  ;;  %v656_v39 = vmul.f32 %v5704_v33, %v648_v36  ;;  %v653_v31 = vmul.f32 %v648_v36, %v5692_v9 }
 0x2c9   :  { %v640_v2 = vpop.permute.xlu1 %639  ;;  %v654_v51 = vmul.f32 %v5690_v46, %v648_v36  ;;  %v659_v50 = vmul.f32 %v648_v36, %v5734_v61  ;;  %v660_v12 = vmul.f32 %v5732_v60, %v648_v36  ;;  %v657_v6 = vmul.f32 %v648_v36, %v5720_v49 }
 0x2ca   :  { %v644_v41 = vsel %vm9574_vm6, %v643_v28, %v640_v2  ;;  %v658_v3 = vmul.f32 %v5718_v48, %v648_v36  ;;  %v663_v35 = vmul.f32 %v648_v36, %v5762_v4  ;;  %v664_v33 = vmul.f32 %v5760_v24, %v648_v36 }
 0x2cb   :  { %v668_v40 = vrot.slane %v644_v41, %v5852_v52  ;;  %v661_v28 = vmul.f32 %v648_v36, %v5748_v13  ;;  %v662_v9 = vmul.f32 %v5746_v11, %v648_v36  ;;  %v9599_v52 = vunpack.i.l.bf16 %v5786_v58 }
 0x2cc   :  { %vm2928_vm6 = vcmask 982016  }
 0x2cd   :  { %v671_v2 = vadd.f32 %v668_v40, %v651_v54  ;;  %v672_v46 = vadd.f32 %v668_v40, %v652_v22  ;;  %v669_v42 = vadd.f32 %v668_v40, %v649_v29  ;;  %v670_v61 = vadd.f32 %v668_v40, %v650_v26 }
 0x2ce   :  { %v675_v53 = vadd.f32 %v668_v40, %v655_v30  ;;  %v676_v41 = vadd.f32 %v668_v40, %v656_v39  ;;  %v5898_v38 = vadd.f32 %v668_v40, %v653_v31  ;;  %v5900_v60 = vadd.f32 %v668_v40, %v654_v51 }
 0x2cf   :  { %v687_v49 = vmax.f32 %v671_v2, 0.0  ;;  %v688_v48 = vmax.f32 %v672_v46, 0.0  ;;  %v685_v20 = vmax.f32 %v669_v42, 0.0  ;;  %v686_v4 = vmax.f32 %v670_v61, 0.0 }
 0x2d0   :  { %v691_v43 = vmax.f32 %v675_v53, 0.0  ;;  %v692_v24 = vmax.f32 %v676_v41, 0.0  ;;  %v9426_v13 = vmax.f32 %v5898_v38, 0.0  ;;  %v9425_v11 = vmax.f32 %v5900_v60, 0.0 }
 0x2d1   :  { %v5904_v54 = vpack.i.bf16 %v688_v48, %v687_v49  ;;  %v5906_v36 = vpack.i.bf16 %v686_v4, %v685_v20  ;;  %v5908_v22 = vadd.f32 %v668_v40, %v659_v50  ;;  %v5910_v30 = vadd.f32 %v668_v40, %v660_v12 }
 0x2d2   :  { %v5912_v31 = vpack.i.bf16 %v692_v24, %v691_v43  ;;  %v5918_v53 = vpack.i.bf16 %v9425_v11, %v9426_v13  ;;  %v5920_v39 = vadd.f32 %v668_v40, %v657_v6  ;;  %v5922_v51 = vadd.f32 %v668_v40, %v658_v3 }
 0x2d3   :  { %4401 = vrot.lane.b32.xlu1 %v5904_v54, %s5089_s1  ;;  %4396 = vrot.lane.b32.xlu0 %v5906_v36, %s5089_s1  ;;  %v9424_v29 = vmax.f32 %v5908_v22, 0.0  ;;  %v9423_v26 = vmax.f32 %v5910_v30, 0.0  ;;  %v5930_v50 = vadd.f32 %v668_v40, %v663_v35  ;;  %v5932_v12 = vadd.f32 %v668_v40, %v664_v33 }
 0x2d4   :  { %v9420_v2 = vmax.f32 %v5920_v39, 0.0  ;;  %v9417_v6 = vmax.f32 %v5922_v51, 0.0  ;;  %v5936_v3 = vadd.f32 %v668_v40, %v661_v28  ;;  %v5938_v46 = vadd.f32 %v668_v40, %v662_v9 }
 0x2d5   :  { %v5944_v42 = vpack.i.bf16 %v9423_v26, %v9424_v29  ;;  %v9419_v61 = vmax.f32 %v5930_v50, 0.0  ;;  %v9418_v35 = vmax.f32 %v5932_v12, 0.0  ;;  %v783_v9 = vsel %vm623_vm5, %v687_v49, %v4243_v47 }
 0x2d6   :  { %v5952_v33 = vpack.i.bf16 %v9417_v6, %v9420_v2  ;;  %v9422_v28 = vmax.f32 %v5936_v3, 0.0  ;;  %v9421_v40 = vmax.f32 %v5938_v46, 0.0  ;;  %v9598_v26 = vunpack.i.h.bf16 %v5780_v55 }
 0x2d7   :  { %4411 = vrot.lane.b32.xlu1 %v5912_v31, %s5089_s1  ;;  %4406 = vrot.lane.b32.xlu0 %v5918_v53, %s5089_s1  ;;  %v5965_v41 = vpack.i.bf16 %v9418_v35, %v9419_v61  ;;  %v784_v35 = vsel %vm623_vm5, %v688_v48, %v4244_v45  ;;  %v815_v61 = vrot.slane %v783_v9, 7  ;;  %v787_v47 = vsel %vm623_vm5, %v691_v43, %v9599_v52 }
 0x2d8   :  { %v5971_v6 = vpack.i.bf16 %v9421_v40, %v9422_v28  ;;  %v816_v2 = vrot.slane %v784_v35, 7  ;;  %v9597_v40 = vunpack.i.l.bf16 %v5780_v55  ;;  %v782_v29 = vsel %vm623_vm5, %v686_v4, %v9598_v26 }
 0x2d9   :  { %v814_v13 = vrot.slane %v782_v29, 7  ;;  %v788_v45 = vsel %vm623_vm5, %v692_v24, %v9600_v56  ;;  %v5996_v49 = vsel %vm847_vm7, 0.0, %v815_v61  ;;  %v6002_v55 = vsel %vm847_vm7, %v815_v61, 0.0 }
 0x2da   :  { %v781_v28 = vsel %vm623_vm5, %v685_v20, %v9597_v40  ;;  %v5999_v48 = vsel %vm847_vm7, 0.0, %v816_v2  ;;  %v6005_v20 = vsel %vm847_vm7, %v816_v2, 0.0  ;;  %v2001_v58 = vrot.slane %v5996_v49, 1 }
 0x2db   :  { %4421 = vrot.lane.b32.xlu1 %v5944_v42, %s5089_s1  ;;  %4416 = vrot.lane.b32.xlu0 %v5952_v33, %s5089_s1  ;;  %v813_v11 = vrot.slane %v781_v28, 7  ;;  %v2002_v52 = vrot.slane %v6002_v55, 1  ;;  %v2004_v43 = vrot.slane %v5999_v48, 1  ;;  %v2005_v4 = vrot.slane %v6005_v20, 1 }
 0x2dc   :  { %v6019_v29 = vsel %vm847_vm7, 0.0, %v814_v13  ;;  %v6025_v2 = vsel %vm847_vm7, %v814_v13, 0.0  ;;  %v819_v27 = vrot.slane %v787_v47, 7  ;;  %v9603_v9 = vunpack.i.h.bf16 %v5784_v57 }
 0x2dd   :  { %v6016_v24 = vsel %vm847_vm7, 0.0, %v813_v11  ;;  %v6022_v26 = vsel %vm847_vm7, %v813_v11, 0.0  ;;  %v6028_v61 = vsel %vm62_vm0, %v2001_v58, %v2002_v52  ;;  %v6031_v35 = vsel %vm62_vm0, %v2004_v43, %v2005_v4 }
 0x2de   :  { %v1995_v28 = vrot.slane %v6016_v24, 1  ;;  %v1996_v40 = vrot.slane %v6022_v26, 1  ;;  %v1998_v56 = vrot.slane %v6019_v29, 1  ;;  %v1999_v11 = vrot.slane %v6025_v2, 1 }
 0x2df   :  { %4431 = vrot.lane.b32.xlu1 %v5965_v41, %s5089_s1  ;;  %4426 = vrot.lane.b32.xlu0 %v5971_v6, %s5089_s1  ;;  %v820_v58 = vrot.slane %v788_v45, 7  ;;  %v9601_v52 = vunpack.i.l.bf16 %v5784_v57  ;;  %v9602_v43 = vmax.f32 %v5898_v38, 0.0  ;;  %v9604_v47 = vmax.f32 %v5900_v60, 0.0 }
 0x2e0   :  { %v6044_v13 = vsel %vm62_vm0, %v1995_v28, %v1996_v40  ;;  %v6057_v44 = vsel %vm62_vm0, %v1998_v56, %v1999_v11  ;;  %v6060_v23 = vsel %vm847_vm7, 0.0, %v819_v27  ;;  %v6063_v45 = vsel %vm847_vm7, %v819_v27, 0.0 }
 0x2e1   :  { %v785_v4 = vsel %vm623_vm5, %v9602_v43, %v9601_v52  ;;  %v786_v25 = vsel %vm623_vm5, %v9604_v47, %v9603_v9  ;;  %v6068_v40 = vsel %vm847_vm7, 0.0, %v820_v58  ;;  %v6071_v57 = vsel %vm847_vm7, %v820_v58, 0.0 }
 0x2e2   :  { %v817_v28 = vrot.slane %v785_v4, 7  ;;  %v2013_v60 = vrot.slane %v6060_v23, 1  ;;  %v2014_v9 = vrot.slane %v6063_v45, 1  ;;  %v2016_v56 = vrot.slane %v6068_v40, 1 }
 0x2e3   :  { %4441 = vrot.lane.b32.xlu1 %v5904_v54, %s5090_s15  ;;  %4436 = vrot.lane.b32.xlu0 %v5906_v36, %s5090_s15  ;;  %v2017_v11 = vrot.slane %v6071_v57, 1  ;;  %v818_v27 = vrot.slane %v786_v25, 7  ;;  %v9605_v43 = vunpack.i.l.bf16 %v5790_v62  ;;  %v9606_v4 = vmax.f32 %v5908_v22, 0.0 }
 0x2e4   :  { %v6082_v52 = vsel %vm847_vm7, 0.0, %v817_v28  ;;  %v6085_v58 = vsel %vm847_vm7, %v817_v28, 0.0  ;;  %v9607_v25 = vunpack.i.h.bf16 %v5790_v62  ;;  %v9608_v38 = vmax.f32 %v5910_v30, 0.0 }
 0x2e5   :  { %v791_v47 = vsel %vm623_vm5, %v9606_v4, %v9605_v43  ;;  %v6098_v19 = vsel %vm62_vm0, %v2013_v60, %v2014_v9  ;;  %v6101_v18 = vsel %vm62_vm0, %v2016_v56, %v2017_v11  ;;  %v6104_v28 = vsel %vm847_vm7, 0.0, %v818_v27 }
 0x2e6   :  { %v792_v21 = vsel %vm623_vm5, %v9608_v38, %v9607_v25  ;;  %v6107_v17 = vsel %vm847_vm7, %v818_v27, 0.0  ;;  %v2007_v62 = vrot.slane %v6082_v52, 1  ;;  %v2008_v30 = vrot.slane %v6085_v58, 1 }
 0x2e7   :  { %4451 = vrot.lane.b32.xlu1 %v5912_v31, %s5090_s15  ;;  %4446 = vrot.lane.b32.xlu0 %v5918_v53, %s5090_s15  ;;  %v2010_v38 = vrot.slane %v6104_v28, 1  ;;  %v2011_v60 = vrot.slane %v6107_v17, 1  ;;  %v824_v9 = vrot.slane %v791_v47, 7  ;;  %v825_v56 = vrot.slane %v792_v21, 7 }
 0x2e8   :  { %v9609_v11 = vunpack.i.l.bf16 %v5788_v59  ;;  %v9610_v43 = vmax.f32 %v5920_v39, 0.0  ;;  %v6125_v4 = vsel %vm62_vm0, %v2007_v62, %v2008_v30  ;;  %v9611_v25 = vunpack.i.h.bf16 %v5788_v59 }
 0x2e9   :  { %v9612_v47 = vmax.f32 %v5922_v51, 0.0  ;;  %v9613_v39 = vunpack.i.l.bf16 %v5794_v32  ;;  %v6138_v16 = vsel %vm62_vm0, %v2010_v38, %v2011_v60  ;;  %v6141_v15 = vsel %vm847_vm7, 0.0, %v824_v9 }
 0x2ea   :  { %v789_v27 = vsel %vm623_vm5, %v9610_v43, %v9609_v11  ;;  %v9614_v11 = vmax.f32 %v5930_v50, 0.0  ;;  %v6144_v62 = vsel %vm847_vm7, 0.0, %v825_v56  ;;  %v6147_v59 = vsel %vm847_vm7, %v824_v9, 0.0 }
 0x2eb   :  { %4461 = vrot.lane.b32.xlu1 %v5944_v42, %s5090_s15  ;;  %4456 = vrot.lane.b32.xlu0 %v5952_v33, %s5090_s15  ;;  %v790_v21 = vsel %vm623_vm5, %v9612_v47, %v9611_v25  ;;  %v822_v22 = vrot.slane %v789_v27, 7  ;;  %v6152_v30 = vsel %vm847_vm7, %v825_v56, 0.0  ;;  %v2025_v50 = vrot.slane %v6141_v15, 1 }
 0x2ec   :  { %v795_v43 = vsel %vm623_vm5, %v9614_v11, %v9613_v39  ;;  %v2026_v38 = vrot.slane %v6147_v59, 1  ;;  %v2028_v60 = vrot.slane %v6144_v62, 1  ;;  %v2029_v27 = vrot.slane %v6152_v30, 1 }
 0x2ed   :  { %v823_v25 = vrot.slane %v790_v21, 7  ;;  %v6159_v47 = vsel %vm847_vm7, 0.0, %v822_v22  ;;  %v6169_v56 = vsel %vm847_vm7, %v822_v22, 0.0  ;;  %v9615_v11 = vunpack.i.h.bf16 %v5794_v32 }
 0x2ee   :  { %v6166_v9 = vsel %vm62_vm0, %v2025_v50, %v2026_v38  ;;  %v2019_v39 = vrot.slane %v6159_v47, 1  ;;  %v9616_v21 = vmax.f32 %v5932_v12, 0.0  ;;  %v6178_v14 = vsel %vm62_vm0, %v2028_v60, %v2029_v27 }
 0x2ef   :  { %4471 = vrot.lane.b32.xlu1 %v5965_v41, %s5090_s15  ;;  %4466 = vrot.lane.b32.xlu0 %v5971_v6, %s5090_s15  ;;  %v6181_v37 = vsel %vm847_vm7, 0.0, %v823_v25  ;;  %v6184_v50 = vsel %vm847_vm7, %v823_v25, 0.0  ;;  %v2020_v22 = vrot.slane %v6169_v56, 1  ;;  %v828_v10 = vrot.slane %v795_v43, 7 }
 0x2f0   :  { %v796_v51 = vsel %vm623_vm5, %v9616_v21, %v9615_v11  ;;  %v2022_v32 = vrot.slane %v6181_v37, 1  ;;  %v2023_v12 = vrot.slane %v6184_v50, 1  ;;  %v9617_v27 = vunpack.i.l.bf16 %v5792_v63 }
 0x2f1   :  { %v6192_v11 = vsel %vm62_vm0, %v2019_v39, %v2020_v22  ;;  %v829_v60 = vrot.slane %v796_v51, 7  ;;  %v9618_v21 = vmax.f32 %v5936_v3, 0.0  ;;  %v9620_v8 = vmax.f32 %v5938_v46, 0.0 }
 0x2f2   :  { %v6209_v43 = vsel %vm62_vm0, %v2022_v32, %v2023_v12  ;;  %v6214_v39 = vsel %vm847_vm7, 0.0, %v828_v10  ;;  %v6217_v63 = vsel %vm847_vm7, %v828_v10, 0.0  ;;  %v2203_v22 = vrot.slane %v6016_v24, 2 }
 0x2f3   :  { %v793_v25 = vsel %vm623_vm5, %v9618_v21, %v9617_v27  ;;  %v794_v38 = vsel %vm623_vm5, %v9620_v8, %v9619_v0  ;;  %4481 = vrot.lane.b32.xlu1 %v5904_v54, %s5091_s16  ;;  %4476 = vrot.lane.b32.xlu0 %v5906_v36, %s5091_s16  ;;  %v6220_v8 = vsel %vm847_vm7, 0.0, %v829_v60  ;;  %v6223_v0 = vsel %vm847_vm7, %v829_v60, 0.0 }
 0x2f4   :  { %v826_v51 = vrot.slane %v793_v25, 7  ;;  %v827_v54 = vrot.slane %v794_v38, 7  ;;  %v2204_v32 = vrot.slane %v6022_v26, 2  ;;  %v2037_v10 = vrot.slane %v6214_v39, 1 }
 0x2f5   :  { %v2038_v38 = vrot.slane %v6217_v63, 1  ;;  %v2206_v25 = vrot.slane %v6019_v29, 2  ;;  %v2209_v3 = vrot.slane %v5996_v49, 2  ;;  %v2210_v24 = vrot.slane %v6002_v55, 2 }
 0x2f6   :  { %v6226_v36 = vsel %vm847_vm7, 0.0, %v826_v51  ;;  %v6229_v46 = vsel %vm847_vm7, %v826_v51, 0.0  ;;  %v6240_v12 = vsel %vm847_vm7, 0.0, %v827_v54  ;;  %v6243_v60 = vsel %vm847_vm7, %v827_v54, 0.0 }
 0x2f7   :  { %4491 = vrot.lane.b32.xlu1 %v5912_v31, %s5091_s16  ;;  %4486 = vrot.lane.b32.xlu0 %v5918_v53, %s5091_s16  ;;  %v2031_v26 = vrot.slane %v6226_v36, 1  ;;  %v2032_v27 = vrot.slane %v6229_v46, 1  ;;  %v2034_v31 = vrot.slane %v6240_v12, 1  ;;  %v2035_v53 = vrot.slane %v6243_v60, 1 }
 0x2f8   :  { %v6251_v21 = vsel %vm1808_vm8, %v2203_v22, %v2204_v32  ;;  %v2207_v51 = vrot.slane %v6025_v2, 2  ;;  %v2212_v5 = vrot.slane %v5999_v48, 2  ;;  %v2213_v2 = vrot.slane %v6005_v20, 2 }
 0x2f9   :  { %v6256_v54 = vsel %vm62_vm0, %v2031_v26, %v2032_v27  ;;  %v6266_v22 = vsel %vm62_vm0, %v2034_v31, %v2035_v53  ;;  %v4565_v49 = vpack.i.bf16 %v6028_v61, %v6057_v44  ;;  %v6279_v55 = vsel %vm1808_vm8, %v2209_v3, %v2210_v24 }
 0x2fa   :  { %v6269_v29 = vsel %vm1808_vm8, %v2206_v25, %v2207_v51  ;;  %v4545_v48 = vpack.i.bf16 %v6266_v22, %v6256_v54  ;;  %v6283_v32 = vsel %vm1808_vm8, %v2212_v5, %v2213_v2  ;;  %v2216_v26 = vrot.slane %v6085_v58, 2 }
 0x2fb   :  { %4501 = vrot.lane.b32.xlu1 %v5944_v42, %s5091_s16  ;;  %4496 = vrot.lane.b32.xlu0 %v5952_v33, %s5091_s16  ;;  %v4555_v42 = vpack.i.bf16 %v6269_v29, %v6251_v21  ;;  %v2215_v33 = vrot.slane %v6082_v52, 2  ;;  %v2218_v20 = vrot.slane %v6104_v28, 2  ;;  %v2219_v27 = vrot.slane %v6107_v17, 2 }
 0x2fc   :  { %v4560_v31 = vpack.i.bf16 %v6283_v32, %v6279_v55  ;;  %v4575_v53 = vpack.i.bf16 %v6279_v55, %v6269_v29  ;;  %v4580_v3 = vpack.i.bf16 %v6125_v4, %v6031_v35  ;;  %v2221_v52 = vrot.slane %v6060_v23, 2 }
 0x2fd   :  { %v6300_v5 = vsel %vm1808_vm8, %v2215_v33, %v2216_v26  ;;  %v6303_v17 = vsel %vm1808_vm8, %v2218_v20, %v2219_v27  ;;  %v2222_v58 = vrot.slane %v6063_v45, 2  ;;  %v2224_v28 = vrot.slane %v6068_v40, 2 }
 0x2fe   :  { %v4570_v24 = vpack.i.bf16 %v6303_v17, %v6300_v5  ;;  %v2225_v23 = vrot.slane %v6071_v57, 2  ;;  %v2227_v51 = vrot.slane %v6159_v47, 2  ;;  %v2228_v45 = vrot.slane %v6169_v56, 2 }
 0x2ff   :  { %4511 = vrot.lane.b32.xlu1 %v5965_v41, %s5091_s16  ;;  %4506 = vrot.lane.b32.xlu0 %v5971_v6, %s5091_s16  ;;  %v4590_v41 = vpack.i.bf16 %v6300_v5, %v6283_v32  ;;  %v4595_v6 = vpack.i.bf16 %v6098_v19, %v6138_v16  ;;  %v6315_v25 = vsel %vm1808_vm8, %v2221_v52, %v2222_v58  ;;  %v2230_v40 = vrot.slane %v6181_v37, 2 }
 0x300   :  { %v2041_v2 = vrot.slane %v6223_v0, 1  ;;  %v6322_v33 = vsel %vm1808_vm8, %v2224_v28, %v2225_v23  ;;  %v2231_v57 = vrot.slane %v6184_v50, 2  ;;  %v4605_v26 = vpack.i.bf16 %v6315_v25, %v6303_v17 }
 0x301   :  { %v9621_v20 = vpack.i.bf16 %v6031_v35, %v6028_v61  ;;  %v9622_v37 = vpack.i.bf16 %v6057_v44, %v6044_v13  ;;  %v4585_v47 = vpack.i.bf16 %v6322_v33, %v6315_v25  ;;  %v2229_v56 = vsel %vm1808_vm8, %v2227_v51, %v2228_v45 }
 0x302   :  { %v2233_v50 = vrot.slane %v6141_v15, 2  ;;  %v2234_v27 = vrot.slane %v6147_v59, 2  ;;  %v6341_v52 = vsel %vm62_vm0, %v2037_v10, %v2038_v38  ;;  %v6344_v5 = vsel %vm1808_vm8, %v2230_v40, %v2231_v57 }
 0x303   :  { %4521 = vrot.lane.b32.xlu1 %v9621_v20, %s5093_s4  ;;  %4516 = vrot.lane.b32.xlu0 %v9622_v37, %s5093_s4  ;;  %v2236_v17 = vrot.slane %v6144_v62, 2  ;;  %v2237_v13 = vrot.slane %v6152_v30, 2  ;;  %v4600_v58 = vpack.i.bf16 %v6344_v5, %v2229_v56  ;;  %v4625_v15 = vpack.i.bf16 %v6166_v9, %v6209_v43 }
 0x304   :  { %v6350_v28 = vsel %vm1808_vm8, %v2233_v50, %v2234_v27  ;;  %v2239_v59 = vrot.slane %v6226_v36, 2  ;;  %v2240_v38 = vrot.slane %v6229_v46, 2  ;;  %v2242_v23 = vrot.slane %v6240_v12, 2 }
 0x305   :  { %v6356_v10 = vsel %vm1808_vm8, %v2236_v17, %v2237_v13  ;;  %v2243_v62 = vrot.slane %v6243_v60, 2  ;;  %v9623_v30 = vpack.i.bf16 %v6101_v18, %v6098_v19  ;;  %v9624_v25 = vpack.i.bf16 %v6138_v16, %v6125_v4 }
 0x306   :  { %v4615_v36 = vpack.i.bf16 %v6356_v10, %v6350_v28  ;;  %v4635_v46 = vpack.i.bf16 %v6350_v28, %v6344_v5  ;;  %v4640_v12 = vpack.i.bf16 %v6256_v54, %v6178_v14  ;;  %v2245_v60 = vrot.slane %v6214_v39, 2 }
 0x307   :  { %4531 = vrot.lane.b32.xlu1 %v9623_v30, %s5093_s4  ;;  %4526 = vrot.lane.b32.xlu0 %v9624_v25, %s5093_s4  ;;  %v6377_v51 = vsel %vm1808_vm8, %v2239_v59, %v2240_v38  ;;  %v6380_v19 = vsel %vm1808_vm8, %v2242_v23, %v2243_v62  ;;  %v2246_v16 = vrot.slane %v6217_v63, 2  ;;  %v2248_v45 = vrot.slane %v6220_v8, 2 }
 0x308   :  { %v4630_v40 = vpack.i.bf16 %v6380_v19, %v6377_v51  ;;  %v2249_v57 = vrot.slane %v6223_v0, 2  ;;  %v4650_v20 = vpack.i.bf16 %v6377_v51, %v6356_v10  ;;  %v4655_v39 = vpack.i.bf16 %v6341_v52, %v6266_v22 }
 0x309   :  { %v9625_v37 = vrot.slane %v6220_v8, 1  ;;  %v6397_v63 = vsel %vm1808_vm8, %v2245_v60, %v2246_v16  ;;  %v9627_v50 = vpack.i.bf16 %v6178_v14, %v6166_v9  ;;  %v9628_v0 = vpack.i.bf16 %v6209_v43, %v6192_v11 }
 0x30a   :  { %v6408_v27 = vsel %vm1808_vm8, %v2248_v45, %v2249_v57  ;;  %v4660_v8 = vpack.i.bf16 %v6397_v63, %v6380_v19  ;;  %v9630_v9 = vmov 0.0   ;;  %v4289_v17 = vunpack.i.h.bf16 %v5800_v7 }
 0x30b   :  { %v6394_v56 = vsel %vm62_vm0, %v9625_v37, %v2041_v2  ;;  %4541 = vrot.lane.b32.xlu1 %v9627_v50, %s5093_s4  ;;  %4536 = vrot.lane.b32.xlu0 %v9628_v0, %s5093_s4  ;;  %9629 = vst [vmem:[#allocation25_spill] sm:$0xff] %v6408_v27  ;;  %v821_v11 = vrot.slane %v9630_v9, 7  ;;  %v4288_v13 = vunpack.i.l.bf16 %v5800_v7  ;;  %v4645_v14 = vpack.i.bf16 %v6408_v27, %v6397_v63  ;;  %v9647_v63 = vld [vmem:[#allocation7_spill] sm:$0xff] }
 0x30c   :  { %9626 = vst [vmem:[#allocation24_spill] sm:$0xff] %v6394_v56  ;;  %v4550_v2 = vpack.i.bf16 %v6394_v56, %v6341_v52  ;;  %v4298_v54 = vunpack.i.l.bf16 %v5804_v1  ;;  %v4299_v60 = vunpack.i.h.bf16 %v5804_v1 }
 0x30d   :  { %v6445_v44 = vsel %vm847_vm7, 0.0, %v821_v11  ;;  %v873_v61 = vsel %vm847_vm7, %v821_v11, 0.0  ;;  %v9642_v11 = vld [vmem:[#allocation2_spill] sm:$0xff] }
 0x30e   :  { %9631 = vst [vmem:[#allocation26_spill] sm:$0xff] %v6445_v44  ;;  %v1603_v43 = vrot.slane %v6445_v44, 1  ;;  %v1604_v21 = vrot.slane %v873_v61, 1  ;;  %v1809_v29 = vrot.slane %v6445_v44, 2 }
 0x30f   :  { %4551 = vrot.lane.b32.xlu1 %v4550_v2, %s5093_s4  ;;  %4546 = vrot.lane.b32.xlu0 %v4545_v48, %s5093_s4 }
 0x310   :  { %v6451_v35 = vsel %vm62_vm0, %v1603_v43, %v1604_v21  ;;  %v4283_v21 = vunpack.i.l.bf16 %v9642_v11 }
 0x311   :  { %9632 = vst [vmem:[#allocation27_spill] sm:$0xff] %v6451_v35  ;;  %v4610_v4 = vpack.i.bf16 %v6451_v35, %v6101_v18 }
 0x313   :  { %4556 = vrot.lane.b32.xlu1 %v4555_v42, %s5094_s5  ;;  %4561 = vrot.lane.b32.xlu0 %v4560_v31, %s5094_s5 }
 0x317   :  { %4566 = vrot.lane.b32.xlu1 %v4565_v49, %s5095_s22  ;;  %v1810_v49 = vrot.slane %v873_v61, 2  ;;  %v4284_v61 = vunpack.i.h.bf16 %v9642_v11  ;;  %v9655_v11 = vld [vmem:[#allocation15_spill] sm:$0xff] }
 0x319   :  { %v6459_v48 = vsel %vm1808_vm8, %v1809_v29, %v1810_v49 }
 0x31a   :  { %9633 = vst [vmem:[#allocation28_spill] sm:$0xff] %v6459_v48  ;;  %v4620_v42 = vpack.i.bf16 %v6459_v48, %v6322_v33 }
 0x31b   :  { %4571 = vrot.lane.b32.xlu1 %v4570_v24, %s5094_s5  ;;  %v4278_v24 = vunpack.i.l.bf16 %v5796_v34 }
 0x31f   :  { %4576 = vrot.lane.b32.xlu1 %v4575_v53, %s5090_s15 }
 0x323   :  { %4581 = vrot.lane.b32.xlu1 %v4580_v3, %s5095_s22  ;;  %v4279_v3 = vunpack.i.h.bf16 %v5796_v34 }
 0x327   :  { %4586 = vrot.lane.b32.xlu1 %v4585_v47, %s5094_s5 }
 0x32b   :  { %4591 = vrot.lane.b32.xlu1 %v4590_v41, %s5090_s15 }
 0x32f   :  { %4596 = vrot.lane.b32.xlu1 %v4595_v6, %s5095_s22 }
 0x333   :  { %4601 = vrot.lane.b32.xlu1 %v4600_v58, %s5094_s5 }
 0x337   :  { %4606 = vrot.lane.b32.xlu1 %v4605_v26, %s5090_s15 }
 0x33b   :  { %4611 = vrot.lane.b32.xlu1 %v4610_v4, %s5095_s22  ;;  %v9643_v4 = vld [vmem:[#allocation3_spill] sm:$0xff] }
 0x33c   :  { %v4294_v29 = vunpack.i.h.bf16 %v9643_v4  ;;  %v4293_v52 = vunpack.i.l.bf16 %v9643_v4 }
 0x33f   :  { %4616 = vrot.lane.b32.xlu1 %v4615_v36, %s5094_s5 }
 0x343   :  { %4621 = vrot.lane.b32.xlu1 %v4620_v42, %s5090_s15 }
 0x345   :  { %v6465_v55 = vpop.permute.xlu1 %4401  ;;  %v4397_v32 = vpop.permute.xlu0 %4396 }
 0x346   :  { %v4399_v18 = vunpack.i.h.bf16 %v4397_v32  ;;  %v4398_v31 = vunpack.i.l.bf16 %v4397_v32 }
 0x347   :  { %4626 = vrot.lane.b32.xlu1 %v4625_v15, %s5095_s22 }
 0x348   :  { %v6474_v6 = vsel %vm623_vm5, %v4398_v31, %v4278_v24  ;;  %v6477_v33 = vsel %vm623_vm5, %v4399_v18, %v4279_v3  ;;  %v9645_v18 = vld [vmem:[#allocation5_spill] sm:$0xff]  ;;  %v9646_v24 = vld [vmem:[#allocation6_spill] sm:$0xff] }
 0x349   :  { %v6468_v53 = vpop.permute.xlu1 %4411  ;;  %v4407_v41 = vpop.permute.xlu0 %4406  ;;  %v9450_v34 = vrot.slane %v6474_v6, 7  ;;  %v9449_v58 = vrot.slane %v6477_v33, 7  ;;  %v4309_v31 = vunpack.i.h.bf16 %v9645_v18  ;;  %v4308_v3 = vunpack.i.l.bf16 %v9645_v18  ;;  %v9652_v18 = vld [vmem:[#allocation12_spill] sm:$0xff] }
 0x34a   :  { %v4409_v47 = vunpack.i.h.bf16 %v4407_v41  ;;  %v4408_v5 = vunpack.i.l.bf16 %v4407_v41  ;;  %v9660_v41 = vld [vmem:[#allocation19_spill] sm:$0xff] }
 0x34b   :  { %4631 = vrot.lane.b32.xlu1 %v4630_v40, %s5094_s5  ;;  %v6501_v7 = vsel %vm847_vm7, 0.0, %v9450_v34  ;;  %v6506_v62 = vsel %vm847_vm7, 0.0, %v9449_v58  ;;  %v9661_v34 = vld [vmem:[#allocation20_spill] sm:$0xff] }
 0x34c   :  { %v6489_v59 = vsel %vm623_vm5, %v4408_v5, %v4288_v13  ;;  %v6492_v38 = vsel %vm623_vm5, %v4409_v47, %v4289_v17  ;;  %9634 = vst [vmem:[#allocation29_spill] sm:$0xff] %v6501_v7  ;;  %9635 = vst [vmem:[#allocation30_spill] sm:$0xff] %v6506_v62  ;;  %v4404_v5 = vunpack.i.h.bf16 %v6465_v55  ;;  %v9648_v13 = vld [vmem:[#allocation8_spill] sm:$0xff]  ;;  %v9653_v17 = vld [vmem:[#allocation13_spill] sm:$0xff] }
 0x34d   :  { %v6479_v26 = vpop.permute.xlu1 %4421  ;;  %v4417_v28 = vpop.permute.xlu0 %4416  ;;  %v9448_v30 = vrot.slane %v6489_v59, 7  ;;  %v9447_v25 = vrot.slane %v6492_v38, 7  ;;  %v9658_v47 = vld [vmem:[#allocation18_spill] sm:$0xff] }
 0x34e   :  { %v4418_v23 = vunpack.i.l.bf16 %v4417_v28 }
 0x34f   :  { %4636 = vrot.lane.b32.xlu1 %v4635_v46, %s5090_s15  ;;  %v4419_v46 = vunpack.i.h.bf16 %v4417_v28  ;;  %v6526_v45 = vsel %vm847_vm7, 0.0, %v9448_v30  ;;  %v6531_v40 = vsel %vm847_vm7, 0.0, %v9447_v25 }
 0x350   :  { %v6520_v16 = vsel %vm623_vm5, %v4418_v23, %v4298_v54  ;;  %9636 = vst [vmem:[#allocation31_spill] sm:$0xff] %v6526_v45  ;;  %9637 = vst [vmem:[#allocation32_spill] sm:$0xff] %v6531_v40  ;;  %v4675_v50 = vpack.i.bf16 %v6531_v40, %v6526_v45  ;;  %v4403_v23 = vunpack.i.l.bf16 %v6465_v55  ;;  %v9649_v54 = vld [vmem:[#allocation9_spill] sm:$0xff] }
 0x351   :  { %v6486_v15 = vpop.permute.xlu1 %4431  ;;  %v6536_v1 = vsel %vm623_vm5, %v4419_v46, %v4299_v60  ;;  %v9446_v37 = vrot.slane %v6520_v16, 7  ;;  %v4427_v10 = vpop.permute.xlu0 %4426  ;;  %v4423_v46 = vunpack.i.l.bf16 %v6479_v26 }
 0x352   :  { %v9445_v0 = vrot.slane %v6536_v1, 7  ;;  %v4429_v49 = vunpack.i.h.bf16 %v4427_v10  ;;  %v4428_v22 = vunpack.i.l.bf16 %v4427_v10  ;;  %v9650_v10 = vld [vmem:[#allocation10_spill] sm:$0xff] }
 0x353   :  { %4641 = vrot.lane.b32.xlu1 %v4640_v12, %s5095_s22  ;;  %v4665_v12 = vpack.i.bf16 %v6506_v62, %v6501_v7  ;;  %v6552_v9 = vsel %vm847_vm7, 0.0, %v9446_v37 }
 0x354   :  { %9639 = vst [vmem:[#allocation34_spill] sm:$0xff] %v6552_v9  ;;  %v6561_v51 = vsel %vm847_vm7, 0.0, %v9445_v0  ;;  %v6595_v60 = vsel %vm623_vm5, %v4429_v49, %v4309_v31 }
 0x355   :  { %v6510_v36 = vpop.permute.xlu1 %4441  ;;  %4666 = vrot.lane.b32.xlu0 %v4665_v12, %s5096_s24  ;;  %9640 = vst [vmem:[#allocation35_spill] sm:$0xff] %v6561_v51  ;;  %v4685_v43 = vpack.i.bf16 %v6561_v51, %v6552_v9  ;;  %v6592_v12 = vsel %vm623_vm5, %v4428_v22, %v4308_v3  ;;  %v6605_v22 = vsel %vm623_vm5, %v4404_v5, %v4284_v61  ;;  %v6607_v3 = vpop.permute.xlu0 %4436  ;;  %v9452_v4 = vrot.slane %v6595_v60, 7 }
 0x356   :  { %v4414_v5 = vunpack.i.h.bf16 %v6468_v53  ;;  %v9453_v31 = vrot.slane %v6605_v22, 7 }
 0x357   :  { %4646 = vrot.lane.b32.xlu1 %v4645_v14, %s5094_s5  ;;  %v9656_v14 = vld [vmem:[#allocation16_spill] sm:$0xff] }
 0x358   :  { %v6647_v61 = vsel %vm623_vm5, %v4414_v5, %v4294_v29 }
 0x359   :  { %v6533_v57 = vpop.permute.xlu1 %4451  ;;  %4676 = vrot.lane.b32.xlu0 %v4675_v50, %s5096_s24  ;;  %v6613_v50 = vsel %vm623_vm5, %v4403_v23, %v4283_v21  ;;  %v4413_v21 = vunpack.i.l.bf16 %v6468_v53  ;;  %v9657_v23 = vld [vmem:[#allocation17_spill] sm:$0xff]  ;;  %v6641_v53 = vsel %vm847_vm7, 0.0, %v9452_v4  ;;  %v6649_v0 = vpop.permute.xlu0 %4446  ;;  %v6656_v4 = vsel %vm847_vm7, %v9453_v31, 0.0 }
 0x35a   :  { %9638 = vst [vmem:[#allocation33_spill] sm:$0xff] %v6533_v57  ;;  %9662 = vst [vmem:[#allocation3_spill] sm:$0xff] %v6656_v4  ;;  %v9665_v31 = vrot.slane %v6474_v6, 7  ;;  %v4444_v6 = vunpack.i.h.bf16 %v6510_v36  ;;  %v9672_v48 = vrot.slane %v6647_v61, 7  ;;  %v4438_v4 = vunpack.i.l.bf16 %v6607_v3 }
 0x35b   :  { %4651 = vrot.lane.b32.xlu1 %v4650_v20, %s5090_s15  ;;  %v6659_v25 = vsel %vm623_vm5, %v4413_v21, %v4293_v52  ;;  %v9692_v21 = vunpack.i.l.bf16 %v9648_v13 }
 0x35c   :  { %v6679_v52 = vsel %vm847_vm7, %v9665_v31, 0.0  ;;  %v6709_v31 = vsel %vm847_vm7, %v9672_v48, 0.0  ;;  %v9676_v56 = vrot.slane %v6659_v25, 7 }
 0x35d   :  { %v6546_v2 = vpop.permute.xlu1 %4461  ;;  %4686 = vrot.lane.b32.xlu0 %v4685_v43, %s5096_s24  ;;  %v9651_v43 = vld [vmem:[#allocation11_spill] sm:$0xff]  ;;  %9666 = vst [vmem:[#allocation5_spill] sm:$0xff] %v6679_v52  ;;  %v6701_v55 = vpop.permute.xlu0 %4456  ;;  %9673 = vst [vmem:[#allocation8_spill] sm:$0xff] %v6709_v31 }
 0x35e   :  { %v6724_v35 = vsel %vm847_vm7, %v9676_v56, 0.0 }
 0x35f   :  { %4656 = vrot.lane.b32.xlu1 %v4655_v39, %s5095_s22  ;;  %v9644_v39 = vld [vmem:[#allocation4_spill] sm:$0xff]  ;;  %9677 = vst [vmem:[#allocation9_spill] sm:$0xff] %v6724_v35 }
 0x360   :  { %v4304_v42 = vunpack.i.h.bf16 %v9644_v39  ;;  %v4303_v32 = vunpack.i.l.bf16 %v9644_v39  ;;  %v9451_v39 = vrot.slane %v6592_v12, 7 }
 0x361   :  { %v6563_v20 = vpop.permute.xlu1 %4471 }
 0x362   :  { %9641 = vst [vmem:[#allocation36_spill] sm:$0xff] %v6563_v20  ;;  %v6636_v37 = vsel %vm847_vm7, 0.0, %v9451_v39  ;;  %v6670_v5 = vsel %vm623_vm5, %v4423_v46, %v4303_v32  ;;  %v9668_v32 = vrot.slane %v6477_v33, 7  ;;  %v9675_v33 = vunpack.i.l.bf16 %v9646_v24 }
 0x363   :  { %4661 = vrot.lane.b32.xlu1 %v4660_v8, %s5090_s15  ;;  %v4424_v8 = vunpack.i.h.bf16 %v6479_v26  ;;  %9659 = vst [vmem:[#allocation2_spill] sm:$0xff] %v6636_v37  ;;  %v9663_v26 = vrot.slane %v6613_v50, 7  ;;  %v4695_v39 = vpack.i.bf16 %v6641_v53, %v6636_v37  ;;  %v9737_v31 = vrot.slane %v6670_v5, 7 }
 0x364   :  { %v6688_v46 = vsel %vm847_vm7, %v9668_v32, 0.0 }
 0x365   :  { %v6583_v19 = vpop.permute.xlu1 %4481  ;;  %v6664_v58 = vsel %vm847_vm7, %v9663_v26, 0.0  ;;  %v6667_v29 = vsel %vm623_vm5, %v4424_v8, %v4304_v42  ;;  %v4434_v26 = vunpack.i.h.bf16 %v6486_v15  ;;  %v4433_v42 = vunpack.i.l.bf16 %v6486_v15  ;;  %v9667_v8 = vld [vmem:[#allocation21_spill] sm:$0xff]  ;;  %9669 = vst [vmem:[#allocation6_spill] sm:$0xff] %v6688_v46  ;;  %4696 = vrot.lane.b32.xlu0 %v4695_v39, %s5096_s24 }
 0x366   :  { %9664 = vst [vmem:[#allocation4_spill] sm:$0xff] %v6664_v58  ;;  %v9674_v15 = vunpack.i.h.bf16 %v9646_v24  ;;  %v9678_v39 = vrot.slane %v6489_v59, 7  ;;  %v9681_v24 = vrot.slane %v6492_v38, 7  ;;  %v9685_v59 = vrot.slane %v6670_v5, 7 }
 0x367   :  { %v6719_v32 = vsel %vm623_vm5, %v4433_v42, %v9675_v33  ;;  %v9683_v33 = vrot.slane %v6667_v29, 7  ;;  %v9689_v38 = vrot.slane %v6536_v1, 7  ;;  %v9704_v1 = vunpack.i.h.bf16 %v9647_v63 }
 0x368   :  { %v6714_v27 = vsel %vm623_vm5, %v4434_v26, %v9674_v15  ;;  %v6729_v48 = vsel %vm847_vm7, %v9678_v39, 0.0  ;;  %v4443_v15 = vunpack.i.l.bf16 %v6510_v36  ;;  %v6738_v42 = vsel %vm847_vm7, %v9681_v24, 0.0 }
 0x369   :  { %v6609_v49 = vpop.permute.xlu1 %4491  ;;  %9679 = vst [vmem:[#allocation11_spill] sm:$0xff] %v6729_v48  ;;  %9682 = vst [vmem:[#allocation12_spill] sm:$0xff] %v6738_v42  ;;  %v6743_v56 = vsel %vm847_vm7, %v9683_v33, 0.0  ;;  %v6748_v39 = vsel %vm847_vm7, %v9685_v59, 0.0  ;;  %v6774_v33 = vpop.permute.xlu0 %4466  ;;  %v9739_v35 = vrot.slane %v6667_v29, 7  ;;  %v4459_v48 = vunpack.i.h.bf16 %v6701_v55 }
 0x36a   :  { %9684 = vst [vmem:[#allocation13_spill] sm:$0xff] %v6743_v56  ;;  %9686 = vst [vmem:[#allocation15_spill] sm:$0xff] %v6748_v39  ;;  %v1254_v24 = vsel %vm623_vm5, %v4443_v15, %v9692_v21  ;;  %v9696_v21 = vrot.slane %v6719_v32, 7 }
 0x36c   :  { %v6791_v15 = vsel %vm847_vm7, %v9696_v21, 0.0 }
 0x36d   :  { %v6629_v30 = vpop.permute.xlu1 %4501  ;;  %9697 = vst [vmem:[#allocation20_spill] sm:$0xff] %v6791_v15 }
 0x371   :  { %v6674_v28 = vpop.permute.xlu1 %4511 }
 0x375   :  { %v6703_v44 = vpop.permute.xlu1 %4521 }
 0x376   :  { %9671 = vst [vmem:[#allocation7_spill] sm:$0xff] %v6703_v44  ;;  %v9680_v44 = vunpack.i.h.bf16 %v9648_v13 }
 0x378   :  { %v1255_v26 = vsel %vm623_vm5, %v4444_v6, %v9680_v44  ;;  %v9687_v44 = vrot.slane %v6520_v16, 7  ;;  %v6759_v6 = vsel %vm847_vm7, %v9689_v38, 0.0  ;;  %v4439_v16 = vunpack.i.h.bf16 %v6607_v3 }
 0x379   :  { %9690 = vst [vmem:[#allocation17_spill] sm:$0xff] %v6759_v6  ;;  %v6763_v58 = vpop.permute.xlu1 %4531  ;;  %v1287_v52 = vrot.slane %v1255_v26, 7  ;;  %v9693_v3 = vunpack.i.l.bf16 %v9647_v63  ;;  %v9694_v38 = vrot.slane %v6714_v27, 7 }
 0x37a   :  { %v6754_v36 = vsel %vm847_vm7, %v9687_v44, 0.0  ;;  %9691 = vst [vmem:[#allocation18_spill] sm:$0xff] %v6763_v58  ;;  %v9698_v58 = vrot.slane %v6592_v12, 7  ;;  %v1286_v44 = vrot.slane %v1254_v24, 7  ;;  %v1253_v21 = vsel %vm623_vm5, %v4439_v16, %v9704_v1 }
 0x37b   :  { %9688 = vst [vmem:[#allocation16_spill] sm:$0xff] %v6754_v36  ;;  %v1252_v46 = vsel %vm623_vm5, %v4438_v4, %v9693_v3  ;;  %v6786_v13 = vsel %vm847_vm7, %v9694_v38, 0.0  ;;  %v9701_v4 = vrot.slane %v6595_v60, 7  ;;  %v6806_v38 = vsel %vm847_vm7, 0.0, %v1287_v52 }
 0x37c   :  { %9695 = vst [vmem:[#allocation19_spill] sm:$0xff] %v6786_v13  ;;  %v6796_v26 = vsel %vm847_vm7, %v9698_v58, 0.0  ;;  %9703 = vst [vmem:[#allocation39_spill] sm:$0xff] %v6806_v38  ;;  %v6814_v56 = vsel %vm847_vm7, %v1287_v52, 0.0  ;;  %v4453_v24 = vunpack.i.l.bf16 %v6533_v57  ;;  %v1285_v12 = vrot.slane %v1253_v21, 7  ;;  %v4477_v58 = vpop.permute.xlu0 %4476 }
 0x37d   :  { %9699 = vst [vmem:[#allocation21_spill] sm:$0xff] %v6796_v26  ;;  %v6798_v59 = vpop.permute.xlu1 %4541  ;;  %v6803_v3 = vsel %vm847_vm7, %v9701_v4, 0.0  ;;  %9705 = vst [vmem:[#allocation40_spill] sm:$0xff] %v6814_v56  ;;  %v4448_v4 = vunpack.i.l.bf16 %v6649_v0  ;;  %v6832_v39 = vsel %vm847_vm7, %v1286_v44, 0.0  ;;  %v4449_v16 = vunpack.i.h.bf16 %v6649_v0 }
 0x37e   :  { %9700 = vst [vmem:[#allocation37_spill] sm:$0xff] %v6798_v59  ;;  %9702 = vst [vmem:[#allocation38_spill] sm:$0xff] %v6803_v3  ;;  %v1284_v59 = vrot.slane %v1252_v46, 7  ;;  %v6827_v46 = vsel %vm847_vm7, 0.0, %v1286_v44  ;;  %v9710_v1 = vunpack.i.l.bf16 %v9650_v10  ;;  %v9711_v57 = vrot.slane %v6613_v50, 7 }
 0x37f   :  { %9707 = vst [vmem:[#allocation42_spill] sm:$0xff] %v6827_v46  ;;  %9708 = vst [vmem:[#allocation43_spill] sm:$0xff] %v6832_v39  ;;  %v9712_v44 = vrot.slane %v6605_v22, 7  ;;  %v6853_v26 = vsel %vm847_vm7, 0.0, %v1285_v12  ;;  %v4479_v21 = vunpack.i.h.bf16 %v4477_v58  ;;  %v9716_v36 = vunpack.i.h.bf16 %v9649_v54 }
 0x380   :  { %v6835_v63 = vsel %vm847_vm7, 0.0, %v1284_v59  ;;  %v1258_v52 = vsel %vm623_vm5, %v4453_v24, %v9710_v1  ;;  %v6845_v60 = vsel %vm847_vm7, 0.0, %v9711_v57  ;;  %9713 = vst [vmem:[#allocation45_spill] sm:$0xff] %v6853_v26  ;;  %v6856_v0 = vsel %vm847_vm7, %v1284_v59, 0.0 }
 0x381   :  { %v6823_v6 = vpop.permute.xlu1 %4551  ;;  %9709 = vst [vmem:[#allocation44_spill] sm:$0xff] %v6835_v63  ;;  %v6850_v13 = vsel %vm847_vm7, 0.0, %v9712_v44  ;;  %v9715_v44 = vunpack.i.l.bf16 %v9649_v54  ;;  %v6870_v59 = vsel %vm847_vm7, %v1285_v12, 0.0  ;;  %v9731_v3 = vunpack.i.h.bf16 %v9656_v14 }
 0x382   :  { %9706 = vst [vmem:[#allocation41_spill] sm:$0xff] %v6823_v6  ;;  %v4478_v6 = vunpack.i.l.bf16 %v4477_v58  ;;  %v4670_v24 = vpack.i.bf16 %v6850_v13, %v6845_v60  ;;  %v1290_v58 = vrot.slane %v1258_v52, 7  ;;  %v9718_v52 = vunpack.i.h.bf16 %v9655_v11 }
 0x383   :  { %v1256_v10 = vsel %vm623_vm5, %v4448_v4, %v9715_v44  ;;  %v9717_v4 = vunpack.i.l.bf16 %v9655_v11 }
 0x384   :  { %4671 = vrot.lane.b32.xlu1 %v4670_v24, %s5096_s24  ;;  %v1288_v12 = vrot.slane %v1256_v10, 7  ;;  %v6887_v54 = vsel %vm623_vm5, %v4479_v21, %v9718_v52  ;;  %v9720_v24 = vrot.slane %v6647_v61, 7  ;;  %v6909_v52 = vsel %vm847_vm7, %v1290_v58, 0.0 }
 0x385   :  { %v6860_v1 = vpop.permute.xlu1 %4556  ;;  %v6882_v44 = vsel %vm623_vm5, %v4478_v6, %v9717_v4  ;;  %9723 = vst [vmem:[#allocation49_spill] sm:$0xff] %v6909_v52  ;;  %v9733_v11 = vrot.slane %v6887_v54, 7 }
 0x386   :  { %9714 = vst [vmem:[#allocation46_spill] sm:$0xff] %v6860_v1  ;;  %v1257_v1 = vsel %vm623_vm5, %v4449_v16, %v9716_v36  ;;  %v9719_v36 = vrot.slane %v6659_v25, 7  ;;  %v6897_v9 = vsel %vm847_vm7, 0.0, %v9720_v24  ;;  %v6906_v25 = vsel %vm847_vm7, 0.0, %v1290_v58 }
 0x387   :  { %v1289_v21 = vrot.slane %v1257_v1, 7  ;;  %9722 = vst [vmem:[#allocation48_spill] sm:$0xff] %v6906_v25  ;;  %v4483_v24 = vunpack.i.l.bf16 %v6583_v19  ;;  %v6919_v4 = vsel %vm847_vm7, 0.0, %v1288_v12  ;;  %v4464_v58 = vunpack.i.h.bf16 %v6546_v2 }
 0x388   :  { %v6892_v16 = vsel %vm847_vm7, 0.0, %v9719_v36  ;;  %v4484_v36 = vunpack.i.h.bf16 %v6583_v19  ;;  %9724 = vst [vmem:[#allocation50_spill] sm:$0xff] %v6919_v4  ;;  %v6930_v6 = vsel %vm847_vm7, %v1288_v12, 0.0  ;;  %v9729_v22 = vrot.slane %v6882_v44, 7 }
 0x389   :  { %v6899_v50 = vpop.permute.xlu1 %4566  ;;  %v4680_v10 = vpack.i.bf16 %v6897_v9, %v6892_v16  ;;  %v6927_v19 = vsel %vm847_vm7, 0.0, %v1289_v21  ;;  %9727 = vst [vmem:[#allocation53_spill] sm:$0xff] %v6930_v6  ;;  %v6933_v61 = vsel %vm847_vm7, %v1289_v21, 0.0  ;;  %v6976_v12 = vsel %vm847_vm7, 0.0, %v9737_v31 }
 0x38a   :  { %9721 = vst [vmem:[#allocation47_spill] sm:$0xff] %v6899_v50  ;;  %9726 = vst [vmem:[#allocation52_spill] sm:$0xff] %v6927_v19  ;;  %v6942_v15 = vsel %vm847_vm7, 0.0, %v9729_v22  ;;  %v6948_v21 = vsel %vm623_vm5, %v4484_v36, %v9731_v3  ;;  %v6958_v50 = vsel %vm847_vm7, 0.0, %v9733_v11 }
 0x38b   :  { %9728 = vst [vmem:[#allocation54_spill] sm:$0xff] %v6933_v61  ;;  %4681 = vrot.lane.b32.xlu1 %v4680_v10, %s5096_s24  ;;  %9730 = vst [vmem:[#allocation55_spill] sm:$0xff] %v6942_v15  ;;  %v9732_v10 = vunpack.i.l.bf16 %v9656_v14  ;;  %v9736_v14 = vunpack.i.h.bf16 %v9652_v18  ;;  %v4705_v11 = vpack.i.bf16 %v6958_v50, %v6942_v15  ;;  %v9745_v42 = vrot.slane %v6948_v21, 7 }
 0x38c   :  { %9734 = vst [vmem:[#allocation56_spill] sm:$0xff] %v6958_v50  ;;  %9738 = vst [vmem:[#allocation58_spill] sm:$0xff] %v6976_v12  ;;  %v9751_v50 = vunpack.i.l.bf16 %v9652_v18 }
 0x38d   :  { %v6923_v57 = vpop.permute.xlu1 %4571  ;;  %v6953_v1 = vsel %vm623_vm5, %v4483_v24, %v9732_v10  ;;  %v1263_v36 = vsel %vm623_vm5, %v4464_v58, %v9736_v14  ;;  %v4493_v14 = vunpack.i.l.bf16 %v6609_v49  ;;  %4706 = vrot.lane.b32.xlu0 %v4705_v11, %s5097_s25  ;;  %v9741_v11 = vunpack.i.h.bf16 %v9657_v23 }
 0x38e   :  { %9725 = vst [vmem:[#allocation51_spill] sm:$0xff] %v6923_v57  ;;  %v4487_v57 = vpop.permute.xlu0 %4486  ;;  %v1295_v58 = vrot.slane %v1263_v36, 7  ;;  %v7015_v29 = vsel %vm847_vm7, 0.0, %v9745_v42 }
 0x38f   :  { %v4489_v24 = vunpack.i.h.bf16 %v4487_v57  ;;  %v4488_v10 = vunpack.i.l.bf16 %v4487_v57  ;;  %v4494_v57 = vunpack.i.h.bf16 %v6609_v49  ;;  %v9740_v49 = vunpack.i.l.bf16 %v9657_v23  ;;  %9746 = vst [vmem:[#allocation61_spill] sm:$0xff] %v7015_v29 }
 0x391   :  { %v6964_v3 = vpop.permute.xlu1 %4576  ;;  %v6997_v7 = vsel %vm623_vm5, %v4488_v10, %v9740_v49  ;;  %v7002_v38 = vsel %vm623_vm5, %v4489_v24, %v9741_v11  ;;  %v9747_v10 = vrot.slane %v6719_v32, 7  ;;  %v9748_v24 = vrot.slane %v6714_v27, 7 }
 0x392   :  { %9735 = vst [vmem:[#allocation57_spill] sm:$0xff] %v6964_v3  ;;  %v6981_v3 = vsel %vm847_vm7, 0.0, %v9739_v35  ;;  %v4463_v35 = vunpack.i.l.bf16 %v6546_v2  ;;  %v4497_v22 = vpop.permute.xlu0 %4496  ;;  %v9743_v2 = vrot.slane %v6953_v1, 7  ;;  %v9749_v49 = vunpack.i.h.bf16 %v9658_v47 }
 0x393   :  { %v4690_v5 = vpack.i.bf16 %v6981_v3, %v6976_v12  ;;  %v7020_v23 = vsel %vm847_vm7, 0.0, %v9747_v10  ;;  %v4498_v32 = vunpack.i.l.bf16 %v4497_v22  ;;  %v4458_v10 = vunpack.i.l.bf16 %v6701_v55 }
 0x394   :  { %v7010_v36 = vsel %vm847_vm7, 0.0, %v9743_v2  ;;  %v7030_v11 = vsel %vm623_vm5, %v4494_v57, %v9749_v49  ;;  %v9750_v2 = vunpack.i.l.bf16 %v9658_v47  ;;  %v1262_v57 = vsel %vm623_vm5, %v4463_v35, %v9751_v50 }
 0x395   :  { %4691 = vrot.lane.b32.xlu1 %v4690_v5, %s5096_s24  ;;  %v7005_v31 = vpop.permute.xlu1 %4581  ;;  %9744 = vst [vmem:[#allocation60_spill] sm:$0xff] %v7010_v36  ;;  %v7025_v5 = vsel %vm847_vm7, 0.0, %v9748_v24  ;;  %v4710_v24 = vpack.i.bf16 %v7015_v29, %v7010_v36  ;;  %v9752_v47 = vunpack.i.h.bf16 %v9651_v43  ;;  %v4469_v49 = vunpack.i.h.bf16 %v6774_v33 }
 0x396   :  { %9742 = vst [vmem:[#allocation59_spill] sm:$0xff] %v7005_v31  ;;  %v7035_v42 = vsel %vm623_vm5, %v4493_v14, %v9750_v2  ;;  %v4499_v31 = vunpack.i.h.bf16 %v4497_v22  ;;  %v4700_v55 = vpack.i.bf16 %v7025_v5, %v7020_v23  ;;  %v4468_v2 = vunpack.i.l.bf16 %v6774_v33  ;;  %v4507_v18 = vpop.permute.xlu0 %4506 }
 0x397   :  { %v7048_v14 = vsel %vm623_vm5, %v4459_v48, %v9752_v47  ;;  %4711 = vrot.lane.b32.xlu0 %v4710_v24, %s5097_s25  ;;  %v4504_v50 = vunpack.i.h.bf16 %v6629_v30  ;;  %v4503_v48 = vunpack.i.l.bf16 %v6629_v30  ;;  %v9753_v35 = vunpack.i.l.bf16 %v9660_v41 }
 0x398   :  { %v9754_v22 = vunpack.i.h.bf16 %v9660_v41  ;;  %v7074_v24 = vsel %vm847_vm7, 0.0, %v1295_v58  ;;  %v1294_v27 = vrot.slane %v1262_v57, 7  ;;  %v9756_v30 = vrot.slane %v6997_v7, 7 }
 0x399   :  { %v7063_v47 = vsel %vm623_vm5, %v4498_v32, %v9753_v35  ;;  %4701 = vrot.lane.b32.xlu1 %v4700_v55, %s5096_s24  ;;  %v7071_v33 = vpop.permute.xlu1 %4586  ;;  %v9758_v32 = vrot.slane %v7002_v38, 7  ;;  %v4715_v35 = vpack.i.bf16 %v6845_v60, %v6506_v62  ;;  %v9766_v62 = vunpack.i.l.bf16 %v9661_v34 }
 0x39a   :  { %v7068_v56 = vsel %vm623_vm5, %v4499_v31, %v9754_v22  ;;  %9755 = vst [vmem:[#allocation62_spill] sm:$0xff] %v7071_v33  ;;  %v7079_v36 = vsel %vm847_vm7, 0.0, %v9756_v30  ;;  %v7087_v31 = vsel %vm847_vm7, %v1295_v58, 0.0  ;;  %v9760_v22 = vunpack.i.l.bf16 %v9651_v43 }
 0x39b   :  { %9757 = vst [vmem:[#allocation63_spill] sm:$0xff] %v7079_v36  ;;  %v7084_v41 = vsel %vm847_vm7, 0.0, %v9758_v32  ;;  %v9761_v32 = vrot.slane %v7035_v42, 7  ;;  %v9763_v58 = vrot.slane %v7030_v11, 7  ;;  %v7116_v30 = vsel %vm623_vm5, %v4503_v48, %v9766_v62 }
 0x39c   :  { %9759 = vst [vmem:[#allocation64_spill] sm:$0xff] %v7084_v41  ;;  %v1260_v55 = vsel %vm623_vm5, %v4458_v10, %v9760_v22  ;;  %v4720_v57 = vpack.i.bf16 %v7084_v41, %v7079_v36  ;;  %v9765_v10 = vunpack.i.h.bf16 %v9661_v34  ;;  %v4509_v33 = vunpack.i.h.bf16 %v4507_v18 }
 0x39d   :  { %v7101_v29 = vsel %vm847_vm7, 0.0, %v9761_v32  ;;  %v7106_v43 = vsel %vm847_vm7, 0.0, %v9763_v58  ;;  %v4508_v36 = vunpack.i.l.bf16 %v4507_v18  ;;  %4716 = vrot.lane.b32.xlu1 %v4715_v35, %s5098_s2  ;;  %v7123_v41 = vsel %vm847_vm7, 0.0, %v1294_v27 }
 0x39e   :  { %9762 = vst [vmem:[#allocation65_spill] sm:$0xff] %v7101_v29  ;;  %9764 = vst [vmem:[#allocation66_spill] sm:$0xff] %v7106_v43  ;;  %v7111_v22 = vsel %vm623_vm5, %v4504_v50, %v9765_v10  ;;  %4721 = vrot.lane.b32.xlu0 %v4720_v57, %s5097_s25  ;;  %v7126_v50 = vsel %vm847_vm7, %v1294_v27, 0.0  ;;  %v1292_v34 = vrot.slane %v1260_v55, 7  ;;  %v1293_v62 = vrot.slane %v7048_v14, 7  ;;  %v7133_v57 = vpop.permute.xlu1 %4591 }
 0x39f   :  { %v4730_v18 = vpack.i.bf16 %v7106_v43, %v7101_v29  ;;  %v4725_v48 = vpack.i.bf16 %v6526_v45, %v6850_v13  ;;  %9767 = vst [vmem:[#allocation67_spill] sm:$0xff] %v7133_v57  ;;  %v9768_v32 = vrot.slane %v7063_v47, 7  ;;  %v9770_v55 = vrot.slane %v7068_v56, 7 }
 0x3a0   :  { %v4514_v58 = vunpack.i.h.bf16 %v6674_v28  ;;  %v4513_v45 = vunpack.i.l.bf16 %v6674_v28  ;;  %v9772_v57 = vunpack.i.l.bf16 %v9667_v8  ;;  %v9773_v10 = vunpack.i.h.bf16 %v9667_v8 }
 0x3a1   :  { %v7140_v27 = vsel %vm847_vm7, 0.0, %v9768_v32  ;;  %v7145_v14 = vsel %vm847_vm7, 0.0, %v9770_v55  ;;  %4726 = vrot.lane.b32.xlu1 %v4725_v48, %s5098_s2  ;;  %v9775_v8 = vunpack.i.h.bf16 %v9653_v17  ;;  %v4735_v48 = vpack.i.bf16 %v6892_v16, %v6531_v40 }
 0x3a2   :  { %9769 = vst [vmem:[#allocation68_spill] sm:$0xff] %v7140_v27  ;;  %9771 = vst [vmem:[#allocation69_spill] sm:$0xff] %v7145_v14  ;;  %v7152_v35 = vsel %vm623_vm5, %v4508_v36, %v9772_v57  ;;  %v7157_v29 = vsel %vm623_vm5, %v4509_v33, %v9773_v10  ;;  %4731 = vrot.lane.b32.xlu0 %v4730_v18, %s5097_s25  ;;  %v9774_v36 = vunpack.i.l.bf16 %v9653_v17  ;;  %v9776_v55 = vrot.slane %v7116_v30, 7 }
 0x3a3   :  { %v1265_v33 = vsel %vm623_vm5, %v4469_v49, %v9775_v8  ;;  %v4740_v18 = vpack.i.bf16 %v7145_v14, %v7140_v27  ;;  %v7188_v49 = vsel %vm847_vm7, 0.0, %v1292_v34  ;;  %v9780_v8 = vld [vmem:[#allocation22_spill] sm:$0xff]  ;;  %v7208_v40 = vsel %vm847_vm7, %v1292_v34, 0.0 }
 0x3a4   :  { %v1264_v57 = vsel %vm623_vm5, %v4468_v2, %v9774_v36  ;;  %v7180_v28 = vsel %vm847_vm7, 0.0, %v9776_v55  ;;  %v9778_v2 = vrot.slane %v7111_v22, 7  ;;  %v7191_v36 = vsel %vm847_vm7, 0.0, %v1293_v62  ;;  %v9789_v34 = vld [vmem:[#allocation14_spill] sm:$0xff] }
 0x3a5   :  { %9777 = vst [vmem:[#allocation70_spill] sm:$0xff] %v7180_v28  ;;  %v9781_v43 = vunpack.i.h.bf16 %v9780_v8  ;;  %v9782_v10 = vunpack.i.l.bf16 %v9780_v8  ;;  %4736 = vrot.lane.b32.xlu1 %v4735_v48, %s5098_s2  ;;  %v7211_v27 = vsel %vm847_vm7, %v1293_v62, 0.0  ;;  %v1296_v14 = vrot.slane %v1264_v57, 7 }
 0x3a6   :  { %v7185_v17 = vsel %vm847_vm7, 0.0, %v9778_v2  ;;  %4741 = vrot.lane.b32.xlu0 %v4740_v18, %s5097_s25  ;;  %v7205_v2 = vpop.permute.xlu1 %4596  ;;  %v9784_v18 = vld [vmem:[#allocation26_spill] sm:$0xff]  ;;  %v9787_v57 = vrot.slane %v7157_v29, 7 }
 0x3a7   :  { %9779 = vst [vmem:[#allocation71_spill] sm:$0xff] %v7185_v17  ;;  %v7196_v32 = vsel %vm623_vm5, %v4514_v58, %v9781_v43  ;;  %v7201_v55 = vsel %vm623_vm5, %v4513_v45, %v9782_v10  ;;  %9783 = vst [vmem:[#allocation22_spill] sm:$0xff] %v7205_v2  ;;  %v1297_v43 = vrot.slane %v1265_v33, 7  ;;  %v4750_v45 = vpack.i.bf16 %v7185_v17, %v7180_v28 }
 0x3a8   :  { %v4745_v48 = vpack.i.bf16 %v9784_v18, %v6897_v9  ;;  %v9785_v2 = vrot.slane %v7152_v35, 7  ;;  %v7229_v33 = vsel %vm847_vm7, 0.0, %v9787_v57  ;;  %v9790_v28 = vunpack.i.l.bf16 %v9789_v34 }
 0x3a9   :  { %9788 = vst [vmem:[#allocation73_spill] sm:$0xff] %v7229_v33  ;;  %v9791_v17 = vunpack.i.l.bf16 %v6563_v20  ;;  %v7246_v58 = vsel %vm847_vm7, 0.0, %v1296_v14  ;;  %v7249_v18 = vsel %vm847_vm7, 0.0, %v1297_v43  ;;  %v9793_v34 = vrot.slane %v7201_v55, 7 }
 0x3aa   :  { %v7224_v62 = vsel %vm847_vm7, 0.0, %v9785_v2  ;;  %4751 = vrot.lane.b32.xlu0 %v4750_v45, %s5097_s25  ;;  %4746 = vrot.lane.b32.xlu1 %v4745_v48, %s5098_s2  ;;  %v4755_v2 = vpack.i.bf16 %v6976_v12, %v6561_v51  ;;  %v7257_v8 = vpop.permute.xlu1 %4601  ;;  %v9795_v45 = vrot.slane %v7196_v32, 7  ;;  %v9798_v51 = vrot.slane %v6882_v44, 7 }
 0x3ab   :  { %9786 = vst [vmem:[#allocation72_spill] sm:$0xff] %v7224_v62  ;;  %v7243_v57 = vsel %vm623_vm5, %v9791_v17, %v9790_v28  ;;  %v4760_v48 = vpack.i.bf16 %v7229_v33, %v7224_v62  ;;  %9792 = vst [vmem:[#allocation74_spill] sm:$0xff] %v7257_v8  ;;  %v7260_v28 = vsel %vm847_vm7, %v1296_v14, 0.0  ;;  %v7263_v17 = vsel %vm847_vm7, %v1297_v43, 0.0 }
 0x3ac   :  { %v7268_v10 = vsel %vm847_vm7, 0.0, %v9793_v34  ;;  %v7273_v20 = vsel %vm847_vm7, 0.0, %v9795_v45  ;;  %v9796_v43 = vrot.slane %v6948_v21, 7  ;;  %v9797_v45 = vrot.slane %v6953_v1, 7 }
 0x3ad   :  { %9794 = vst [vmem:[#allocation75_spill] sm:$0xff] %v7268_v10  ;;  %v7294_v14 = vsel %vm847_vm7, %v9798_v51, 0.0  ;;  %v9799_v12 = vrot.slane %v6887_v54, 7  ;;  %v4770_v1 = vpack.i.bf16 %v7273_v20, %v7268_v10  ;;  %v9801_v44 = vrot.slane %v7030_v11, 7 }
 0x3ae   :  { %4761 = vrot.lane.b32.xlu0 %v4760_v48, %s5097_s25  ;;  %4756 = vrot.lane.b32.xlu1 %v4755_v2, %s5098_s2  ;;  %v7284_v34 = vsel %vm847_vm7, %v9796_v43, 0.0  ;;  %v7289_v62 = vsel %vm847_vm7, %v9797_v45, 0.0  ;;  %v4765_v43 = vpack.i.bf16 %v6636_v37, %v6981_v3  ;;  %v7317_v37 = vpop.permute.xlu1 %4606  ;;  %v9802_v51 = vrot.slane %v7035_v42, 7 }
 0x3af   :  { %v7299_v48 = vsel %vm847_vm7, %v9799_v12, 0.0  ;;  %9800 = vst [vmem:[#allocation76_spill] sm:$0xff] %v7317_v37  ;;  %v7322_v45 = vsel %vm847_vm7, %v9801_v44, 0.0  ;;  %v9803_v54 = vrot.slane %v6997_v7, 7  ;;  %v9805_v8 = vrot.slane %v7111_v22, 7 }
 0x3b0   :  { %v7327_v12 = vsel %vm847_vm7, %v9802_v51, 0.0  ;;  %v4775_v7 = vpack.i.bf16 %v7020_v23, %v6641_v53  ;;  %v9809_v11 = vrot.slane %v6870_v59, 1  ;;  %v9810_v44 = vrot.slane %v6853_v26, 1  ;;  %v9868_v26 = vld [vmem:[#allocation29_spill] sm:$0xff] }
 0x3b1   :  { %v7332_v21 = vsel %vm847_vm7, %v9803_v54, 0.0  ;;  %v7344_v42 = vsel %vm847_vm7, %v9805_v8, 0.0  ;;  %v9806_v54 = vrot.slane %v6856_v0, 1  ;;  %v9812_v8 = vrot.slane %v6832_v39, 1 }
 0x3b2   :  { %4771 = vrot.lane.b32.xlu0 %v4770_v1, %s5097_s25  ;;  %4766 = vrot.lane.b32.xlu1 %v4765_v43, %s5098_s2  ;;  %v9804_v1 = vrot.slane %v7002_v38, 7  ;;  %v9807_v38 = vrot.slane %v6835_v63, 1  ;;  %v7361_v22 = vsel %vm62_vm0, %v9810_v44, %v9809_v11  ;;  %v9813_v2 = vrot.slane %v6827_v46, 1  ;;  %v9816_v63 = vld [vmem:[#allocation27_spill] sm:$0xff] }
 0x3b3   :  { %9811 = vst [vmem:[#allocation78_spill] sm:$0xff] %v7361_v22  ;;  %v9815_v44 = vrot.slane %v7116_v30, 7  ;;  %v2412_v37 = vrot.slane %v7273_v20, 1  ;;  %v9817_v46 = vrot.slane %v6930_v6, 1  ;;  %v9819_v30 = vrot.slane %v6933_v61, 1  ;;  %v7403_v20 = vpop.permute.xlu1 %4611 }
 0x3b4   :  { %v7337_v43 = vsel %vm847_vm7, %v9804_v1, 0.0  ;;  %v7354_v1 = vsel %vm62_vm0, %v9807_v38, %v9806_v54  ;;  %v7368_v51 = vsel %vm62_vm0, %v9813_v2, %v9812_v8  ;;  %v1721_v8 = vrot.slane %v6942_v15, 1  ;;  %9821 = vst [vmem:[#allocation80_spill] sm:$0xff] %v7403_v20  ;;  %v9828_v20 = vld [vmem:[#allocation40_spill] sm:$0xff] }
 0x3b5   :  { %9808 = vst [vmem:[#allocation77_spill] sm:$0xff] %v7354_v1  ;;  %9814 = vst [vmem:[#allocation79_spill] sm:$0xff] %v7368_v51  ;;  %v7381_v2 = vsel %vm847_vm7, %v9815_v44, 0.0  ;;  %v4780_v54 = vpack.i.bf16 %v7354_v1, %v9816_v63  ;;  %v4785_v38 = vpack.i.bf16 %v7368_v51, %v7361_v22  ;;  %v9820_v44 = vrot.slane %v6927_v19, 1 }
 0x3b6   :  { %2545 = vrot.lane.b32.xlu0 %v7025_v5, %s5098_s2  ;;  %4776 = vrot.lane.b32.xlu1 %v4775_v7, %s5098_s2  ;;  %v9818_v7 = vrot.slane %v6919_v4, 1  ;;  %v9822_v1 = vrot.slane %v6909_v52, 1  ;;  %v9823_v51 = vrot.slane %v6906_v25, 1  ;;  %v9825_v4 = vrot.slane %v7201_v55, 7 }
 0x3b7   :  { %v7401_v15 = vsel %vm62_vm0, %v9820_v44, %v9819_v30  ;;  %v1760_v30 = vrot.slane %v7268_v10, 1  ;;  %v9827_v44 = vld [vmem:[#allocation56_spill] sm:$0xff]  ;;  %v9829_v25 = vrot.slane %v9828_v20, 1 }
 0x3b8   :  { %v7394_v11 = vsel %vm62_vm0, %v9818_v7, %v9817_v46  ;;  %v7410_v22 = vsel %vm62_vm0, %v9823_v51, %v9822_v1  ;;  %v1571_v46 = vsel %vm847_vm7, %v9825_v4, 0.0  ;;  %v9826_v7 = vrot.slane %v7196_v32, 7  ;;  %v9830_v51 = vld [vmem:[#allocation39_spill] sm:$0xff] }
 0x3b9   :  { %9824 = vst [vmem:[#allocation81_spill] sm:$0xff] %v7410_v22  ;;  %v1724_v61 = vrot.slane %v9827_v44, 1  ;;  %v9831_v1 = vrot.slane %v9830_v51, 1  ;;  %v1761_v4 = vrot.slane %v1571_v46, 1  ;;  %v9836_v46 = vrot.slane %v7188_v49, 1 }
 0x3ba   :  { %v1572_v19 = vsel %vm847_vm7, %v9826_v7, 0.0  ;;  %4781 = vrot.lane.b32.xlu0 %v4780_v54, %s5086_s14  ;;  %4786 = vrot.lane.b32.xlu1 %v4785_v38, %s5086_s14  ;;  %v9833_v7 = vrot.slane %v7063_v47, 7  ;;  %v9834_v54 = vrot.slane %v7068_v56, 7 }
 0x3bb   :  { %v7427_v55 = vsel %vm62_vm0, %v9831_v1, %v9829_v25  ;;  %v2413_v52 = vrot.slane %v1572_v19, 1  ;;  %v4795_v25 = vpack.i.bf16 %v7410_v22, %v7401_v15  ;;  %v9835_v19 = vrot.slane %v7208_v40, 1 }
 0x3bc   :  { %9832 = vst [vmem:[#allocation82_spill] sm:$0xff] %v7427_v55  ;;  %v7433_v10 = vsel %vm847_vm7, %v9833_v7, 0.0  ;;  %v7438_v38 = vsel %vm847_vm7, %v9834_v54, 0.0  ;;  %v4790_v44 = vpack.i.bf16 %v7394_v11, %v7427_v55  ;;  %v7450_v1 = vsel %vm62_vm0, %v1760_v30, %v1761_v4 }
 0x3bd   :  { %v1629_v47 = vsel %vm62_vm0, %v9836_v46, %v9835_v19  ;;  %9837 = vst [vmem:[#allocation83_spill] sm:$0xff] %v7450_v1  ;;  %v7453_v56 = vsel %vm62_vm0, %v2412_v37, %v2413_v52  ;;  %v9839_v7 = vrot.slane %v7211_v27, 1  ;;  %v9840_v54 = vrot.slane %v7191_v36, 1  ;;  %v9853_v37 = vld [vmem:[#allocation60_spill] sm:$0xff]  ;;  %v9861_v1 = vld [vmem:[#allocation63_spill] sm:$0xff] }
 0x3be   :  { %9838 = vst [vmem:[#allocation84_spill] sm:$0xff] %v7453_v56  ;;  %v9841_v22 = vrot.slane %v7126_v50, 1  ;;  %v9842_v55 = vrot.slane %v7123_v41, 1  ;;  %v9843_v19 = vrot.slane %v7087_v31, 1  ;;  %v9844_v30 = vrot.slane %v7074_v24, 1  ;;  %4791 = vrot.lane.b32.xlu0 %v4790_v44, %s5086_s14  ;;  %4796 = vrot.lane.b32.xlu1 %v4795_v25, %s5086_s14  ;;  %v9852_v25 = vld [vmem:[#allocation61_spill] sm:$0xff] }
 0x3bf   :  { %v1632_v32 = vsel %vm62_vm0, %v9840_v54, %v9839_v7  ;;  %v1743_v52 = vrot.slane %v7433_v10, 1  ;;  %v9845_v46 = vrot.slane %v7152_v35, 7  ;;  %v7490_v10 = vpop.permute.xlu1 %4616  ;;  %v1746_v35 = vrot.slane %v7438_v38, 1 }
 0x3c0   :  { %v1635_v6 = vsel %vm62_vm0, %v9842_v55, %v9841_v22  ;;  %v1638_v4 = vsel %vm62_vm0, %v9844_v30, %v9843_v19  ;;  %v9846_v22 = vrot.slane %v7243_v57, 7  ;;  %9850 = vst [vmem:[#allocation87_spill] sm:$0xff] %v7490_v10  ;;  %v9851_v30 = vrot.slane %v7157_v29, 7 }
 0x3c1   :  { %v7476_v7 = vsel %vm847_vm7, %v9845_v46, 0.0  ;;  %v1730_v46 = vrot.slane %v9852_v25, 1  ;;  %v1727_v56 = vrot.slane %v9853_v37, 1  ;;  %v7502_v20 = vpack.i.bf16 %v1638_v4, %v1635_v6  ;;  %v9860_v4 = vld [vmem:[#allocation64_spill] sm:$0xff]  ;;  %v9864_v25 = vld [vmem:[#allocation69_spill] sm:$0xff] }
 0x3c2   :  { %v7483_v55 = vsel %vm847_vm7, 0.0, %v9846_v22  ;;  %v9848_v54 = vmov %v9846_v22  ;;  %v7496_v44 = vsel %vm847_vm7, %v9851_v30, 0.0  ;;  %v7500_v22 = vpack.i.bf16 %v1632_v32, %v1629_v47 }
 0x3c3   :  { %9847 = vst [vmem:[#allocation85_spill] sm:$0xff] %v7483_v55  ;;  %v7488_v19 = vsel %vm847_vm7, %v9848_v54, 0.0  ;;  %9855 = vst [vmem:[#allocation89_spill] sm:$0xff] %v7502_v20  ;;  %v9856_v57 = vrot.slane %v7260_v28, 1  ;;  %v9857_v54 = vrot.slane %v7246_v58, 1  ;;  %v9858_v38 = vrot.slane %v7263_v17, 1  ;;  %4806 = vrot.lane.b32.xlu1 %v7502_v20, %s5086_s14 }
 0x3c4   :  { %9849 = vst [vmem:[#allocation86_spill] sm:$0xff] %v7488_v19  ;;  %9854 = vst [vmem:[#allocation88_spill] sm:$0xff] %v7500_v22  ;;  %v9859_v29 = vrot.slane %v7249_v18, 1  ;;  %v1645_v32 = vrot.slane %v7483_v55, 1  ;;  %v1646_v6 = vrot.slane %v7488_v19, 1  ;;  %v1736_v51 = vrot.slane %v9860_v4, 1  ;;  %4801 = vrot.lane.b32.xlu0 %v7500_v22, %s5086_s14 }
 0x3c5   :  { %v1641_v10 = vsel %vm62_vm0, %v9857_v54, %v9856_v57  ;;  %v1733_v57 = vrot.slane %v9861_v1, 1  ;;  %v9862_v54 = vld [vmem:[#allocation66_spill] sm:$0xff]  ;;  %v1745_v37 = vrot.slane %v9864_v25, 1  ;;  %v9866_v19 = vld [vmem:[#allocation5_spill] sm:$0xff]  ;;  %v9869_v4 = vrot.slane %v9868_v26, 1 }
 0x3c6   :  { %v1644_v30 = vsel %vm62_vm0, %v9859_v29, %v9858_v38  ;;  %v2409_v39 = vrot.slane %v9862_v54, 1  ;;  %v9863_v38 = vld [vmem:[#allocation65_spill] sm:$0xff]  ;;  %v9867_v47 = vrot.slane %v9866_v19, 1  ;;  %v9870_v54 = vrot.slane %v7294_v14, 1  ;;  %v7552_v19 = vpop.permute.xlu1 %4621  ;;  %v9874_v26 = vld [vmem:[#allocation6_spill] sm:$0xff] }
 0x3c7   :  { %v1739_v29 = vrot.slane %v9863_v38, 1  ;;  %v7528_v55 = vpack.i.bf16 %v1644_v30, %v1641_v10  ;;  %v9871_v20 = vrot.slane %v7299_v48, 1  ;;  %v9872_v10 = vrot.slane %v7289_v62, 1  ;;  %9873 = vst [vmem:[#allocation5_spill] sm:$0xff] %v7552_v19  ;;  %v9880_v62 = vld [vmem:[#allocation4_spill] sm:$0xff]  ;;  %v9884_v19 = vld [vmem:[#allocation70_spill] sm:$0xff] }
 0x3c8   :  { %v7535_v1 = vsel %vm62_vm0, %v9869_v4, %v9867_v47  ;;  %v7540_v22 = vsel %vm62_vm0, %v1721_v8, %v9870_v54  ;;  %v9875_v47 = vrot.slane %v9874_v26, 1  ;;  %v9876_v4 = vld [vmem:[#allocation30_spill] sm:$0xff]  ;;  %v9878_v8 = vld [vmem:[#allocation68_spill] sm:$0xff]  ;;  %v7563_v48 = vsel %vm62_vm0, %v1645_v32, %v1646_v6  ;;  %v9883_v26 = vld [vmem:[#allocation71_spill] sm:$0xff] }
 0x3c9   :  { %9865 = vst [vmem:[#allocation66_spill] sm:$0xff] %v7528_v55  ;;  %v7545_v38 = vsel %vm62_vm0, %v1724_v61, %v9871_v20  ;;  %v7550_v30 = vsel %vm62_vm0, %v1727_v56, %v9872_v10  ;;  %v9877_v25 = vrot.slane %v9876_v4, 1  ;;  %v1742_v54 = vrot.slane %v9878_v8, 1  ;;  %9879 = vst [vmem:[#allocation29_spill] sm:$0xff] %v7563_v48  ;;  %4811 = vrot.lane.b32.xlu0 %v7528_v55, %s5086_s14  ;;  %v9885_v32 = vld [vmem:[#allocation3_spill] sm:$0xff] }
 0x3ca   :  { %v9881_v20 = vrot.slane %v9880_v62, 1  ;;  %v9882_v56 = vrot.slane %v6845_v60, 1  ;;  %v1751_v4 = vrot.slane %v9883_v26, 1  ;;  %1676 = vrot.lane.b32.xlu1 %v7563_v48, %s5086_s14  ;;  %v9886_v6 = vrot.slane %v9885_v32, 1 }
 0x3cb   :  { %v7559_v14 = vsel %vm62_vm0, %v9877_v25, %v9875_v47  ;;  %v1748_v25 = vrot.slane %v9884_v19, 1  ;;  %v1757_v47 = vrot.slane %v7229_v33, 1  ;;  %v9887_v62 = vrot.slane %v6850_v13, 1  ;;  %v9888_v33 = vld [vmem:[#allocation11_spill] sm:$0xff] }
 0x3cc   :  { %v7572_v10 = vsel %vm62_vm0, %v9882_v56, %v9881_v20  ;;  %v4815_v20 = vpack.i.bf16 %v7540_v22, %v9816_v63  ;;  %v4820_v56 = vpack.i.bf16 %v7550_v30, %v7545_v38  ;;  %v9889_v26 = vrot.slane %v9888_v33, 1  ;;  %v9890_v19 = vld [vmem:[#allocation31_spill] sm:$0xff]  ;;  %v9895_v33 = vld [vmem:[#allocation12_spill] sm:$0xff] }
 0x3cd   :  { %v7586_v60 = vsel %vm62_vm0, %v9887_v62, %v9886_v6  ;;  %v9891_v8 = vrot.slane %v9890_v19, 1  ;;  %v9892_v13 = vrot.slane %v7284_v34, 1  ;;  %v9893_v62 = vrot.slane %v7332_v21, 1  ;;  %v9897_v63 = vld [vmem:[#allocation32_spill] sm:$0xff] }
 0x3ce   :  { %v9894_v55 = vrot.slane %v7337_v43, 1  ;;  %v9896_v19 = vrot.slane %v9895_v33, 1  ;;  %v9899_v34 = vrot.slane %v7327_v12, 1  ;;  %v1744_v21 = vsel %vm62_vm0, %v1742_v54, %v1743_v52  ;;  %4816 = vrot.lane.b32.xlu0 %v4815_v20, %s5085_s11  ;;  %4821 = vrot.lane.b32.xlu1 %v4820_v56, %s5085_s11  ;;  %v7637_v12 = vpop.permute.xlu1 %4626  ;;  %v9904_v33 = vld [vmem:[#allocation9_spill] sm:$0xff] }
 0x3cf   :  { %v7599_v32 = vsel %vm62_vm0, %v9891_v8, %v9889_v26  ;;  %v7604_v6 = vsel %vm62_vm0, %v1730_v46, %v9892_v13  ;;  %v7609_v48 = vsel %vm62_vm0, %v1733_v57, %v9893_v62  ;;  %v9898_v8 = vrot.slane %v9897_v63, 1 }
 0x3d0   :  { %v7614_v61 = vsel %vm62_vm0, %v1736_v51, %v9894_v55  ;;  %v7626_v46 = vsel %vm62_vm0, %v1739_v29, %v9899_v34  ;;  %v9900_v55 = vld [vmem:[#allocation72_spill] sm:$0xff]  ;;  %v1747_v63 = vsel %vm62_vm0, %v1745_v37, %v1746_v35  ;;  %v9901_v29 = vrot.slane %v7322_v45, 1 }
 0x3d1   :  { %v7621_v26 = vsel %vm62_vm0, %v9898_v8, %v9896_v19  ;;  %v1754_v57 = vrot.slane %v9900_v55, 1  ;;  %v9902_v13 = vrot.slane %v7381_v2, 1  ;;  %v9903_v20 = vrot.slane %v7344_v42, 1 }
 0x3d2   :  { %v4915_v43 = vpack.i.bf16 %v7621_v26, %v7599_v32  ;;  %v7642_v52 = vsel %vm62_vm0, %v2409_v39, %v9901_v29  ;;  %v9905_v37 = vrot.slane %v9904_v33, 1  ;;  %v9906_v35 = vrot.slane %v6892_v16, 1  ;;  %v9907_v39 = vld [vmem:[#allocation8_spill] sm:$0xff] }
 0x3d3   :  { %v1750_v62 = vsel %vm62_vm0, %v1748_v25, %v9902_v13  ;;  %v1753_v56 = vsel %vm62_vm0, %v1751_v4, %v9903_v20  ;;  %v9908_v19 = vrot.slane %v9907_v39, 1  ;;  %v9909_v8 = vrot.slane %v6897_v9, 1  ;;  %v9910_v25 = vld [vmem:[#allocation58_spill] sm:$0xff]  ;;  %v9972_v9 = vld [vmem:[#allocation48_spill] sm:$0xff] }
 0x3d4   :  { %v7657_v45 = vsel %vm62_vm0, %v9906_v35, %v9905_v37  ;;  %v1849_v2 = vrot.slane %v7263_v17, 2  ;;  %v4825_v42 = vpack.i.bf16 %v7609_v48, %v7604_v6  ;;  %v4830_v4 = vpack.i.bf16 %v7626_v46, %v7614_v61  ;;  %v9911_v20 = vld [vmem:[#allocation38_spill] sm:$0xff] }
 0x3d5   :  { %v7664_v34 = vsel %vm62_vm0, %v9909_v8, %v9908_v19  ;;  %v2137_v29 = vrot.slane %v9910_v25, 1  ;;  %v7674_v13 = vpack.i.bf16 %v1747_v63, %v1744_v21  ;;  %v9912_v33 = vrot.slane %v9911_v20, 1  ;;  %v9914_v21 = vld [vmem:[#allocation20_spill] sm:$0xff]  ;;  %v9919_v20 = vld [vmem:[#allocation34_spill] sm:$0xff] }
 0x3d6   :  { %v9913_v17 = vrot.slane %v6641_v53, 1  ;;  %v2140_v35 = vrot.slane %v6981_v3, 1  ;;  %4826 = vrot.lane.b32.xlu0 %v4825_v42, %s5085_s11  ;;  %4831 = vrot.lane.b32.xlu1 %v4830_v4, %s5085_s11  ;;  %v7688_v39 = vpack.i.bf16 %v1753_v56, %v1750_v62  ;;  %v9915_v63 = vrot.slane %v9914_v21, 1  ;;  %v9917_v25 = vld [vmem:[#allocation16_spill] sm:$0xff] }
 0x3d7   :  { %v9916_v19 = vrot.slane %v7020_v23, 1  ;;  %v9918_v53 = vrot.slane %v9917_v25, 1  ;;  %v9921_v3 = vrot.slane %v7476_v7, 1  ;;  %v9922_v62 = vrot.slane %v7496_v44, 1 }
 0x3d8   :  { %v7683_v37 = vsel %vm62_vm0, %v9913_v17, %v9912_v33  ;;  %v9920_v33 = vrot.slane %v9919_v20, 1  ;;  %v9923_v23 = vrot.slane %v7208_v40, 2  ;;  %v9924_v4 = vrot.slane %v7188_v49, 2  ;;  %v7727_v40 = vpop.permute.xlu1 %4631  ;;  %v9929_v49 = vld [vmem:[#allocation17_spill] sm:$0xff]  ;;  %v9931_v20 = vld [vmem:[#allocation35_spill] sm:$0xff] }
 0x3d9   :  { %v7695_v8 = vsel %vm62_vm0, %v9916_v19, %v9915_v63  ;;  %v1756_v42 = vsel %vm62_vm0, %v1754_v57, %v9921_v3  ;;  %v1759_v56 = vsel %vm62_vm0, %v1757_v47, %v9922_v62  ;;  %v9925_v19 = vrot.slane %v7211_v27, 2  ;;  %v9968_v63 = vld [vmem:[#allocation52_spill] sm:$0xff] }
 0x3da   :  { %v7702_v17 = vsel %vm62_vm0, %v9920_v33, %v9918_v53  ;;  %v1835_v21 = vsel %vm1808_vm8, %v9924_v4, %v9923_v23  ;;  %v9926_v25 = vrot.slane %v7191_v36, 2  ;;  %v9927_v57 = vrot.slane %v7126_v50, 2  ;;  %v9935_v23 = vld [vmem:[#allocation15_spill] sm:$0xff]  ;;  %4836 = vrot.lane.b32.xlu0 %v7674_v13, %s5085_s11  ;;  %4841 = vrot.lane.b32.xlu1 %v7688_v39, %s5085_s11 }
 0x3db   :  { %v9928_v44 = vrot.slane %v7123_v41, 2  ;;  %v9930_v53 = vrot.slane %v9929_v49, 1  ;;  %v9932_v33 = vrot.slane %v9931_v20, 1  ;;  %v9933_v36 = vrot.slane %v7087_v31, 2  ;;  %v7768_v20 = vpop.permute.xlu0 %4516 }
 0x3dc   :  { %v1838_v7 = vsel %vm1808_vm8, %v9926_v25, %v9925_v19  ;;  %v9934_v50 = vrot.slane %v7074_v24, 2  ;;  %v9936_v4 = vrot.slane %v9935_v23, 1  ;;  %v2152_v25 = vrot.slane %v7025_v5, 1 }
 0x3dd   :  { %v1841_v47 = vsel %vm1808_vm8, %v9928_v44, %v9927_v57  ;;  %v7734_v3 = vsel %vm62_vm0, %v9932_v33, %v9930_v53  ;;  %v9937_v24 = vrot.slane %v7260_v28, 2  ;;  %v9938_v31 = vrot.slane %v7246_v58, 2  ;;  %v9942_v28 = vld [vmem:[#allocation21_spill] sm:$0xff]  ;;  %v9964_v33 = vld [vmem:[#allocation50_spill] sm:$0xff] }
 0x3de   :  { %v1844_v41 = vsel %vm1808_vm8, %v9934_v50, %v9933_v36  ;;  %v7748_v19 = vsel %vm62_vm0, %v2137_v29, %v9936_v4  ;;  %v9939_v44 = vrot.slane %v7249_v18, 2  ;;  %v9940_v29 = vld [vmem:[#allocation13_spill] sm:$0xff]  ;;  %v7772_v36 = vpack.i.bf16 %v1838_v7, %v1835_v21  ;;  %v9944_v50 = vld [vmem:[#allocation2_spill] sm:$0xff] }
 0x3df   :  { %v1847_v57 = vsel %vm1808_vm8, %v9938_v31, %v9937_v24  ;;  %v9941_v53 = vrot.slane %v9940_v29, 1  ;;  %v9943_v58 = vrot.slane %v9942_v28, 1  ;;  %v9945_v23 = vrot.slane %v9944_v50, 1  ;;  %v9950_v29 = vld [vmem:[#allocation45_spill] sm:$0xff]  ;;  %v9954_v28 = vld [vmem:[#allocation42_spill] sm:$0xff] }
 0x3e0   :  { %v1850_v49 = vsel %vm1808_vm8, %v9939_v44, %v1849_v2  ;;  %v7781_v2 = vpack.i.bf16 %v1759_v56, %v1756_v42  ;;  %v9946_v4 = vrot.slane %v6856_v0, 2  ;;  %v9949_v44 = vrot.slane %v6870_v59, 2  ;;  %v9952_v56 = vld [vmem:[#allocation43_spill] sm:$0xff]  ;;  %v7814_v59 = vpop.permute.xlu1 %4636  ;;  %v9962_v7 = vld [vmem:[#allocation53_spill] sm:$0xff] }
 0x3e1   :  { %v7766_v5 = vsel %vm62_vm0, %v2140_v35, %v9941_v53  ;;  %v7779_v18 = vsel %vm62_vm0, %v9945_v23, %v9943_v58  ;;  %v9947_v35 = vld [vmem:[#allocation44_spill] sm:$0xff]  ;;  %v9951_v53 = vrot.slane %v9950_v29, 2  ;;  %v9953_v0 = vrot.slane %v9952_v56, 2  ;;  %v9959_v56 = vld [vmem:[#allocation39_spill] sm:$0xff]  ;;  %v7839_v29 = vpop.permute.xlu0 %4526 }
 0x3e2   :  { %v9948_v24 = vrot.slane %v9947_v35, 2  ;;  %v9955_v58 = vrot.slane %v9954_v28, 2  ;;  %v7808_v23 = vpack.i.bf16 %v1844_v41, %v1841_v47  ;;  %4846 = vrot.lane.b32.xlu0 %v7781_v2, %s5085_s11  ;;  %v9957_v35 = vld [vmem:[#allocation19_spill] sm:$0xff]  ;;  %v2945_v47 = vld [vmem:[%s9407_s3] sm:$0xff]  ;;  %v9960_v28 = vld [vmem:[#allocation40_spill] sm:$0xff]  ;;  %v9963_v21 = vrot.slane %v9962_v7, 2 }
 0x3e3   :  { %v7799_v42 = vsel %vm1808_vm8, %v9951_v53, %v9949_v44  ;;  %v7823_v53 = vpack.i.bf16 %v1850_v49, %v1847_v57  ;;  %v2946_v41 = vld [vmem:[%s9407_s3 + $0x8] sm:$0xff]  ;;  %v9965_v27 = vrot.slane %v9964_v33, 2  ;;  %v9973_v16 = vrot.slane %v9972_v9, 2  ;;  %v2948_v33 = vld [vmem:[%s9407_s3 + $0x18] sm:$0xff]  ;;  %v2949_v7 = vld [vmem:[%s9407_s3 + $0x20] sm:$0xff] }
 0x3e4   :  { %v7788_v31 = vsel %vm1808_vm8, %v9948_v24, %v9946_v4  ;;  %v7806_v50 = vsel %vm1808_vm8, %v9955_v58, %v9953_v0  ;;  %v9956_v4 = vld [vmem:[#allocation83_spill] sm:$0xff]  ;;  %v9958_v24 = vrot.slane %v9957_v35, 1  ;;  %v1821_v0 = vrot.slane %v9959_v56, 2 }
 0x3e5   :  { %1791 = vrot.lane.b32.xlu1 %v9956_v4, %s5085_s11  ;;  %v1822_v58 = vrot.slane %v9960_v28, 2  ;;  %v4167_v35 = vpack.c.bf16 %v2946_v41, %v2945_v47  ;;  %v4855_v49 = vpack.i.bf16 %v7806_v50, %v7799_v42  ;;  %v7846_v56 = vsel %vm1808_vm8, %v9965_v27, %v9963_v21  ;;  %v9966_v28 = vld [vmem:[#allocation54_spill] sm:$0xff]  ;;  %v9970_v41 = vld [vmem:[#allocation49_spill] sm:$0xff]  ;;  %v2947_v27 = vld [vmem:[%s9407_s3 + $0x10] sm:$0xff]  ;;  %v7877_v21 = vpop.permute.xlu1 %4641 }
 0x3e6   :  { %v7819_v44 = vsel %vm62_vm0, %v2152_v25, %v9958_v24  ;;  %v9961_v24 = vld [vmem:[#allocation28_spill] sm:$0xff]  ;;  %v9967_v62 = vrot.slane %v9966_v28, 2  ;;  %v9969_v25 = vrot.slane %v9968_v63, 2  ;;  %v4171_v63 = vpack.c.bf16 %v2948_v33, %v2947_v27  ;;  %v2952_v27 = vld [vmem:[%s9407_s3 + $0x38] sm:$0xff] }
 0x3e7   :  { %v4850_v57 = vpack.i.bf16 %v7788_v31, %v9961_v24  ;;  %v9971_v24 = vrot.slane %v9970_v41, 2  ;;  %4168 = vmatprep.subr.bf16.mxu0 %v4167_v35  ;;  %4199 = vmatprep.subr.bf16.mxu1 %v4167_v35  ;;  %v7871_v9 = vsel %vm1808_vm8, %v1821_v0, %v1822_v58  ;;  %v2950_v0 = vld [vmem:[%s9407_s3 + $0x28] sm:$0xff] }
 0x3e8   :  { %v7853_v47 = vsel %vm1808_vm8, %v9969_v25, %v9967_v62  ;;  %4170 = vmatpush3.bf16.msra.mxu0 %v4167_v35  ;;  %4207 = vmatpush3.bf16.msra.mxu1 %v4167_v35  ;;  %v4175_v58 = vpack.c.bf16 %v2950_v0, %v2949_v7  ;;  %v7887_v25 = vpop.permute.xlu0 %4536  ;;  %v9974_v35 = vld [vmem:[#allocation85_spill] sm:$0xff] }
 0x3e9   :  { %v7860_v54 = vsel %vm1808_vm8, %v9973_v16, %v9971_v24  ;;  %4851 = vrot.lane.b32.xlu0 %v4850_v57, %s5087_s23  ;;  %4856 = vrot.lane.b32.xlu1 %v4855_v49, %s5087_s23  ;;  %v4860_v16 = vpack.i.bf16 %v7846_v56, %v7871_v9  ;;  %v1851_v57 = vrot.slane %v9974_v35, 2  ;;  %v9975_v49 = vld [vmem:[#allocation86_spill] sm:$0xff]  ;;  %v7895_v41 = vpop.permute.xlu1 %4646  ;;  %v2951_v24 = vld [vmem:[%s9407_s3 + $0x30] sm:$0xff] }
 0x3ea   :  { %v4865_v62 = vpack.i.bf16 %v7860_v54, %v7853_v47  ;;  %4172 = vmatprep.subr.bf16.mxu0 %v4171_v63  ;;  %4200 = vmatprep.subr.bf16.mxu1 %v4171_v63  ;;  %v1852_v28 = vrot.slane %v9975_v49, 2  ;;  %9976 = vst [vmem:[#allocation6_spill] sm:$0xff] %v7895_v41  ;;  %v4179_v33 = vpack.c.bf16 %v2952_v27, %v2951_v24  ;;  %v9978_v35 = vld [vmem:[#allocation78_spill] sm:$0xff] }
 0x3eb   :  { %v9980_v27 = vpack.i.bf16 %v7559_v14, %v7535_v1  ;;  %v2958_v1 = vld [vmem:[%s9407_s3 + $0x68] sm:$0xff] }
 0x3ec   :  { %4174 = vmatpush3.bf16.msra.mxu0 %v4171_v63  ;;  %4208 = vmatpush3.bf16.msra.mxu1 %v4171_v63  ;;  %v2953_v63 = vld [vmem:[%s9407_s3 + $0x40] sm:$0xff]  ;;  %v7912_v7 = vsel %vm1808_vm8, %v1851_v57, %v1852_v28  ;;  %v2955_v57 = vld [vmem:[%s9407_s3 + $0x50] sm:$0xff]  ;;  %v2956_v28 = vld [vmem:[%s9407_s3 + $0x58] sm:$0xff] }
 0x3ed   :  { %4861 = vrot.lane.b32.xlu0 %v4860_v16, %s5087_s23  ;;  %4866 = vrot.lane.b32.xlu1 %v4865_v62, %s5087_s23  ;;  %v2954_v16 = vld [vmem:[%s9407_s3 + $0x48] sm:$0xff]  ;;  %v7909_v62 = vpop.permute.xlu0 %4546  ;;  %v7920_v24 = vpop.permute.xlu1 %4651 }
 0x3ee   :  { %4176 = vmatprep.subr.bf16.mxu0 %v4175_v58  ;;  %4201 = vmatprep.subr.bf16.mxu1 %v4175_v58  ;;  %v4183_v0 = vpack.c.bf16 %v2954_v16, %v2953_v63  ;;  %9979 = vst [vmem:[#allocation30_spill] sm:$0xff] %v7920_v24  ;;  %v4900_v16 = vpack.i.bf16 %v7545_v38, %v7540_v22 }
 0x3ef   :  { %v9981_v22 = vpack.i.bf16 %v7586_v60, %v7572_v10 }
 0x3f0   :  { %4178 = vmatpush3.bf16.msra.mxu0 %v4175_v58  ;;  %4209 = vmatpush3.bf16.msra.mxu1 %v4175_v58  ;;  %v9977_v58 = vld [vmem:[#allocation77_spill] sm:$0xff] }
 0x3f1   :  { %4871 = vrot.lane.b32.xlu0 %v7772_v36, %s5087_s23  ;;  %4876 = vrot.lane.b32.xlu1 %v7808_v23, %s5087_s23  ;;  %v4890_v49 = vpack.i.bf16 %v9978_v35, %v9977_v58  ;;  %v7933_v63 = vpop.permute.xlu0 %4561  ;;  %v2957_v58 = vld [vmem:[%s9407_s3 + $0x60] sm:$0xff]  ;;  %v7954_v38 = vpop.permute.xlu1 %4656 }
 0x3f2   :  { %4180 = vmatprep.subr.bf16.mxu0 %v4179_v33  ;;  %4202 = vmatprep.subr.bf16.mxu1 %v4179_v33  ;;  %v4191_v35 = vpack.c.bf16 %v2958_v1, %v2957_v58  ;;  %9982 = vst [vmem:[#allocation4_spill] sm:$0xff] %v7954_v38  ;;  %v4905_v1 = vpack.i.bf16 %v7799_v42, %v7788_v31  ;;  %v9987_v42 = vld [vmem:[#allocation33_spill] sm:$0xff] }
 0x3f3   :  { %v4945_v31 = vpack.i.bf16 %v7614_v61, %v7609_v48  ;;  %v4970_v48 = vpack.i.bf16 %v7642_v52, %v7626_v46  ;;  %v9988_v61 = vld [vmem:[#allocation10_spill] sm:$0xff] }
 0x3f4   :  { %4182 = vmatpush3.bf16.msra.mxu0 %v4179_v33  ;;  %4210 = vmatpush3.bf16.msra.mxu1 %v4179_v33  ;;  %v4187_v33 = vpack.c.bf16 %v2956_v28, %v2955_v57  ;;  %v9983_v28 = vld [vmem:[#allocation79_spill] sm:$0xff] }
 0x3f5   :  { %4881 = vrot.lane.b32.xlu0 %v7823_v53, %s5087_s23  ;;  %1882 = vrot.lane.b32.xlu1 %v7912_v7, %s5087_s23  ;;  %s5100_s23 = smov 72   ;;  %v7956_v57 = vpop.permute.xlu0 %4666 }
 0x3f6   :  { %4184 = vmatprep.subr.bf16.mxu0 %v4183_v0  ;;  %4203 = vmatprep.subr.bf16.mxu1 %v4183_v0 }
 0x3f8   :  { %4186 = vmatpush3.bf16.msra.mxu0 %v4183_v0  ;;  %4211 = vmatpush3.bf16.msra.mxu1 %v4183_v0  ;;  %v2960_v0 = vld [vmem:[%s9407_s3 + $0x78] sm:$0xff] }
 0x3f9   :  { %4886 = vrot.lane.b32.xlu0 %v9980_v27, %s5099_s17  ;;  %4891 = vrot.lane.b32.xlu1 %v4890_v49, %s5100_s23  ;;  %v2959_v49 = vld [vmem:[%s9407_s3 + $0x70] sm:$0xff]  ;;  %v9984_v27 = vld [vmem:[#allocation82_spill] sm:$0xff]  ;;  %s5102_s3 = smov 88  }
 0x3fa   :  { %4188 = vmatprep.subr.bf16.mxu0 %v4187_v33  ;;  %4204 = vmatprep.subr.bf16.mxu1 %v4187_v33  ;;  %v4910_v58 = vpack.i.bf16 %v9984_v27, %v9983_v28  ;;  %v4195_v51 = vpack.c.bf16 %v2960_v0, %v2959_v49  ;;  %v4334_v49 = vunpack.i.h.bf16 %v9988_v61  ;;  %v9991_v27 = vpack.i.bf16 %v7664_v34, %v7657_v45 }
 0x3fb   :  { %v9997_v61 = vpack.i.bf16 %v7734_v3, %v7702_v17 }
 0x3fc   :  { %4190 = vmatpush3.bf16.msra.mxu0 %v4187_v33  ;;  %4212 = vmatpush3.bf16.msra.mxu1 %v4187_v33  ;;  %v7966_v33 = vpop.permute.xlu1 %4661 }
 0x3fd   :  { %4896 = vrot.lane.b32.xlu0 %v9981_v22, %s5099_s17  ;;  %4901 = vrot.lane.b32.xlu1 %v4900_v16, %s5101_s28  ;;  %v4920_v16 = vpack.i.bf16 %v7604_v6, %v7550_v30  ;;  %9985 = vst [vmem:[#allocation3_spill] sm:$0xff] %v7966_v33  ;;  %v7968_v22 = vpop.permute.xlu0 %4676  ;;  %v9986_v30 = vpack.i.bf16 %v7572_v10, %v7559_v14 }
 0x3fe   :  { %4192 = vmatprep.subr.bf16.mxu0 %v4191_v35  ;;  %4205 = vmatprep.subr.bf16.mxu1 %v4191_v35 }
 0x400   :  { %4194 = vmatpush3.bf16.msra.mxu0 %v4191_v35  ;;  %4213 = vmatpush3.bf16.msra.mxu1 %v4191_v35  ;;  %v7982_v6 = vpop.permute.xlu1 %4671  ;;  %v4454_v35 = vunpack.i.h.bf16 %v9987_v42 }
 0x401   :  { %4911 = vrot.lane.b32.xlu0 %v4910_v58, %s5100_s23  ;;  %4906 = vrot.lane.b32.xlu1 %v4905_v1, %s5102_s3 }
 0x402   :  { %4196 = vmatprep.subr.bf16.mxu0 %v4195_v51  ;;  %4206 = vmatprep.subr.bf16.mxu1 %v4195_v51  ;;  %v1259_v14 = vsel %vm623_vm5, %v4454_v35, %v4334_v49  ;;  %v9996_v35 = vld [vmem:[#allocation24_spill] sm:$0xff]  ;;  %v9998_v49 = vld [vmem:[#allocation25_spill] sm:$0xff] }
 0x403   :  { %v1291_v28 = vrot.slane %v1259_v14, 7 }
 0x404   :  { %4198 = vmatpush3.bf16.msra.mxu0 %v4195_v51  ;;  %4214 = vmatpush3.bf16.msra.mxu1 %v4195_v51  ;;  %v4930_v51 = vpack.i.bf16 %v7871_v9, %v7806_v50  ;;  %v7995_v10 = vpop.permute.xlu1 %4681  ;;  %v9990_v50 = vpack.i.bf16 %v7401_v15, %v7394_v11 }
 0x405   :  { %4916 = vrot.lane.b32.xlu0 %v4915_v43, %s5099_s17  ;;  %4921 = vrot.lane.b32.xlu1 %v4920_v16, %s5101_s28  ;;  %v7985_v43 = vpop.permute.xlu0 %4686  ;;  %v1323_v52 = vsel %vm847_vm7, 0.0, %v1291_v28  ;;  %v1339_v9 = vsel %vm847_vm7, %v1291_v28, 0.0 }
 0x406   :  { %v2353_v15 = vrot.slane %v1323_v52, 1  ;;  %v2354_v11 = vrot.slane %v1339_v9, 1 }
 0x408   :  { %v8015_v58 = vpop.permute.xlu1 %4691 }
 0x409   :  { %4926 = vrot.lane.b32.xlu0 %v9986_v30, %s5103_s29  ;;  %4946 = vrot.lane.b32.xlu1 %v4945_v31, %s5101_s28  ;;  %v7997_v0 = vpop.permute.xlu0 %4696  ;;  %v4955_v31 = vpack.i.bf16 %v7853_v47, %v7846_v56  ;;  %v9994_v30 = vpack.i.bf16 %v7695_v8, %v7683_v37 }
 0x40a   :  { %9989 = vst [vmem:[#allocation11_spill] sm:$0xff] %v7997_v0 }
 0x40c   :  { %v8025_v16 = vpop.permute.xlu1 %4701 }
 0x40d   :  { %4931 = vrot.lane.b32.xlu0 %v4930_v51, %s5102_s3  ;;  %4971 = vrot.lane.b32.xlu1 %v4970_v48, %s5101_s28  ;;  %v8005_v46 = vpop.permute.xlu0 %4706  ;;  %9993 = vst [vmem:[#allocation31_spill] sm:$0xff] %v8025_v16  ;;  %v2463_v51 = vrot.slane %v1323_v52, 2  ;;  %v2464_v48 = vrot.slane %v1339_v9, 2 }
 0x411   :  { %4936 = vrot.lane.b32.xlu0 %v9990_v50, %s5100_s23  ;;  %4996 = vrot.lane.b32.xlu1 %v7674_v13, %s5101_s28  ;;  %v9992_v13 = vpack.i.bf16 %v7599_v32, %v7586_v60  ;;  %v8023_v1 = vpop.permute.xlu0 %4711  ;;  %v8037_v32 = vpop.permute.xlu1 %4716  ;;  %v2465_v50 = vsel %vm1808_vm8, %v2463_v51, %v2464_v48 }
 0x412   :  { %v4980_v17 = vpack.i.bf16 %v2465_v50, %v7860_v54 }
 0x415   :  { %4941 = vrot.lane.b32.xlu0 %v9991_v27, %s5099_s17  ;;  %5021 = vrot.lane.b32.xlu1 %v7688_v39, %s5101_s28  ;;  %v2355_v39 = vsel %vm62_vm0, %v2353_v15, %v2354_v11  ;;  %v8035_v60 = vpop.permute.xlu0 %4721  ;;  %v8045_v47 = vpop.permute.xlu1 %4726  ;;  %v9999_v27 = vpack.i.bf16 %v7657_v45, %v7621_v26  ;;  %v10005_v26 = vpack.i.bf16 %v7766_v5, %v7748_v19 }
 0x419   :  { %4951 = vrot.lane.b32.xlu0 %v9992_v13, %s5103_s29  ;;  %5046 = vrot.lane.b32.xlu1 %v7781_v2, %s5101_s28  ;;  %v9995_v2 = vld [vmem:[#allocation81_spill] sm:$0xff]  ;;  %v8043_v56 = vpop.permute.xlu0 %4731  ;;  %v8055_v28 = vpop.permute.xlu1 %4736  ;;  %v10002_v13 = vld [vmem:[#allocation88_spill] sm:$0xff] }
 0x41a   :  { %v4960_v42 = vpack.i.bf16 %v2355_v39, %v9995_v2 }
 0x41d   :  { %4956 = vrot.lane.b32.xlu0 %v4955_v31, %s5102_s3  ;;  %5071 = vrot.lane.b32.xlu1 %v9994_v30, %s5103_s29  ;;  %v8053_v14 = vpop.permute.xlu0 %4741  ;;  %v8064_v9 = vpop.permute.xlu1 %4746  ;;  %v10008_v30 = vld [vmem:[#allocation27_spill] sm:$0xff] }
 0x41e   :  { %v5000_v2 = vpack.i.bf16 %v10008_v30, %v7664_v34  ;;  %v10010_v34 = vpack.i.bf16 %v7683_v37, %v7779_v18 }
 0x421   :  { %4961 = vrot.lane.b32.xlu0 %v4960_v42, %s5100_s23  ;;  %2590 = vrot.lane.b32.xlu1 %v9996_v35, %s5095_s22  ;;  %v8062_v52 = vpop.permute.xlu0 %4751  ;;  %v8070_v11 = vpop.permute.xlu1 %4756 }
 0x422   :  { %10000 = vst [vmem:[#allocation12_spill] sm:$0xff] %v8062_v52 }
 0x425   :  { %4966 = vrot.lane.b32.xlu0 %v9997_v61, %s5099_s17  ;;  %2680 = vrot.lane.b32.xlu1 %v9998_v49, %s5090_s15  ;;  %v8068_v15 = vpop.permute.xlu0 %4761  ;;  %v8076_v39 = vpop.permute.xlu1 %4766  ;;  %v10009_v61 = vld [vmem:[#allocation89_spill] sm:$0xff] }
 0x426   :  { %10001 = vst [vmem:[#allocation32_spill] sm:$0xff] %v8068_v15  ;;  %10004 = vst [vmem:[#allocation8_spill] sm:$0xff] %v8076_v39 }
 0x429   :  { %4976 = vrot.lane.b32.xlu0 %v9999_v27, %s5103_s29  ;;  %v8074_v31 = vpop.permute.xlu0 %4771  ;;  %v8084_v54 = vpop.permute.xlu1 %4776 }
 0x42a   :  { %10003 = vst [vmem:[#allocation9_spill] sm:$0xff] %v8074_v31  ;;  %10007 = vst [vmem:[#allocation38_spill] sm:$0xff] %v8084_v54 }
 0x42d   :  { %4981 = vrot.lane.b32.xlu0 %v4980_v17, %s5102_s3  ;;  %v8082_v45 = vpop.permute.xlu0 %2545  ;;  %v8089_v35 = vpop.permute.xlu1 %4786 }
 0x42e   :  { %10006 = vst [vmem:[#allocation58_spill] sm:$0xff] %v8082_v45 }
 0x431   :  { %4986 = vrot.lane.b32.xlu0 %v10002_v13, %s5100_s23  ;;  %v4782_v42 = vpop.permute.xlu0 %4781  ;;  %v8095_v48 = vpop.permute.xlu1 %4796  ;;  %v10013_v13 = vld [vmem:[#allocation36_spill] sm:$0xff] }
 0x432   :  { %v4783_v39 = vunpack.i.l.bf16 %v4782_v42 }
 0x435   :  { %4991 = vrot.lane.b32.xlu0 %v10005_v26, %s5099_s17  ;;  %v8093_v51 = vpop.permute.xlu0 %4791  ;;  %v8101_v50 = vpop.permute.xlu1 %4806  ;;  %v4474_v26 = vunpack.i.h.bf16 %v10013_v13 }
 0x439   :  { %5001 = vrot.lane.b32.xlu0 %v5000_v2, %s5103_s29  ;;  %v8099_v49 = vpop.permute.xlu0 %4801 }
 0x43c   :  { %v8109_v17 = vpop.permute.xlu1 %1676 }
 0x43d   :  { %5006 = vrot.lane.b32.xlu0 %v7772_v36, %s5102_s3  ;;  %v8107_v27 = vpop.permute.xlu0 %4811  ;;  %10011 = vst [vmem:[#allocation20_spill] sm:$0xff] %v8109_v17  ;;  %v10012_v36 = vpack.i.bf16 %v7748_v19, %v7734_v3  ;;  %v10015_v3 = vld [vmem:[#allocation66_spill] sm:$0xff] }
 0x440   :  { %v8116_v2 = vpop.permute.xlu1 %4821 }
 0x441   :  { %5011 = vrot.lane.b32.xlu0 %v10009_v61, %s5100_s23  ;;  %v4817_v30 = vpop.permute.xlu0 %4816  ;;  %v10014_v61 = vld [vmem:[#allocation14_spill] sm:$0xff] }
 0x442   :  { %v4354_v45 = vunpack.i.h.bf16 %v10014_v61 }
 0x444   :  { %v1267_v37 = vsel %vm623_vm5, %v4474_v26, %v4354_v45 }
 0x445   :  { %5016 = vrot.lane.b32.xlu0 %v10010_v34, %s5099_s17  ;;  %v1299_v41 = vrot.slane %v1267_v37, 7 }
 0x447   :  { %v1331_v13 = vsel %vm847_vm7, 0.0, %v1299_v41  ;;  %v1347_v61 = vsel %vm847_vm7, %v1299_v41, 0.0  ;;  %vm2894_vm7 = vcmask 850944  }
 0x448   :  { %v8122_v34 = vpop.permute.xlu0 %4826  ;;  %v8124_v31 = vpop.permute.xlu1 %4831  ;;  %v2356_v37 = vrot.slane %v1331_v13, 1  ;;  %v2357_v33 = vrot.slane %v1347_v61, 1  ;;  %v2466_v52 = vrot.slane %v1331_v13, 2  ;;  %v4688_v13 = vunpack.i.l.bf16 %v7985_v43 }
 0x449   :  { %5026 = vrot.lane.b32.xlu0 %v10012_v36, %s5103_s29 }
 0x44a   :  { %v2358_v41 = vsel %vm62_vm0, %v2356_v37, %v2357_v33  ;;  %v4819_v33 = vunpack.i.h.bf16 %v4817_v30  ;;  %vm2877_vm0 = vcmask 785408  }
 0x44c   :  { %v8128_v19 = vpop.permute.xlu0 %4836  ;;  %v8130_v36 = vpop.permute.xlu1 %4841 }
 0x44d   :  { %5031 = vrot.lane.b32.xlu0 %v7808_v23, %s5102_s3  ;;  %v10016_v23 = vpack.i.bf16 %v7819_v44, %v7695_v8  ;;  %v4818_v8 = vunpack.i.l.bf16 %v4817_v30  ;;  %v4538_v30 = vunpack.i.l.bf16 %v7887_v25 }
 0x451   :  { %5036 = vrot.lane.b32.xlu0 %v10015_v3, %s5100_s23  ;;  %v10019_v3 = vpack.i.bf16 %v7779_v18, %v7766_v5  ;;  %v2467_v5 = vrot.slane %v1347_v61, 2  ;;  %v4784_v18 = vunpack.i.h.bf16 %v4782_v42  ;;  %v10022_v42 = vld [vmem:[#allocation55_spill] sm:$0xff] }
 0x453   :  { %v2468_v0 = vsel %vm1808_vm8, %v2466_v52, %v2467_v5  ;;  %v2698_v61 = vsel %vm235_vm1, %v10022_v42, %v4784_v18  ;;  %v4669_v18 = vunpack.i.h.bf16 %v7956_v57  ;;  %vm2911_vm8 = vcmask 916480  }
 0x454   :  { %v8138_v45 = vpop.permute.xlu0 %4846 }
 0x455   :  { %5041 = vrot.lane.b32.xlu0 %v10016_v23, %s5099_s17  ;;  %10017 = vst [vmem:[#allocation16_spill] sm:$0xff] %v8138_v45  ;;  %v10020_v23 = vld [vmem:[#allocation29_spill] sm:$0xff] }
 0x456   :  { %v5060_v15 = vpack.i.bf16 %v2358_v41, %v10020_v23 }
 0x457   :  { %v8140_v26 = vpop.permute.xlu1 %1791 }
 0x458   :  { %10018 = vst [vmem:[#allocation34_spill] sm:$0xff] %v8140_v26 }
 0x459   :  { %5051 = vrot.lane.b32.xlu0 %v10019_v3, %s5103_s29  ;;  %v10021_v3 = vld [vmem:[#allocation26_spill] sm:$0xff] }
 0x45a   :  { %v2697_v24 = vsel %vm235_vm1, %v10021_v3, %v4783_v39  ;;  %v10023_v39 = vld [vmem:[#allocation84_spill] sm:$0xff]  ;;  %v10027_v3 = vld [vmem:[#allocation7_spill] sm:$0xff] }
 0x45b   :  { %v4852_v54 = vpop.permute.xlu0 %4851  ;;  %v8146_v17 = vpop.permute.xlu1 %4856  ;;  %v2712_v37 = vsel %vm252_vm2, %v2697_v24, %v4818_v8  ;;  %v2713_v24 = vsel %vm252_vm2, %v2698_v61, %v4819_v33  ;;  %v10028_v61 = vld [vmem:[#allocation46_spill] sm:$0xff]  ;;  %v10029_v33 = vld [vmem:[#allocation47_spill] sm:$0xff] }
 0x45c   :  { %v4853_v26 = vunpack.i.l.bf16 %v4852_v54 }
 0x45d   :  { %5056 = vrot.lane.b32.xlu0 %v7823_v53, %s5102_s3  ;;  %v4854_v53 = vunpack.i.h.bf16 %v4852_v54 }
 0x45e   :  { %v2727_v55 = vsel %vm269_vm3, %v2712_v37, %v4853_v26  ;;  %v5075_v26 = vpack.i.bf16 %v2468_v0, %v7912_v7  ;;  %v4519_v7 = vunpack.i.h.bf16 %v7768_v20  ;;  %v4518_v0 = vunpack.i.l.bf16 %v7768_v20 }
 0x45f   :  { %v8152_v16 = vpop.permute.xlu0 %4861  ;;  %v8154_v38 = vpop.permute.xlu1 %4866  ;;  %v2750_v54 = vsel %vm290_vm4, %v2727_v55, %v4688_v13  ;;  %v2728_v52 = vsel %vm269_vm3, %v2713_v24, %v4854_v53 }
 0x460   :  { %v8188_v13 = vsel %vm2758_vm9, %v2750_v54, %v4538_v30  ;;  %v2743_v42 = vsel %vm290_vm4, %v2728_v52, %v4669_v18  ;;  %v4709_v52 = vunpack.i.h.bf16 %v8005_v46  ;;  %v4708_v18 = vunpack.i.l.bf16 %v8005_v46 }
 0x461   :  { %5061 = vrot.lane.b32.xlu0 %v5060_v15, %s5100_s23  ;;  %v10024_v15 = vpack.i.bf16 %v10023_v39, %v9956_v4  ;;  %v4668_v4 = vunpack.i.l.bf16 %v7956_v57  ;;  %v4559_v39 = vunpack.i.h.bf16 %v10028_v61  ;;  %v4558_v57 = vunpack.i.l.bf16 %v10028_v61 }
 0x462   :  { %v4823_v54 = vunpack.i.l.bf16 %v8116_v2 }
 0x463   :  { %v8161_v41 = vpop.permute.xlu0 %4871  ;;  %v8163_v23 = vpop.permute.xlu1 %4876  ;;  %v2742_v53 = vsel %vm290_vm4, %v2727_v55, %v4668_v4  ;;  %v2760_v55 = vsel %vm2758_vm9, %v2743_v42, %v4519_v7 }
 0x464   :  { %v2759_v20 = vsel %vm2758_vm9, %v2742_v53, %v4518_v0 }
 0x465   :  { %5066 = vrot.lane.b32.xlu0 %v10024_v15, %s5101_s28  ;;  %v4789_v15 = vunpack.i.h.bf16 %v8089_v35 }
 0x467   :  { %v8178_v8 = vpop.permute.xlu0 %4881  ;;  %v8180_v5 = vpop.permute.xlu1 %1882 }
 0x468   :  { %10025 = vst [vmem:[#allocation17_spill] sm:$0xff] %v8178_v8  ;;  %10026 = vst [vmem:[#allocation35_spill] sm:$0xff] %v8180_v5  ;;  %v10031_v8 = vld [vmem:[#allocation56_spill] sm:$0xff] }
 0x469   :  { %5076 = vrot.lane.b32.xlu0 %v5075_v26, %s5102_s3 }
 0x46b   :  { %v4887_v24 = vpop.permute.xlu0 %4886  ;;  %v4892_v26 = vpop.permute.xlu1 %4891 }
 0x46c   :  { %v4889_v30 = vunpack.i.h.bf16 %v4887_v24  ;;  %v4888_v37 = vunpack.i.l.bf16 %v4887_v24  ;;  %v4788_v24 = vunpack.i.l.bf16 %v8089_v35  ;;  %v4893_v35 = vunpack.i.l.bf16 %v4892_v26 }
 0x46d   :  { %2635 = vrot.lane.b32.xlu0 %v7819_v44, %s5103_s29  ;;  %v4824_v44 = vunpack.i.h.bf16 %v8116_v2 }
 0x46e   :  { %v2776_v4 = vsel %vm2775_vm10, %v2759_v20, %v4888_v37  ;;  %v2777_v61 = vsel %vm2775_vm10, %v2760_v55, %v4889_v30  ;;  %v4859_v30 = vunpack.i.h.bf16 %v8146_v17  ;;  %v4858_v20 = vunpack.i.l.bf16 %v8146_v17 }
 0x46f   :  { %v2793_v0 = vsel %vm2792_vm11, %v2776_v4, %v4558_v57  ;;  %v2794_v7 = vsel %vm2792_vm11, %v2777_v61, %v4559_v39  ;;  %v4897_v53 = vpop.permute.xlu0 %4896  ;;  %v4902_v42 = vpop.permute.xlu1 %4901  ;;  %v4894_v55 = vunpack.i.h.bf16 %v4892_v26  ;;  %v4569_v57 = vunpack.i.h.bf16 %v10029_v33  ;;  %v10030_v61 = vld [vmem:[#allocation60_spill] sm:$0xff] }
 0x470   :  { %v2810_v46 = vsel %vm2809_vm12, %v2793_v0, %v4708_v18  ;;  %v2811_v37 = vsel %vm2809_vm12, %v2794_v7, %v4709_v52  ;;  %v4904_v39 = vunpack.i.h.bf16 %v4902_v42  ;;  %v4903_v4 = vunpack.i.l.bf16 %v4902_v42 }
 0x471   :  { %v2700_v5 = vsel %vm235_vm1, %v10030_v61, %v4789_v15  ;;  %v2699_v2 = vsel %vm235_vm1, %v10031_v8, %v4788_v24  ;;  %v2827_v18 = vsel %vm2826_vm13, %v2810_v46, %v4893_v35  ;;  %v2828_v52 = vsel %vm2826_vm13, %v2811_v37, %v4894_v55 }
 0x472   :  { %v2714_v26 = vsel %vm252_vm2, %v2699_v2, %v4823_v54  ;;  %v2715_v7 = vsel %vm252_vm2, %v2700_v5, %v4824_v44  ;;  %v4674_v8 = vunpack.i.h.bf16 %v7982_v6  ;;  %v4673_v24 = vunpack.i.l.bf16 %v7982_v6 }
 0x473   :  { %v8223_v0 = vpop.permute.xlu0 %4911  ;;  %v4907_v17 = vpop.permute.xlu1 %4906  ;;  %v2729_v42 = vsel %vm269_vm3, %v2714_v26, %v4858_v20  ;;  %v2730_v15 = vsel %vm269_vm3, %v2715_v7, %v4859_v30  ;;  %v2844_v46 = vsel %vm2843_vm14, %v2827_v18, %v4903_v4  ;;  %v2845_v37 = vsel %vm2843_vm14, %v2828_v52, %v4904_v39  ;;  %v10032_v18 = vld [vmem:[#allocation57_spill] sm:$0xff] }
 0x474   :  { %v4909_v61 = vunpack.i.h.bf16 %v4907_v17  ;;  %v4908_v45 = vunpack.i.l.bf16 %v4907_v17  ;;  %v4719_v54 = vunpack.i.h.bf16 %v8037_v32  ;;  %v4718_v5 = vunpack.i.l.bf16 %v8037_v32 }
 0x475   :  { %v2744_v30 = vsel %vm290_vm4, %v2729_v42, %v4673_v24  ;;  %v2745_v35 = vsel %vm290_vm4, %v2730_v15, %v4674_v8  ;;  %v4899_v2 = vunpack.i.h.bf16 %v4897_v53  ;;  %v4898_v6 = vunpack.i.l.bf16 %v4897_v53 }
 0x476   :  { %v2861_v44 = vsel %vm2860_vm15, %v2844_v46, %v4908_v45  ;;  %v2862_v20 = vsel %vm2860_vm15, %v2845_v37, %v4909_v61  ;;  %v4568_v4 = vunpack.i.l.bf16 %v10029_v33  ;;  %v4579_v39 = vunpack.i.h.bf16 %v10032_v18 }
 0x477   :  { %v8237_v55 = vpop.permute.xlu0 %4916  ;;  %v4578_v52 = vunpack.i.l.bf16 %v10032_v18  ;;  %v2879_v32 = vsel %vm2877_vm0, %v2862_v20, %v4719_v54  ;;  %v2878_v45 = vsel %vm2877_vm0, %v2861_v44, %v4718_v5  ;;  %v4794_v17 = vunpack.i.h.bf16 %v8093_v51  ;;  %v4922_v18 = vpop.permute.xlu1 %4921 }
 0x478   :  { %v4793_v26 = vunpack.i.l.bf16 %v8093_v51  ;;  %v10033_v7 = vunpack.i.l.bf16 %v10027_v3  ;;  %v10034_v33 = vunpack.i.h.bf16 %v10027_v3  ;;  %v4829_v37 = vunpack.i.h.bf16 %v8122_v34 }
 0x479   :  { %v4828_v54 = vunpack.i.l.bf16 %v8122_v34  ;;  %v2895_v51 = vsel %vm2894_vm7, %v2878_v45, %v4568_v4  ;;  %v2896_v5 = vsel %vm2894_vm7, %v2879_v32, %v4569_v57  ;;  %v4864_v44 = vunpack.i.h.bf16 %v8152_v16 }
 0x47a   :  { %v2761_v53 = vsel %vm2758_vm9, %v2744_v30, %v10033_v7  ;;  %v2762_v42 = vsel %vm2758_vm9, %v2745_v35, %v10034_v33  ;;  %v4863_v3 = vunpack.i.l.bf16 %v8152_v16  ;;  %v10035_v35 = vunpack.i.l.bf16 %v7933_v63  ;;  %v10037_v7 = vld [vmem:[#allocation63_spill] sm:$0xff]  ;;  %v10038_v33 = vld [vmem:[#allocation61_spill] sm:$0xff] }
 0x47b   :  { %v4927_v15 = vpop.permute.xlu0 %4926  ;;  %v2779_v61 = vsel %vm2775_vm10, %v2762_v42, %v4899_v2  ;;  %v2778_v8 = vsel %vm2775_vm10, %v2761_v53, %v4898_v6  ;;  %v10036_v6 = vunpack.i.h.bf16 %v7933_v63  ;;  %v4714_v16 = vunpack.i.h.bf16 %v8023_v1 }
 0x47c   :  { %v4929_v24 = vunpack.i.h.bf16 %v4927_v15  ;;  %v4928_v46 = vunpack.i.l.bf16 %v4927_v15  ;;  %v2795_v2 = vsel %vm2792_vm11, %v2778_v8, %v10035_v35  ;;  %v4713_v45 = vunpack.i.l.bf16 %v8023_v1 }
 0x47d   :  { %v2796_v34 = vsel %vm2792_vm11, %v2779_v61, %v10036_v6  ;;  %v2702_v53 = vsel %vm235_vm1, %v10037_v7, %v4794_v17  ;;  %v2701_v42 = vsel %vm235_vm1, %v10038_v33, %v4793_v26  ;;  %v4914_v61 = vunpack.i.h.bf16 %v8223_v0 }
 0x47e   :  { %v2912_v20 = vsel %vm2911_vm8, %v2895_v51, %v4928_v46  ;;  %v2913_v30 = vsel %vm2911_vm8, %v2896_v5, %v4929_v24  ;;  %v2716_v63 = vsel %vm252_vm2, %v2701_v42, %v4828_v54  ;;  %v2717_v15 = vsel %vm252_vm2, %v2702_v53, %v4829_v37  ;;  %v10040_v53 = vld [vmem:[#allocation59_spill] sm:$0xff] }
 0x47f   :  { %v4932_v4 = vpop.permute.xlu0 %4931  ;;  %v2929_v57 = vsel %vm2928_vm6, %v2912_v20, %v4578_v52  ;;  %v2930_v32 = vsel %vm2928_vm6, %v2913_v30, %v4579_v39  ;;  %v4913_v52 = vunpack.i.l.bf16 %v8223_v0  ;;  %v2812_v39 = vsel %vm2809_vm12, %v2795_v2, %v4713_v45 }
 0x480   :  { %4135 = vmatprep.mubr.f32.mxu0 %v2929_v57  ;;  %v2813_v1 = vsel %vm2809_vm12, %v2796_v34, %v4714_v16  ;;  %v4924_v8 = vunpack.i.h.bf16 %v4922_v18  ;;  %v4923_v24 = vunpack.i.l.bf16 %v4922_v18  ;;  %v2731_v17 = vsel %vm269_vm3, %v2716_v63, %v4863_v3  ;;  %v10039_v57 = vld [vmem:[#allocation51_spill] sm:$0xff] }
 0x481   :  { %4136 = vmatmul.mubr.f32.vlgmr.msra.gmra.mrb[16].mxu0 %v2930_v32  ;;  %v2732_v26 = vsel %vm269_vm3, %v2717_v15, %v4864_v44  ;;  %v4934_v46 = vunpack.i.h.bf16 %v4932_v4  ;;  %v4933_v51 = vunpack.i.l.bf16 %v4932_v4  ;;  %v4679_v37 = vunpack.i.h.bf16 %v7968_v22  ;;  %v10041_v63 = vld [vmem:[#allocation67_spill] sm:$0xff] }
 0x482   :  { %v4678_v5 = vunpack.i.l.bf16 %v7968_v22  ;;  %v4529_v0 = vunpack.i.h.bf16 %v7839_v29  ;;  %v4528_v20 = vunpack.i.l.bf16 %v7839_v29  ;;  %v2829_v30 = vsel %vm2826_vm13, %v2812_v39, %v4913_v52 }
 0x483   :  { %v8286_v54 = vpop.permute.xlu0 %4936  ;;  %v2830_v35 = vsel %vm2826_vm13, %v2813_v1, %v4914_v61  ;;  %v2747_v44 = vsel %vm290_vm4, %v2732_v26, %v4679_v37  ;;  %v2846_v2 = vsel %vm2843_vm14, %v2829_v30, %v4923_v24  ;;  %v4919_v34 = vunpack.i.h.bf16 %v8237_v55 }
 0x484   :  { %v2746_v3 = vsel %vm290_vm4, %v2731_v17, %v4678_v5  ;;  %v2847_v6 = vsel %vm2843_vm14, %v2830_v35, %v4924_v8  ;;  %v4918_v22 = vunpack.i.l.bf16 %v8237_v55  ;;  %v2863_v18 = vsel %vm2860_vm15, %v2846_v2, %v4933_v51 }
 0x485   :  { %v2864_v29 = vsel %vm2860_vm15, %v2847_v6, %v4934_v46  ;;  %v4574_v32 = vunpack.i.h.bf16 %v10039_v57  ;;  %v4573_v16 = vunpack.i.l.bf16 %v10039_v57  ;;  %v4729_v45 = vunpack.i.h.bf16 %v8045_v47  ;;  %v10042_v57 = vld [vmem:[#allocation65_spill] sm:$0xff] }
 0x486   :  { %v4728_v7 = vunpack.i.l.bf16 %v8045_v47  ;;  %v4584_v33 = vunpack.i.h.bf16 %v10040_v53  ;;  %v4583_v42 = vunpack.i.l.bf16 %v10040_v53  ;;  %v4594_v55 = vunpack.i.h.bf16 %v10041_v63  ;;  %v4947_v53 = vpop.permute.xlu1 %4946 }
 0x487   :  { %v8302_v4 = vpop.permute.xlu0 %4941  ;;  %v4593_v15 = vunpack.i.l.bf16 %v10041_v63  ;;  %v2763_v61 = vsel %vm2758_vm9, %v2746_v3, %v4528_v20  ;;  %v2764_v52 = vsel %vm2758_vm9, %v2747_v44, %v4529_v0  ;;  %v2881_v1 = vsel %vm2877_vm0, %v2864_v29, %v4729_v45 }
 0x488   :  { %v2880_v39 = vsel %vm2877_vm0, %v2863_v18, %v4728_v7  ;;  %v4799_v8 = vunpack.i.h.bf16 %v8095_v48  ;;  %v4798_v47 = vunpack.i.l.bf16 %v8095_v48  ;;  %v2780_v24 = vsel %vm2775_vm10, %v2763_v61, %v4918_v22 }
 0x489   :  { %v2781_v17 = vsel %vm2775_vm10, %v2764_v52, %v4919_v34  ;;  %v4834_v46 = vunpack.i.h.bf16 %v8124_v31  ;;  %v4833_v51 = vunpack.i.l.bf16 %v8124_v31  ;;  %v4869_v0 = vunpack.i.h.bf16 %v8154_v38 }
 0x48a   :  { %v4868_v20 = vunpack.i.l.bf16 %v8154_v38  ;;  %v2897_v30 = vsel %vm2894_vm7, %v2880_v39, %v4583_v42  ;;  %v2898_v35 = vsel %vm2894_vm7, %v2881_v1, %v4584_v33  ;;  %v2797_v48 = vsel %vm2792_vm11, %v2780_v24, %v4573_v16  ;;  %v10043_v16 = vld [vmem:[#allocation64_spill] sm:$0xff] }
 0x48b   :  { %v4952_v26 = vpop.permute.xlu0 %4951  ;;  %v2798_v3 = vsel %vm2792_vm11, %v2781_v17, %v4574_v32  ;;  %v4939_v31 = vunpack.i.h.bf16 %v8286_v54  ;;  %v4938_v6 = vunpack.i.l.bf16 %v8286_v54  ;;  %v4724_v18 = vunpack.i.h.bf16 %v8035_v60 }
 0x48c   :  { %v4954_v37 = vunpack.i.h.bf16 %v4952_v26  ;;  %v4953_v5 = vunpack.i.l.bf16 %v4952_v26  ;;  %v4723_v29 = vunpack.i.l.bf16 %v8035_v60  ;;  %v2704_v32 = vsel %vm235_vm1, %v10042_v57, %v4799_v8 }
 0x48d   :  { %v2703_v45 = vsel %vm235_vm1, %v10043_v16, %v4798_v47  ;;  %v2719_v54 = vsel %vm252_vm2, %v2704_v32, %v4834_v46  ;;  %v2815_v60 = vsel %vm2809_vm12, %v2798_v3, %v4724_v18  ;;  %v4684_v1 = vunpack.i.h.bf16 %v7995_v10  ;;  %v10047_v32 = vld [vmem:[#allocation76_spill] sm:$0xff] }
 0x48e   :  { %v2914_v44 = vsel %vm2911_vm8, %v2897_v30, %v4953_v5  ;;  %v2915_v2 = vsel %vm2911_vm8, %v2898_v35, %v4954_v37  ;;  %v2718_v7 = vsel %vm252_vm2, %v2703_v45, %v4833_v51  ;;  %v2734_v42 = vsel %vm269_vm3, %v2719_v54, %v4869_v0 }
 0x48f   :  { %v4957_v34 = vpop.permute.xlu0 %4956  ;;  %v2931_v22 = vsel %vm2928_vm6, %v2914_v44, %v4593_v15  ;;  %v2932_v38 = vsel %vm2928_vm6, %v2915_v2, %v4594_v55  ;;  %v2733_v33 = vsel %vm269_vm3, %v2718_v7, %v4868_v20  ;;  %v2814_v63 = vsel %vm2809_vm12, %v2797_v48, %v4723_v29  ;;  %v10045_v2 = vld [vmem:[#allocation62_spill] sm:$0xff] }
 0x490   :  { %4138 = vmatprep.mubr.f32.mxu0 %v2931_v22  ;;  %v2831_v55 = vsel %vm2826_vm13, %v2814_v63, %v4938_v6  ;;  %v2832_v15 = vsel %vm2826_vm13, %v2815_v60, %v4939_v31  ;;  %v4959_v61 = vunpack.i.h.bf16 %v4957_v34  ;;  %v4958_v52 = vunpack.i.l.bf16 %v4957_v34  ;;  %v10046_v34 = vld [vmem:[#allocation22_spill] sm:$0xff] }
 0x491   :  { %4139 = vmatmul.mubr.f32.gmra.mrb[18].mxu0 %v2932_v38  ;;  %v4683_v8 = vunpack.i.l.bf16 %v7995_v10  ;;  %v4949_v47 = vunpack.i.h.bf16 %v4947_v53  ;;  %v4948_v24 = vunpack.i.l.bf16 %v4947_v53  ;;  %v2749_v26 = vsel %vm290_vm4, %v2734_v42, %v4684_v1  ;;  %v10044_v10 = vld [vmem:[#allocation18_spill] sm:$0xff] }
 0x492   :  { %v4944_v37 = vunpack.i.h.bf16 %v8302_v4  ;;  %v4943_v5 = vunpack.i.l.bf16 %v8302_v4  ;;  %v4534_v35 = vunpack.i.h.bf16 %v10044_v10  ;;  %v4533_v48 = vunpack.i.l.bf16 %v10044_v10 }
 0x493   :  { %v8348_v39 = vpop.permute.xlu0 %4961  ;;  %v2748_v17 = vsel %vm290_vm4, %v2733_v33, %v4683_v8  ;;  %v2848_v46 = vsel %vm2843_vm14, %v2831_v55, %v4948_v24  ;;  %v2849_v51 = vsel %vm2843_vm14, %v2832_v15, %v4949_v47  ;;  %v4739_v3 = vunpack.i.h.bf16 %v8055_v28 }
 0x494   :  { %v2865_v0 = vsel %vm2860_vm15, %v2848_v46, %v4958_v52  ;;  %v2866_v20 = vsel %vm2860_vm15, %v2849_v51, %v4959_v61  ;;  %v4738_v44 = vunpack.i.l.bf16 %v8055_v28  ;;  %v4589_v31 = vunpack.i.h.bf16 %v10045_v2  ;;  %v10048_v51 = vld [vmem:[#allocation37_spill] sm:$0xff] }
 0x495   :  { %v4588_v6 = vunpack.i.l.bf16 %v10045_v2  ;;  %v4599_v4 = vunpack.i.h.bf16 %v10046_v34  ;;  %v2765_v22 = vsel %vm2758_vm9, %v2748_v17, %v4533_v48  ;;  %v2766_v38 = vsel %vm2758_vm9, %v2749_v26, %v4534_v35  ;;  %v4972_v2 = vpop.permute.xlu1 %4971 }
 0x496   :  { %v2882_v18 = vsel %vm2877_vm0, %v2865_v0, %v4738_v44  ;;  %v2883_v29 = vsel %vm2877_vm0, %v2866_v20, %v4739_v3  ;;  %v4598_v57 = vunpack.i.l.bf16 %v10046_v34  ;;  %v4609_v16 = vunpack.i.h.bf16 %v10047_v32  ;;  %v10049_v20 = vld [vmem:[#allocation68_spill] sm:$0xff] }
 0x497   :  { %v8360_v30 = vpop.permute.xlu0 %4966  ;;  %v2783_v28 = vsel %vm2775_vm10, %v2766_v38, %v4944_v37  ;;  %v2782_v45 = vsel %vm2775_vm10, %v2765_v22, %v4943_v5  ;;  %v4608_v54 = vunpack.i.l.bf16 %v10047_v32  ;;  %v4803_v53 = vunpack.i.l.bf16 %v8099_v49 }
 0x498   :  { %v4838_v63 = vunpack.i.l.bf16 %v8128_v19  ;;  %v4873_v60 = vunpack.i.l.bf16 %v8161_v41  ;;  %v2899_v55 = vsel %vm2894_vm7, %v2882_v18, %v4598_v57  ;;  %v2900_v15 = vsel %vm2894_vm7, %v2883_v29, %v4599_v4 }
 0x499   :  { %v2800_v61 = vsel %vm2792_vm11, %v2783_v28, %v4589_v31  ;;  %v2799_v52 = vsel %vm2792_vm11, %v2782_v45, %v4588_v6  ;;  %v4964_v47 = vunpack.i.h.bf16 %v8348_v39  ;;  %v4963_v24 = vunpack.i.l.bf16 %v8348_v39  ;;  %v10050_v39 = vld [vmem:[#allocation41_spill] sm:$0xff]  ;;  %v10051_v45 = vld [vmem:[#allocation74_spill] sm:$0xff] }
 0x49a   :  { %v4544_v37 = vunpack.i.h.bf16 %v10048_v51  ;;  %v4734_v5 = vunpack.i.h.bf16 %v8043_v56  ;;  %v4733_v0 = vunpack.i.l.bf16 %v8043_v56  ;;  %v2705_v10 = vsel %vm235_vm1, %v10049_v20, %v4803_v53  ;;  %v10052_v53 = vld [vmem:[#allocation80_spill] sm:$0xff] }
 0x49b   :  { %v4977_v7 = vpop.permute.xlu0 %4976  ;;  %v4543_v35 = vunpack.i.l.bf16 %v10048_v51  ;;  %v4539_v48 = vunpack.i.h.bf16 %v7887_v25  ;;  %v4554_v3 = vunpack.i.h.bf16 %v10050_v39  ;;  %v2720_v44 = vsel %vm252_vm2, %v2705_v10, %v4838_v63 }
 0x49c   :  { %v4979_v33 = vunpack.i.h.bf16 %v4977_v7  ;;  %v4978_v42 = vunpack.i.l.bf16 %v4977_v7  ;;  %v4553_v31 = vunpack.i.l.bf16 %v10050_v39  ;;  %v2735_v6 = vsel %vm269_vm3, %v2720_v44, %v4873_v60 }
 0x49d   :  { %v2816_v56 = vsel %vm2809_vm12, %v2799_v52, %v4733_v0  ;;  %v2817_v34 = vsel %vm2809_vm12, %v2800_v61, %v4734_v5  ;;  %v4549_v29 = vunpack.i.h.bf16 %v7909_v62  ;;  %v4689_v57 = vunpack.i.h.bf16 %v7985_v43 }
 0x49e   :  { %v2916_v1 = vsel %vm2911_vm8, %v2899_v55, %v4978_v42  ;;  %v2917_v8 = vsel %vm2911_vm8, %v2900_v15, %v4979_v33  ;;  %v2833_v4 = vsel %vm2826_vm13, %v2816_v56, %v4963_v24  ;;  %v2834_v22 = vsel %vm2826_vm13, %v2817_v34, %v4964_v47 }
 0x49f   :  { %v4982_v17 = vpop.permute.xlu0 %4981  ;;  %v2933_v26 = vsel %vm2928_vm6, %v2916_v1, %v4608_v54  ;;  %v2934_v46 = vsel %vm2928_vm6, %v2917_v8, %v4609_v16  ;;  %v4974_v32 = vunpack.i.h.bf16 %v4972_v2  ;;  %v4973_v16 = vunpack.i.l.bf16 %v4972_v2  ;;  %v10053_v8 = vld [vmem:[#allocation87_spill] sm:$0xff] }
 0x4a0   :  { %4141 = vmatprep.mubr.f32.mxu0 %v2933_v26  ;;  %v4984_v38 = vunpack.i.h.bf16 %v4982_v17  ;;  %v4983_v25 = vunpack.i.l.bf16 %v4982_v17  ;;  %v4548_v28 = vunpack.i.l.bf16 %v7909_v62  ;;  %v4604_v7 = vunpack.i.h.bf16 %v10051_v45 }
 0x4a1   :  { %4142 = vmatmul.mubr.f32.gmra.mrb[20].mxu0 %v2934_v46  ;;  %v4603_v54 = vunpack.i.l.bf16 %v10051_v45  ;;  %v4614_v33 = vunpack.i.h.bf16 %v10052_v53  ;;  %v4613_v42 = vunpack.i.l.bf16 %v10052_v53  ;;  %v2751_v63 = vsel %vm290_vm4, %v2735_v6, %v4689_v57  ;;  %v10054_v46 = vld [vmem:[#allocation5_spill] sm:$0xff] }
 0x4a2   :  { %v2850_v60 = vsel %vm2843_vm14, %v2833_v4, %v4973_v16  ;;  %v2851_v55 = vsel %vm2843_vm14, %v2834_v22, %v4974_v32  ;;  %v4969_v43 = vunpack.i.h.bf16 %v8360_v30  ;;  %v4968_v15 = vunpack.i.l.bf16 %v8360_v30 }
 0x4a3   :  { %v8406_v18 = vpop.permute.xlu0 %4986  ;;  %v2867_v61 = vsel %vm2860_vm15, %v2850_v60, %v4983_v25  ;;  %v2868_v52 = vsel %vm2860_vm15, %v2851_v55, %v4984_v38  ;;  %v4619_v47 = vunpack.i.h.bf16 %v10053_v8  ;;  %v4618_v24 = vunpack.i.l.bf16 %v10053_v8  ;;  %v10062_v8 = vld [vmem:[#allocation30_spill] sm:$0xff] }
 0x4a4   :  { %v4749_v17 = vunpack.i.h.bf16 %v8064_v9  ;;  %v4748_v26 = vunpack.i.l.bf16 %v8064_v9  ;;  %v4624_v5 = vunpack.i.h.bf16 %v10054_v46  ;;  %v4623_v0 = vunpack.i.l.bf16 %v10054_v46 }
 0x4a5   :  { %v4629_v30 = vunpack.i.h.bf16 %v7637_v12  ;;  %v4628_v20 = vunpack.i.l.bf16 %v7637_v12  ;;  %v4634_v10 = vunpack.i.h.bf16 %v7727_v40  ;;  %v2768_v44 = vsel %vm2758_vm9, %v2751_v63, %v4539_v48 }
 0x4a6   :  { %v2884_v2 = vsel %vm2877_vm0, %v2867_v61, %v4748_v26  ;;  %v2885_v6 = vsel %vm2877_vm0, %v2868_v52, %v4749_v17  ;;  %v4804_v56 = vunpack.i.h.bf16 %v8099_v49  ;;  %v4808_v34 = vunpack.i.l.bf16 %v8101_v50  ;;  %v10055_v52 = vld [vmem:[#allocation69_spill] sm:$0xff] }
 0x4a7   :  { %v8422_v1 = vpop.permute.xlu0 %4991  ;;  %v2784_v4 = vsel %vm2775_vm10, %v8188_v13, %v4968_v15  ;;  %v2785_v22 = vsel %vm2775_vm10, %v2768_v44, %v4969_v43  ;;  %v4839_v25 = vunpack.i.h.bf16 %v8128_v19  ;;  %v4843_v48 = vunpack.i.l.bf16 %v8130_v36  ;;  %v10056_v44 = vld [vmem:[#allocation70_spill] sm:$0xff] }
 0x4a8   :  { %v4874_v16 = vunpack.i.h.bf16 %v8161_v41  ;;  %v4878_v49 = vunpack.i.l.bf16 %v8163_v23  ;;  %v2901_v45 = vsel %vm2894_vm7, %v2884_v2, %v4613_v42  ;;  %v2902_v13 = vsel %vm2894_vm7, %v2885_v6, %v4614_v33 }
 0x4a9   :  { %v2801_v63 = vsel %vm2792_vm11, %v2784_v4, %v4603_v54  ;;  %v2802_v19 = vsel %vm2792_vm11, %v2785_v22, %v4604_v7  ;;  %v4989_v41 = vunpack.i.h.bf16 %v8406_v18  ;;  %v4988_v43 = vunpack.i.l.bf16 %v8406_v18  ;;  %v4997_v22 = vpop.permute.xlu1 %4996 }
 0x4aa   :  { %v4744_v54 = vunpack.i.h.bf16 %v8053_v14  ;;  %v4743_v7 = vunpack.i.l.bf16 %v8053_v14  ;;  %v2706_v26 = vsel %vm235_vm1, %v10055_v52, %v4804_v56  ;;  %v2707_v2 = vsel %vm235_vm1, %v10056_v44, %v4808_v34 }
 0x4ab   :  { %v8443_v38 = vpop.permute.xlu0 %5001  ;;  %v4633_v18 = vunpack.i.l.bf16 %v7727_v40  ;;  %v4639_v6 = vunpack.i.h.bf16 %v7814_v59  ;;  %v2722_v4 = vsel %vm252_vm2, %v2707_v2, %v4843_v48  ;;  %v4693_v48 = vunpack.i.l.bf16 %v8015_v58 }
 0x4ac   :  { %v5004_v57 = vunpack.i.h.bf16 %v8443_v38  ;;  %v5003_v32 = vunpack.i.l.bf16 %v8443_v38  ;;  %v2737_v14 = vsel %vm269_vm3, %v2722_v4, %v4878_v49  ;;  %v2818_v56 = vsel %vm2809_vm12, %v2801_v63, %v4743_v7 }
 0x4ad   :  { %v2835_v34 = vsel %vm2826_vm13, %v2818_v56, %v4988_v43  ;;  %v4638_v49 = vunpack.i.l.bf16 %v7814_v59  ;;  %v4644_v63 = vunpack.i.h.bf16 %v7877_v21  ;;  %v4813_v43 = vunpack.i.l.bf16 %v8107_v27  ;;  %v5022_v59 = vpop.permute.xlu1 %5021 }
 0x4ae   :  { %v2918_v60 = vsel %vm2911_vm8, %v2901_v45, %v5003_v32  ;;  %v2919_v55 = vsel %vm2911_vm8, %v2902_v13, %v5004_v57  ;;  %v2819_v45 = vsel %vm2809_vm12, %v2802_v19, %v4744_v54  ;;  %v4809_v19 = vunpack.i.h.bf16 %v8101_v50 }
 0x4af   :  { %v5007_v15 = vpop.permute.xlu0 %5006  ;;  %v2935_v42 = vsel %vm2928_vm6, %v2918_v60, %v4623_v0  ;;  %v2936_v61 = vsel %vm2928_vm6, %v2919_v55, %v4624_v5  ;;  %v2721_v0 = vsel %vm252_vm2, %v2706_v26, %v4839_v25  ;;  %v2836_v13 = vsel %vm2826_vm13, %v2819_v45, %v4989_v41 }
 0x4b0   :  { %4144 = vmatprep.mubr.f32.mxu1 %v2935_v42  ;;  %v2736_v32 = vsel %vm269_vm3, %v2721_v0, %v4874_v16  ;;  %v5009_v60 = vunpack.i.h.bf16 %v5007_v15  ;;  %v5008_v55 = vunpack.i.l.bf16 %v5007_v15  ;;  %v4694_v25 = vunpack.i.h.bf16 %v8015_v58 }
 0x4b1   :  { %4145 = vmatmul.mubr.f32.vlgmr.msra.gmra.mrb[0].mxu1 %v2936_v61  ;;  %v4999_v61 = vunpack.i.h.bf16 %v4997_v22  ;;  %v4998_v16 = vunpack.i.l.bf16 %v4997_v22  ;;  %v2752_v41 = vsel %vm290_vm4, %v2736_v32, %v4693_v48  ;;  %v4994_v58 = vunpack.i.h.bf16 %v8422_v1  ;;  %v10057_v22 = vld [vmem:[#allocation16_spill] sm:$0xff] }
 0x4b2   :  { %v2753_v15 = vsel %vm290_vm4, %v2737_v14, %v4694_v25  ;;  %v4993_v52 = vunpack.i.l.bf16 %v8422_v1  ;;  %v4759_v50 = vunpack.i.h.bf16 %v8070_v11  ;;  %v4758_v0 = vunpack.i.l.bf16 %v8070_v11  ;;  %v10058_v14 = vld [vmem:[#allocation11_spill] sm:$0xff] }
 0x4b3   :  { %v8483_v42 = vpop.permute.xlu0 %5011  ;;  %v2852_v54 = vsel %vm2843_vm14, %v2835_v34, %v4998_v16  ;;  %v2853_v7 = vsel %vm2843_vm14, %v2836_v13, %v4999_v61  ;;  %v4844_v4 = vunpack.i.h.bf16 %v8130_v36  ;;  %v4848_v32 = vunpack.i.l.bf16 %v10057_v22  ;;  %v10059_v34 = vld [vmem:[#allocation17_spill] sm:$0xff]  ;;  %v10060_v25 = vld [vmem:[#allocation71_spill] sm:$0xff]  ;;  %v10061_v61 = vld [vmem:[#allocation72_spill] sm:$0xff] }
 0x4b4   :  { %v2869_v26 = vsel %vm2860_vm15, %v2852_v54, %v5008_v55  ;;  %v2870_v44 = vsel %vm2860_vm15, %v2853_v7, %v5009_v60  ;;  %v4699_v56 = vunpack.i.h.bf16 %v10058_v14  ;;  %v4698_v45 = vunpack.i.l.bf16 %v10058_v14 }
 0x4b5   :  { %v4879_v1 = vunpack.i.h.bf16 %v8163_v23  ;;  %v4883_v13 = vunpack.i.l.bf16 %v10059_v34  ;;  %v2770_v60 = vsel %vm2758_vm9, %v2753_v15, %v4544_v37  ;;  %v2769_v11 = vsel %vm2758_vm9, %v2752_v41, %v4543_v35 }
 0x4b6   :  { %v2886_v36 = vsel %vm2877_vm0, %v2869_v26, %v4758_v0  ;;  %v2887_v55 = vsel %vm2877_vm0, %v2870_v44, %v4759_v50  ;;  %v2708_v48 = vsel %vm235_vm1, %v10060_v25, %v4809_v19  ;;  %v2709_v23 = vsel %vm235_vm1, %v10061_v61, %v4813_v43 }
 0x4b7   :  { %v8499_v2 = vpop.permute.xlu0 %5016  ;;  %v2787_v16 = vsel %vm2775_vm10, %v2770_v60, %v4994_v58  ;;  %v2786_v54 = vsel %vm2775_vm10, %v2769_v11, %v4993_v52  ;;  %v2723_v37 = vsel %vm252_vm2, %v2708_v48, %v4844_v4  ;;  %v2724_v51 = vsel %vm252_vm2, %v2709_v23, %v4848_v32  ;;  %v10064_v60 = vld [vmem:[#allocation4_spill] sm:$0xff] }
 0x4b8   :  { %v2738_v15 = vsel %vm269_vm3, %v2723_v37, %v4879_v1  ;;  %v2739_v26 = vsel %vm269_vm3, %v2724_v51, %v4883_v13  ;;  %v2903_v19 = vsel %vm2894_vm7, %v2886_v36, %v4628_v20  ;;  %v2904_v43 = vsel %vm2894_vm7, %v2887_v55, %v4629_v30 }
 0x4b9   :  { %v2804_v58 = vsel %vm2792_vm11, %v2787_v16, %v4619_v47  ;;  %v2803_v52 = vsel %vm2792_vm11, %v2786_v54, %v4618_v24  ;;  %v5014_v0 = vunpack.i.h.bf16 %v8483_v42  ;;  %v5013_v20 = vunpack.i.l.bf16 %v8483_v42  ;;  %v10063_v24 = vld [vmem:[#allocation12_spill] sm:$0xff] }
 0x4ba   :  { %v4643_v47 = vunpack.i.l.bf16 %v7877_v21  ;;  %v4654_v32 = vunpack.i.h.bf16 %v10062_v8  ;;  %v4754_v14 = vunpack.i.h.bf16 %v10063_v24  ;;  %v4753_v1 = vunpack.i.l.bf16 %v10063_v24 }
 0x4bb   :  { %v5027_v7 = vpop.permute.xlu0 %5026  ;;  %v4653_v13 = vunpack.i.l.bf16 %v10062_v8  ;;  %v4659_v42 = vunpack.i.h.bf16 %v10064_v60  ;;  %v2754_v11 = vsel %vm290_vm4, %v2738_v15, %v4698_v45  ;;  %v5019_v55 = vunpack.i.h.bf16 %v8499_v2  ;;  %v10074_v8 = vld [vmem:[#allocation3_spill] sm:$0xff] }
 0x4bc   :  { %v5029_v35 = vunpack.i.h.bf16 %v5027_v7  ;;  %v5028_v41 = vunpack.i.l.bf16 %v5027_v7  ;;  %v2821_v36 = vsel %vm2809_vm12, %v2804_v58, %v4754_v14  ;;  %v5018_v25 = vunpack.i.l.bf16 %v8499_v2  ;;  %v10069_v14 = vld [vmem:[#allocation20_spill] sm:$0xff] }
 0x4bd   :  { %v2838_v61 = vsel %vm2826_vm13, %v2821_v36, %v5014_v0  ;;  %v4658_v45 = vunpack.i.l.bf16 %v10064_v60  ;;  %v5024_v37 = vunpack.i.h.bf16 %v5022_v59  ;;  %v5023_v51 = vunpack.i.l.bf16 %v5022_v59  ;;  %v5047_v59 = vpop.permute.xlu1 %5046 }
 0x4be   :  { %v2920_v44 = vsel %vm2911_vm8, %v2903_v19, %v5028_v41  ;;  %v2921_v50 = vsel %vm2911_vm8, %v2904_v43, %v5029_v35  ;;  %v4814_v41 = vunpack.i.h.bf16 %v8107_v27  ;;  %v2771_v2 = vsel %vm2758_vm9, %v2754_v11, %v4548_v28 }
 0x4bf   :  { %v5032_v4 = vpop.permute.xlu0 %5031  ;;  %v2937_v12 = vsel %vm2928_vm6, %v2920_v44, %v4638_v49  ;;  %v2938_v30 = vsel %vm2928_vm6, %v2921_v50, %v4639_v6  ;;  %v2755_v49 = vsel %vm290_vm4, %v2739_v26, %v4699_v56  ;;  %v2820_v6 = vsel %vm2809_vm12, %v2803_v52, %v4753_v1  ;;  %v10065_v56 = vld [vmem:[#allocation31_spill] sm:$0xff]  ;;  %v10066_v52 = vld [vmem:[#allocation32_spill] sm:$0xff] }
 0x4c0   :  { %4147 = vmatprep.mubr.f32.mxu1 %v2937_v12  ;;  %v2837_v48 = vsel %vm2826_vm13, %v2820_v6, %v5013_v20  ;;  %v5034_v23 = vunpack.i.h.bf16 %v5032_v4  ;;  %v5033_v16 = vunpack.i.l.bf16 %v5032_v4  ;;  %v4704_v7 = vunpack.i.h.bf16 %v10065_v56  ;;  %v10070_v1 = vld [vmem:[#allocation75_spill] sm:$0xff] }
 0x4c1   :  { %4148 = vmatmul.mubr.f32.gmra.mrb[2].mxu1 %v2938_v30  ;;  %v4703_v35 = vunpack.i.l.bf16 %v10065_v56  ;;  %v2772_v15 = vsel %vm2758_vm9, %v2755_v49, %v4549_v29  ;;  %v2788_v26 = vsel %vm2775_vm10, %v2771_v2, %v5018_v25  ;;  %v2854_v43 = vsel %vm2843_vm14, %v2837_v48, %v5023_v51  ;;  %v10067_v29 = vld [vmem:[#allocation8_spill] sm:$0xff]  ;;  %v10068_v30 = vld [vmem:[#allocation73_spill] sm:$0xff]  ;;  %v10071_v25 = vld [vmem:[#allocation38_spill] sm:$0xff] }
 0x4c2   :  { %v2789_v19 = vsel %vm2775_vm10, %v2772_v15, %v5019_v55  ;;  %v2855_v58 = vsel %vm2843_vm14, %v2838_v61, %v5024_v37  ;;  %v4764_v44 = vunpack.i.h.bf16 %v10066_v52  ;;  %v4849_v27 = vunpack.i.h.bf16 %v10057_v22 }
 0x4c3   :  { %v5037_v54 = vpop.permute.xlu0 %5036  ;;  %v2871_v50 = vsel %vm2860_vm15, %v2854_v43, %v5033_v16  ;;  %v2872_v28 = vsel %vm2860_vm15, %v2855_v58, %v5034_v23  ;;  %v4763_v62 = vunpack.i.l.bf16 %v10066_v52  ;;  %v4769_v20 = vunpack.i.h.bf16 %v10067_v29  ;;  %v10072_v16 = vld [vmem:[#allocation34_spill] sm:$0xff] }
 0x4c4   :  { %v4768_v4 = vunpack.i.l.bf16 %v10067_v29  ;;  %v4884_v12 = vunpack.i.h.bf16 %v10059_v34  ;;  %v2710_v24 = vsel %vm235_vm1, %v10068_v30, %v4814_v41  ;;  %v2711_v22 = vsel %vm235_vm1, %v10070_v1, %v10069_v14 }
 0x4c5   :  { %v2805_v11 = vsel %vm2792_vm11, %v2788_v26, %v4633_v18  ;;  %v2806_v49 = vsel %vm2792_vm11, %v2789_v19, %v4634_v10  ;;  %v5039_v6 = vunpack.i.h.bf16 %v5037_v54  ;;  %v5038_v36 = vunpack.i.l.bf16 %v5037_v54  ;;  %v10073_v10 = vld [vmem:[#allocation35_spill] sm:$0xff] }
 0x4c6   :  { %v2888_v34 = vsel %vm2877_vm0, %v2871_v50, %v4768_v4  ;;  %v2889_v55 = vsel %vm2877_vm0, %v2872_v28, %v4769_v20  ;;  %v4779_v48 = vunpack.i.h.bf16 %v10071_v25  ;;  %v4778_v61 = vunpack.i.l.bf16 %v10071_v25 }
 0x4c7   :  { %v8579_v0 = vpop.permute.xlu0 %5041  ;;  %v2725_v23 = vsel %vm252_vm2, %v2710_v24, %v4849_v27  ;;  %v2726_v18 = vsel %vm252_vm2, %v2711_v22, %v10072_v16  ;;  %v2822_v41 = vsel %vm2809_vm12, %v2805_v11, %v4763_v62  ;;  %v2823_v2 = vsel %vm2809_vm12, %v2806_v49, %v4764_v44  ;;  %v5072_v62 = vpop.permute.xlu1 %5071 }
 0x4c8   :  { %v2740_v40 = vsel %vm269_vm3, %v2725_v23, %v4884_v12  ;;  %v2741_v37 = vsel %vm269_vm3, %v2726_v18, %v10073_v10  ;;  %v2905_v15 = vsel %vm2894_vm7, %v2888_v34, %v4643_v47  ;;  %v2906_v26 = vsel %vm2894_vm7, %v2889_v55, %v4644_v63 }
 0x4c9   :  { %v2839_v19 = vsel %vm2826_vm13, %v2822_v41, %v5038_v36  ;;  %v2840_v43 = vsel %vm2826_vm13, %v2823_v2, %v5039_v6  ;;  %v5049_v27 = vunpack.i.h.bf16 %v5047_v59  ;;  %v5048_v50 = vunpack.i.l.bf16 %v5047_v59 }
 0x4ca   :  { %v2756_v63 = vsel %vm290_vm4, %v2740_v40, %v4703_v35  ;;  %v2757_v47 = vsel %vm290_vm4, %v2741_v37, %v4704_v7  ;;  %v5044_v4 = vunpack.i.h.bf16 %v8579_v0  ;;  %v5043_v12 = vunpack.i.l.bf16 %v8579_v0 }
 0x4cb   :  { %v5052_v56 = vpop.permute.xlu0 %5051  ;;  %v2856_v30 = vsel %vm2843_vm14, %v2839_v19, %v5048_v50  ;;  %v4664_v24 = vunpack.i.h.bf16 %v10074_v8  ;;  %v5074_v14 = vunpack.i.h.bf16 %v5072_v62  ;;  %v5073_v1 = vunpack.i.l.bf16 %v5072_v62 }
 0x4cc   :  { %v5054_v54 = vunpack.i.h.bf16 %v5052_v56  ;;  %v5053_v51 = vunpack.i.l.bf16 %v5052_v56  ;;  %v2774_v49 = vsel %vm2758_vm9, %v2757_v47, %v4554_v3  ;;  %v2773_v59 = vsel %vm2758_vm9, %v2756_v63, %v4553_v31  ;;  %v10076_v56 = vld [vmem:[#allocation9_spill] sm:$0xff] }
 0x4cd   :  { %v2791_v34 = vsel %vm2775_vm10, %v2774_v49, %v5044_v4  ;;  %v2790_v55 = vsel %vm2775_vm10, %v2773_v59, %v5043_v12  ;;  %v4774_v40 = vunpack.i.h.bf16 %v10076_v56  ;;  %v4773_v10 = vunpack.i.l.bf16 %v10076_v56 }
 0x4ce   :  { %v2922_v58 = vsel %vm2911_vm8, %v2905_v15, %v5053_v51  ;;  %v2923_v52 = vsel %vm2911_vm8, %v2906_v26, %v5054_v54  ;;  %v2591_v51 = vpop.permute.xlu1 %2590  ;;  %vm10079_vm3 = vcmask 97280   ;;  %vm3925_vm9 = vcmask 1045509  }
 0x4cf   :  { %v5057_v28 = vpop.permute.xlu0 %5056  ;;  %v2939_v44 = vsel %vm2928_vm6, %v2922_v58, %v4653_v13  ;;  %v2940_v21 = vsel %vm2928_vm6, %v2923_v52, %v4654_v32  ;;  %v2857_v13 = vsel %vm2843_vm14, %v2840_v43, %v5049_v27  ;;  %v4663_v32 = vunpack.i.l.bf16 %v10074_v8 }
 0x4d0   :  { %v5059_v29 = vunpack.i.h.bf16 %v5057_v28  ;;  %v5058_v20 = vunpack.i.l.bf16 %v5057_v28  ;;  %4150 = vmatprep.mubr.f32.mxu1 %v2939_v44 }
 0x4d1   :  { %4151 = vmatmul.mubr.f32.gmra.mrb[4].mxu1 %v2940_v21  ;;  %v10077_v21 = vld [vmem:[#allocation58_spill] sm:$0xff] }
 0x4d2   :  { %v2873_v35 = vsel %vm2860_vm15, %v2856_v30, %v5058_v20  ;;  %v2874_v7 = vsel %vm2860_vm15, %v2857_v13, %v5059_v29  ;;  %v2681_v20 = vpop.permute.xlu1 %2680 }
 0x4d3   :  { %v5062_v22 = vpop.permute.xlu0 %5061  ;;  %v2890_v11 = vsel %vm2877_vm0, %v2873_v35, %v4778_v61  ;;  %v2891_v0 = vsel %vm2877_vm0, %v2874_v7, %v4779_v48  ;;  %v10075_v48 = vld [vmem:[#allocation6_spill] sm:$0xff] }
 0x4d4   :  { %v2907_v6 = vsel %vm2894_vm7, %v2890_v11, %v4658_v45  ;;  %v2908_v36 = vsel %vm2894_vm7, %v2891_v0, %v4659_v42  ;;  %v4649_v39 = vunpack.i.h.bf16 %v10075_v48  ;;  %v4648_v31 = vunpack.i.l.bf16 %v10075_v48 }
 0x4d5   :  { %v2924_v25 = vsel %vm2911_vm8, %v2907_v6, %v5073_v1  ;;  %v2925_v3 = vsel %vm2911_vm8, %v2908_v36, %v5074_v14  ;;  %v5064_v16 = vunpack.i.h.bf16 %v5062_v22  ;;  %v5063_v18 = vunpack.i.l.bf16 %v5062_v22 }
 0x4d6   :  { %v2941_v61 = vsel %vm2928_vm6, %v2924_v25, %v4663_v32  ;;  %v2942_v45 = vsel %vm2928_vm6, %v2925_v3, %v4664_v24  ;;  %v2808_v60 = vsel %vm2792_vm11, %v2791_v34, %v4649_v39  ;;  %v2807_v42 = vsel %vm2792_vm11, %v2790_v55, %v4648_v31 }
 0x4d7   :  { %v5067_v23 = vpop.permute.xlu0 %5066  ;;  %4153 = vmatprep.mubr.f32.mxu1 %v2941_v61  ;;  %v2824_v41 = vsel %vm2809_vm12, %v2807_v42, %v4773_v10  ;;  %v2825_v2 = vsel %vm2809_vm12, %v2808_v60, %v4774_v40  ;;  %vm3931_vm11 = vcmask 1047559  }
 0x4d8   :  { %4154 = vmatmul.mubr.f32.gmra.mrb[6].mxu1 %v2942_v45  ;;  %v5069_v37 = vunpack.i.h.bf16 %v5067_v23  ;;  %v5068_v54 = vunpack.i.l.bf16 %v5067_v23  ;;  %v2841_v26 = vsel %vm2826_vm13, %v2824_v41, %v5063_v18  ;;  %v2842_v19 = vsel %vm2826_vm13, %v2825_v2, %v5064_v16 }
 0x4da   :  { %v2858_v52 = vsel %vm2843_vm14, %v2841_v26, %v5068_v54  ;;  %v2859_v27 = vsel %vm2843_vm14, %v2842_v19, %v5069_v37 }
 0x4db   :  { %v5077_v15 = vpop.permute.xlu0 %5076 }
 0x4dc   :  { %v5079_v43 = vunpack.i.h.bf16 %v5077_v15  ;;  %v5078_v58 = vunpack.i.l.bf16 %v5077_v15 }
 0x4de   :  { %v2875_v50 = vsel %vm2860_vm15, %v2858_v52, %v5078_v58  ;;  %v2876_v28 = vsel %vm2860_vm15, %v2859_v27, %v5079_v43 }
 0x4df   :  { %v2636_v44 = vpop.permute.xlu0 %2635  ;;  %v2892_v63 = vsel %vm2877_vm0, %v2875_v50, %v10077_v21  ;;  %v2893_v47 = vsel %vm2877_vm0, %v2876_v28, %v4749_v17 }
 0x4e0   :  { %v2909_v62 = vsel %vm2894_vm7, %v2892_v63, %v2591_v51  ;;  %v2910_v29 = vsel %vm2894_vm7, %v2893_v47, %v4614_v33 }
 0x4e1   :  { %v2926_v4 = vsel %vm2911_vm8, %v2909_v62, %v2636_v44  ;;  %v2927_v12 = vsel %vm2911_vm8, %v2910_v29, %v5004_v57 }
 0x4e2   :  { %v2943_v30 = vsel %vm2928_vm6, %v2926_v4, %v2681_v20  ;;  %v2944_v9 = vsel %vm2928_vm6, %v2927_v12, %v4624_v5  ;;  %vm10080_vm6 = vmmov %vm10079_vm3 }
 0x4e3   :  { %4156 = vmatprep.mubr.f32.mxu1 %v2943_v30 }
 0x4e4   :  { %4157 = vmatmul.mubr.f32.gmra.mrb[8].mxu1 %v2944_v9 }
 0x554   :  { %v8683_v17 = vpop.f32.mrb[16].mxu0 }
 0x555   :  { %v3109_v53 = vsel %vm252_vm2, %v8683_v17, 0.0  ;;  %v3146_v33 = vmul.f32 %v8683_v17, %v8683_v17  ;;  %v8689_v13 = vpop.f32.mrb[17].mxu0 }
 0x556   :  { %v3108_v38 = vsel %vm252_vm2, %v8689_v13, 0.0  ;;  %v3145_v46 = vmul.f32 %v8689_v13, %v8689_v13 }
 0x557   :  { %v3162_v5 = vsel %vm252_vm2, %v3146_v33, 0.0  ;;  %v3110_v57 = vadd.f32 %v3109_v53, %v3108_v38 }
 0x558   :  { %v3161_v8 = vsel %vm252_vm2, %v3145_v46, 0.0 }
 0x559   :  { %v3163_v24 = vadd.f32 %v3162_v5, %v3161_v8 }
 0x564   :  { %v8697_v32 = vpop.f32.mrb[18].mxu0 }
 0x565   :  { %v8699_v35 = vpop.f32.mrb[19].mxu0  ;;  %v3148_v7 = vmul.f32 %v8697_v32, %v8697_v32  ;;  %v3113_v11 = vsel %vm252_vm2, %v8697_v32, 0.0 }
 0x566   :  { %v3111_v14 = vsel %vm252_vm2, %v8699_v35, 0.0  ;;  %v3147_v1 = vmul.f32 %v8699_v35, %v8699_v35 }
 0x567   :  { %v3112_v22 = vadd.f32 %v3111_v14, %v3110_v57  ;;  %v3166_v6 = vsel %vm252_vm2, %v3148_v7, 0.0 }
 0x568   :  { %v3164_v0 = vsel %vm252_vm2, %v3147_v1, 0.0 }
 0x569   :  { %v3165_v49 = vadd.f32 %v3164_v0, %v3163_v24  ;;  %v3114_v59 = vadd.f32 %v3113_v11, %v3112_v22 }
 0x56b   :  { %v3167_v36 = vadd.f32 %v3166_v6, %v3165_v49 }
 0x574   :  { %v8711_v34 = vpop.f32.mrb[20].mxu0 }
 0x575   :  { %v8713_v55 = vpop.f32.mrb[21].mxu0  ;;  %v3150_v25 = vmul.f32 %v8711_v34, %v8711_v34  ;;  %v3117_v31 = vsel %vm252_vm2, %v8711_v34, 0.0 }
 0x576   :  { %v3115_v3 = vsel %vm252_vm2, %v8713_v55, 0.0  ;;  %v3149_v48 = vmul.f32 %v8713_v55, %v8713_v55 }
 0x577   :  { %v3116_v39 = vadd.f32 %v3115_v3, %v3114_v59  ;;  %v3170_v60 = vsel %vm252_vm2, %v3150_v25, 0.0 }
 0x578   :  { %v3168_v61 = vsel %vm252_vm2, %v3149_v48, 0.0 }
 0x579   :  { %v3118_v45 = vadd.f32 %v3117_v31, %v3116_v39  ;;  %v3169_v23 = vadd.f32 %v3168_v61, %v3167_v36 }
 0x57b   :  { %v3171_v42 = vadd.f32 %v3170_v60, %v3169_v23 }
 0x584   :  { %v8725_v16 = vpop.f32.mrb[0].mxu1 }
 0x585   :  { %v8727_v18 = vpop.f32.mrb[1].mxu1  ;;  %v3152_v56 = vmul.f32 %v8725_v16, %v8725_v16  ;;  %v3121_v54 = vsel %vm252_vm2, %v8725_v16, 0.0 }
 0x586   :  { %v3119_v40 = vsel %vm252_vm2, %v8727_v18, 0.0  ;;  %v3151_v10 = vmul.f32 %v8727_v18, %v8727_v18 }
 0x587   :  { %v3120_v37 = vadd.f32 %v3119_v40, %v3118_v45  ;;  %v3174_v15 = vsel %vm252_vm2, %v3152_v56, 0.0 }
 0x588   :  { %v3172_v51 = vsel %vm252_vm2, %v3151_v10, 0.0 }
 0x589   :  { %v3173_v41 = vadd.f32 %v3172_v51, %v3171_v42  ;;  %v3122_v2 = vadd.f32 %v3121_v54, %v3120_v37 }
 0x58b   :  { %v3175_v26 = vadd.f32 %v3174_v15, %v3173_v41 }
 0x594   :  { %v8739_v19 = vpop.f32.mrb[2].mxu1 }
 0x595   :  { %v8741_v43 = vpop.f32.mrb[3].mxu1  ;;  %v3154_v58 = vmul.f32 %v8739_v19, %v8739_v19  ;;  %v3125_v28 = vsel %vm252_vm2, %v8739_v19, 0.0 }
 0x596   :  { %v3123_v52 = vsel %vm252_vm2, %v8741_v43, 0.0  ;;  %v3153_v27 = vmul.f32 %v8741_v43, %v8741_v43 }
 0x597   :  { %v3124_v50 = vadd.f32 %v3123_v52, %v3122_v2  ;;  %v3178_v47 = vsel %vm252_vm2, %v3154_v58, 0.0 }
 0x598   :  { %v3176_v44 = vsel %vm252_vm2, %v3153_v27, 0.0 }
 0x599   :  { %v3177_v21 = vadd.f32 %v3176_v44, %v3175_v26  ;;  %v3126_v63 = vadd.f32 %v3125_v28, %v3124_v50 }
 0x59b   :  { %v3179_v62 = vadd.f32 %v3178_v47, %v3177_v21 }
 0x5a4   :  { %v8753_v29 = vpop.f32.mrb[4].mxu1 }
 0x5a5   :  { %v8755_v20 = vpop.f32.mrb[5].mxu1  ;;  %v3156_v4 = vmul.f32 %v8753_v29, %v8753_v29  ;;  %v3129_v53 = vsel %vm252_vm2, %v8753_v29, 0.0 }
 0x5a6   :  { %v3127_v12 = vsel %vm252_vm2, %v8755_v20, 0.0  ;;  %v3155_v30 = vmul.f32 %v8755_v20, %v8755_v20 }
 0x5a7   :  { %v3128_v9 = vadd.f32 %v3127_v12, %v3126_v63  ;;  %v3182_v5 = vsel %vm252_vm2, %v3156_v4, 0.0 }
 0x5a8   :  { %v3180_v33 = vsel %vm252_vm2, %v3155_v30, 0.0 }
 0x5a9   :  { %v3181_v38 = vadd.f32 %v3180_v33, %v3179_v62  ;;  %v3130_v46 = vadd.f32 %v3129_v53, %v3128_v9 }
 0x5ab   :  { %v8767_v57 = vpop.f32.mrb[6].mxu1  ;;  %v3183_v8 = vadd.f32 %v3182_v5, %v3181_v38 }
 0x5ac   :  { %v8769_v24 = vpop.f32.mrb[7].mxu1  ;;  %v3158_v7 = vmul.f32 %v8767_v57, %v8767_v57  ;;  %v3133_v11 = vsel %vm252_vm2, %v8767_v57, 0.0 }
 0x5ad   :  { %v3131_v14 = vsel %vm252_vm2, %v8769_v24, 0.0  ;;  %v3157_v1 = vmul.f32 %v8769_v24, %v8769_v24 }
 0x5ae   :  { %v3132_v22 = vadd.f32 %v3131_v14, %v3130_v46  ;;  %v3186_v6 = vsel %vm252_vm2, %v3158_v7, 0.0 }
 0x5af   :  { %v3184_v0 = vsel %vm252_vm2, %v3157_v1, 0.0  ;;  %v3106_v1 = vld [vmem:[%s9408_s6] sm:$0x1] }
 0x5b0   :  { %v3185_v49 = vadd.f32 %v3184_v0, %v3183_v8  ;;  %v3134_v59 = vadd.f32 %v3133_v11, %v3132_v22  ;;  %v3107_v0 = vld [vmem:[%s9409_s7] sm:$0x1] }
 0x5b2   :  { %v3187_v36 = vadd.f32 %v3186_v6, %v3185_v49  ;;  %v10078_v6 = vld [vmem:[#allocation23_spill] sm:$0xff] }
 0x5b7   :  { %v8781_v25 = vpop.f32.mrb[8].mxu1 }
 0x5b8   :  { %v8783_v3 = vpop.f32.mrb[9].mxu1  ;;  %v3160_v48 = vmul.f32 %v8781_v25, %v8781_v25  ;;  %v3137_v45 = vsel %vm252_vm2, %v8781_v25, 0.0 }
 0x5b9   :  { %v3135_v39 = vsel %vm252_vm2, %v8783_v3, 0.0  ;;  %v3159_v31 = vmul.f32 %v8783_v3, %v8783_v3 }
 0x5ba   :  { %v3136_v61 = vadd.f32 %v3135_v39, %v3134_v59  ;;  %v3190_v56 = vsel %vm252_vm2, %v3160_v48, 0.0 }
 0x5bb   :  { %v3188_v23 = vsel %vm252_vm2, %v3159_v31, 0.0 }
 0x5bc   :  { %v3138_v60 = vadd.f32 %v3137_v45, %v3136_v61  ;;  %v3189_v42 = vadd.f32 %v3188_v23, %v3187_v36 }
 0x5be   :  { %v3139_v40 = vrot.slane %v3138_v60, 4  ;;  %v3191_v10 = vadd.f32 %v3190_v56, %v3189_v42 }
 0x5c0   :  { %v3140_v37 = vadd.f32 %v3139_v40, %v3138_v60  ;;  %v3192_v54 = vrot.slane %v3191_v10, 4 }
 0x5c2   :  { %v3141_v51 = vrot.slane %v3140_v37, 2  ;;  %v3193_v41 = vadd.f32 %v3192_v54, %v3191_v10 }
 0x5c4   :  { %v3142_v2 = vadd.f32 %v3141_v51, %v3140_v37  ;;  %v3194_v15 = vrot.slane %v3193_v41, 2 }
 0x5c6   :  { %v3143_v26 = vrot.slane %v3142_v2, 1  ;;  %v3195_v58 = vadd.f32 %v3194_v15, %v3193_v41 }
 0x5c8   :  { %v3144_v52 = vadd.f32 %v3143_v26, %v3142_v2  ;;  %v3196_v27 = vrot.slane %v3195_v58, 1 }
 0x5ca   :  { %3199 = vrot.lane.b32.xlu0 %v3144_v52, %s5089_s1  ;;  %v3197_v50 = vadd.f32 %v3196_v27, %v3195_v58 }
 0x5cc   :  { %3204 = vrot.lane.b32.xlu1 %v3197_v50, %s5089_s1 }
 0x5ce   :  { %3208 = vrot.lane.b32.xlu0 %v3144_v52, %s5090_s15 }
 0x5d0   :  { %3212 = vrot.lane.b32.xlu1 %v3197_v50, %s5090_s15 }
 0x5d2   :  { %3216 = vrot.lane.b32.xlu0 %v3144_v52, %s5091_s16 }
 0x5d4   :  { %3220 = vrot.lane.b32.xlu1 %v3197_v50, %s5091_s16 }
 0x63c   :  { %v3200_v28 = vpop.permute.xlu0 %3199 }
 0x63d   :  { %v3202_v63 = vadd.f32 %v3200_v28, %v3144_v52 }
 0x63e   :  { %v3205_v44 = vpop.permute.xlu1 %3204 }
 0x63f   :  { %v3207_v62 = vadd.f32 %v3205_v44, %v3197_v50 }
 0x640   :  { %v3209_v21 = vpop.permute.xlu0 %3208 }
 0x641   :  { %v3211_v4 = vadd.f32 %v3209_v21, %v3202_v63 }
 0x642   :  { %v3213_v47 = vpop.permute.xlu1 %3212 }
 0x643   :  { %v3215_v30 = vadd.f32 %v3213_v47, %v3207_v62 }
 0x644   :  { %v3217_v12 = vpop.permute.xlu0 %3216 }
 0x645   :  { %v3219_v9 = vadd.f32 %v3217_v12, %v3211_v4 }
 0x646   :  { %v3221_v53 = vpop.permute.xlu1 %3220 }
 0x647   :  { %v3224_v33 = vmul.f32 0.001953125, %v3219_v9  ;;  %v3223_v38 = vadd.f32 %v3221_v53, %v3215_v30 }
 0x649   :  { %v3226_v46 = vmul.f32 %v3224_v33, %v3224_v33  ;;  %v3225_v5 = vmul.f32 0.001953125, %v3223_v38 }
 0x64b   :  { %v3227_v8 = vsub.f32 %v3225_v5, %v3226_v46 }
 0x64d   :  { %v3228_v7 = vmax.f32 %v3227_v8, 0.0 }
 0x64f   :  { %v3229_v14 = vadd.f32 1e-05, %v3228_v7 }
 0x651   :  { %5082 = vrsqrt.f32 %v3229_v14 }
 0x65b   :  { %v5083_v22 = vpop.eup %5082 }
 0x65c   :  { %v3231_v11 = vmul.f32 %v5083_v22, %v3106_v1 }
 0x65e   :  { %3238 = vrot.lane.b32.xlu1 %v3231_v11, %s5086_s14  ;;  %3235 = vrot.lane.b32.xlu0 %v3231_v11, %s5088_s30  ;;  %v3232_v49 = vmul.f32 %v3231_v11, %v3224_v33 }
 0x660   :  { %v3233_v59 = vsub.f32 %v3107_v0, %v3232_v49 }
 0x662   :  { %3241 = vrot.lane.b32.xlu0 %v3231_v11, %s5092_s21  ;;  %v3251_v36 = vrot.slane %v3233_v59, %v10078_v6 }
 0x664   :  { %3252 = vrot.lane.b32.xlu1 %v3251_v36, %s5088_s30 }
 0x666   :  { %3255 = vrot.lane.b32.xlu0 %v3251_v36, %s5086_s14 }
 0x668   :  { %3258 = vrot.lane.b32.xlu1 %v3251_v36, %s5092_s21 }
 0x6d0   :  { %v3236_v48 = vpop.permute.xlu0 %3235  ;;  %v3239_v39 = vpop.permute.xlu1 %3238 }
 0x6d1   :  { %v3244_v31 = vsel %vm623_vm5, %v3231_v11, %v3236_v48 }
 0x6d2   :  { %v3245_v61 = vsel %vm235_vm1, %v3244_v31, %v3239_v39 }
 0x6d4   :  { %v3242_v45 = vpop.permute.xlu0 %3241 }
 0x6d5   :  { %v3246_v23 = vsel %vm10079_vm3, %v3245_v61, %v3242_v45 }
 0x6d6   :  { %v3253_v60 = vpop.permute.xlu1 %3252  ;;  %v8818_v42 = vrot.slane %v3246_v23, %v10078_v6 }
 0x6d7   :  { %v3261_v56 = vsel %vm623_vm5, %v3233_v59, %v3253_v60  ;;  %vm3922_vm5 = vcmask 1044484  }
 0x6d8   :  { %v3256_v40 = vpop.permute.xlu0 %3255  ;;  %v3269_v51 = vmul.f32 %v8683_v17, %v8818_v42  ;;  %v3268_v2 = vmul.f32 %v8818_v42, %v8689_v13  ;;  %v3271_v15 = vmul.f32 %v8697_v32, %v8818_v42  ;;  %v3270_v26 = vmul.f32 %v8818_v42, %v8699_v35 }
 0x6d9   :  { %v3262_v10 = vsel %vm235_vm1, %v3261_v56, %v3256_v40  ;;  %v3273_v50 = vmul.f32 %v8711_v34, %v8818_v42  ;;  %v3272_v13 = vmul.f32 %v8818_v42, %v8713_v55  ;;  %v3275_v34 = vmul.f32 %v8725_v16, %v8818_v42 }
 0x6da   :  { %v3259_v37 = vpop.permute.xlu1 %3258  ;;  %v3274_v55 = vmul.f32 %v8818_v42, %v8727_v18  ;;  %v3277_v16 = vmul.f32 %v8739_v19, %v8818_v42  ;;  %v3276_v18 = vmul.f32 %v8818_v42, %v8741_v43  ;;  %v3279_v19 = vmul.f32 %v8753_v29, %v8818_v42 }
 0x6db   :  { %v3263_v54 = vsel %vm10080_vm6, %v3262_v10, %v3259_v37  ;;  %v3278_v43 = vmul.f32 %v8818_v42, %v8755_v20  ;;  %v3280_v29 = vmul.f32 %v8818_v42, %v8769_v24  ;;  %v3282_v24 = vmul.f32 %v8818_v42, %v8783_v3 }
 0x6dc   :  { %v8826_v41 = vrot.slane %v3263_v54, %v10078_v6  ;;  %v3281_v6 = vmul.f32 %v8767_v57, %v8818_v42  ;;  %v3283_v57 = vmul.f32 %v8781_v25, %v8818_v42  ;;  %vm3913_vm1 = vcmask 1041409  }
 0x6de   :  { %v3289_v58 = vadd.f32 %v8826_v41, %v3269_v51  ;;  %v3288_v52 = vadd.f32 %v8826_v41, %v3268_v2  ;;  %v3291_v27 = vadd.f32 %v8826_v41, %v3271_v15  ;;  %v3290_v17 = vadd.f32 %v8826_v41, %v3270_v26 }
 0x6df   :  { %v3293_v35 = vadd.f32 %v8826_v41, %v3273_v50  ;;  %v3292_v44 = vadd.f32 %v8826_v41, %v3272_v13  ;;  %v3295_v4 = vadd.f32 %v8826_v41, %v3275_v34  ;;  %v3294_v12 = vadd.f32 %v8826_v41, %v3274_v55 }
 0x6e0   :  { %v8842_v28 = vmax.f32 %v3289_v58, 0.0  ;;  %v8844_v32 = vmax.f32 %v3288_v52, 0.0  ;;  %v8850_v47 = vmax.f32 %v3291_v27, 0.0  ;;  %v8852_v62 = vmax.f32 %v3290_v17, 0.0 }
 0x6e1   :  { %v8864_v53 = vmax.f32 %v3293_v35, 0.0  ;;  %v8866_v33 = vmax.f32 %v3292_v44, 0.0  ;;  %v8874_v38 = vmax.f32 %v3295_v4, 0.0  ;;  %v8876_v46 = vmax.f32 %v3294_v12, 0.0 }
 0x6e2   :  { %v3337_v21 = vrot.slane %v8842_v28, 1  ;;  %v3336_v63 = vrot.slane %v8844_v32, 1  ;;  %v3339_v30 = vrot.slane %v8850_v47, 1  ;;  %v3338_v9 = vrot.slane %v8852_v62, 1 }
 0x6e3   :  { %v3341_v5 = vrot.slane %v8864_v53, 1  ;;  %v3340_v8 = vrot.slane %v8866_v33, 1  ;;  %v3297_v7 = vadd.f32 %v8826_v41, %v3277_v16  ;;  %v3296_v14 = vadd.f32 %v8826_v41, %v3276_v18 }
 0x6e4   :  { %3354 = vrot.lane.b32.xlu1 %v3337_v21, %s5085_s11  ;;  %3352 = vrot.lane.b32.xlu0 %v3336_v63, %s5085_s11  ;;  %v3343_v1 = vrot.slane %v8874_v38, 1  ;;  %v3342_v22 = vrot.slane %v8876_v46, 1  ;;  %v3299_v49 = vadd.f32 %v8826_v41, %v3279_v19  ;;  %v3298_v59 = vadd.f32 %v8826_v41, %v3278_v43 }
 0x6e5   :  { %v8890_v11 = vmax.f32 %v3297_v7, 0.0  ;;  %v8892_v0 = vmax.f32 %v3296_v14, 0.0  ;;  %v3301_v20 = vadd.f32 %v8826_v41, %v3281_v6  ;;  %v3300_v36 = vadd.f32 %v8826_v41, %v3280_v29 }
 0x6e6   :  { %v8906_v31 = vmax.f32 %v3299_v49, 0.0  ;;  %v8908_v61 = vmax.f32 %v3298_v59, 0.0  ;;  %v3303_v45 = vadd.f32 %v8826_v41, %v3283_v57  ;;  %v3302_v23 = vadd.f32 %v8826_v41, %v3282_v24 }
 0x6e7   :  { %v3345_v48 = vrot.slane %v8890_v11, 1  ;;  %v3344_v39 = vrot.slane %v8892_v0, 1  ;;  %v8920_v40 = vmax.f32 %v3301_v20, 0.0  ;;  %v8922_v10 = vmax.f32 %v3300_v36, 0.0 }
 0x6e8   :  { %3358 = vrot.lane.b32.xlu1 %v3339_v30, %s5085_s11  ;;  %3356 = vrot.lane.b32.xlu0 %v3338_v9, %s5085_s11  ;;  %v3347_v60 = vrot.slane %v8906_v31, 1  ;;  %v3346_v56 = vrot.slane %v8908_v61, 1  ;;  %v8928_v42 = vmax.f32 %v3303_v45, 0.0  ;;  %v8930_v37 = vmax.f32 %v3302_v23, 0.0 }
 0x6e9   :  { %v3349_v25 = vrot.slane %v8920_v40, 1  ;;  %v3348_v3 = vrot.slane %v8922_v10, 1  ;;  %v3401_v41 = vrot.slane %v8842_v28, 2  ;;  %v3400_v2 = vrot.slane %v8844_v32, 2 }
 0x6ea   :  { %v3351_v54 = vrot.slane %v8928_v42, 1  ;;  %v3350_v51 = vrot.slane %v8930_v37, 1  ;;  %v3403_v15 = vrot.slane %v8850_v47, 2  ;;  %v3402_v26 = vrot.slane %v8852_v62, 2 }
 0x6eb   :  { %v3405_v58 = vrot.slane %v8864_v53, 2  ;;  %v3404_v52 = vrot.slane %v8866_v33, 2  ;;  %v3407_v27 = vrot.slane %v8874_v38, 2  ;;  %v3406_v17 = vrot.slane %v8876_v46, 2 }
 0x6ec   :  { %3362 = vrot.lane.b32.xlu1 %v3341_v5, %s5085_s11  ;;  %3360 = vrot.lane.b32.xlu0 %v3340_v8, %s5085_s11  ;;  %v3409_v50 = vrot.slane %v8890_v11, 2  ;;  %v3408_v13 = vrot.slane %v8892_v0, 2  ;;  %v3411_v35 = vrot.slane %v8906_v31, 2  ;;  %v3410_v44 = vrot.slane %v8908_v61, 2 }
 0x6ed   :  { %v3413_v21 = vrot.slane %v8920_v40, 2  ;;  %v3412_v63 = vrot.slane %v8922_v10, 2  ;;  %v3415_v34 = vrot.slane %v8928_v42, 2  ;;  %v3414_v55 = vrot.slane %v8930_v37, 2 }
 0x6ee   :  { %v3465_v4 = vrot.slane %v8842_v28, 3  ;;  %v3464_v12 = vrot.slane %v8844_v32, 3  ;;  %v3467_v30 = vrot.slane %v8850_v47, 3  ;;  %v3466_v9 = vrot.slane %v8852_v62, 3 }
 0x6ef   :  { %v3469_v16 = vrot.slane %v8864_v53, 3  ;;  %v3468_v18 = vrot.slane %v8866_v33, 3  ;;  %v3471_v5 = vrot.slane %v8874_v38, 3  ;;  %v3470_v8 = vrot.slane %v8876_v46, 3 }
 0x6f0   :  { %3366 = vrot.lane.b32.xlu1 %v3343_v1, %s5085_s11  ;;  %3364 = vrot.lane.b32.xlu0 %v3342_v22, %s5085_s11  ;;  %v3473_v7 = vrot.slane %v8890_v11, 3  ;;  %v3472_v14 = vrot.slane %v8892_v0, 3  ;;  %v3475_v19 = vrot.slane %v8906_v31, 3  ;;  %v3474_v43 = vrot.slane %v8908_v61, 3 }
 0x6f1   :  { %v3477_v1 = vrot.slane %v8920_v40, 3  ;;  %v3476_v22 = vrot.slane %v8922_v10, 3  ;;  %v3479_v49 = vrot.slane %v8928_v42, 3  ;;  %v3478_v59 = vrot.slane %v8930_v37, 3 }
 0x6f2   :  { %v3529_v6 = vrot.slane %v8842_v28, 4  ;;  %v3528_v29 = vrot.slane %v8844_v32, 4  ;;  %v3531_v20 = vrot.slane %v8850_v47, 4  ;;  %v3530_v36 = vrot.slane %v8852_v62, 4 }
 0x6f3   :  { %v3535_v57 = vrot.slane %v8874_v38, 4  ;;  %v3534_v24 = vrot.slane %v8876_v46, 4  ;;  %v3537_v45 = vrot.slane %v8890_v11, 4  ;;  %v3536_v23 = vrot.slane %v8892_v0, 4 }
 0x6f4   :  { %3370 = vrot.lane.b32.xlu1 %v3345_v48, %s5085_s11  ;;  %3368 = vrot.lane.b32.xlu0 %v3344_v39, %s5085_s11  ;;  %v3533_v48 = vrot.slane %v8864_v53, 4  ;;  %v3532_v39 = vrot.slane %v8866_v33, 4 }
 0x6f8   :  { %3374 = vrot.lane.b32.xlu1 %v3347_v60, %s5085_s11  ;;  %3372 = vrot.lane.b32.xlu0 %v3346_v56, %s5085_s11 }
 0x6fc   :  { %3378 = vrot.lane.b32.xlu1 %v3349_v25, %s5085_s11  ;;  %3376 = vrot.lane.b32.xlu0 %v3348_v3, %s5085_s11  ;;  %v3539_v25 = vrot.slane %v8906_v31, 4  ;;  %v3538_v3 = vrot.slane %v8908_v61, 4 }
 0x700   :  { %3382 = vrot.lane.b32.xlu1 %v3351_v54, %s5085_s11  ;;  %3380 = vrot.lane.b32.xlu0 %v3350_v51, %s5085_s11 }
 0x704   :  { %3418 = vrot.lane.b32.xlu1 %v3401_v41, %s5096_s24  ;;  %3416 = vrot.lane.b32.xlu0 %v3400_v2, %s5096_s24  ;;  %v3541_v41 = vrot.slane %v8920_v40, 4  ;;  %v3540_v2 = vrot.slane %v8922_v10, 4 }
 0x708   :  { %3422 = vrot.lane.b32.xlu1 %v3403_v15, %s5096_s24  ;;  %3420 = vrot.lane.b32.xlu0 %v3402_v26, %s5096_s24 }
 0x70c   :  { %3426 = vrot.lane.b32.xlu1 %v3405_v58, %s5096_s24  ;;  %3424 = vrot.lane.b32.xlu0 %v3404_v52, %s5096_s24  ;;  %v3543_v58 = vrot.slane %v8928_v42, 4  ;;  %v3542_v52 = vrot.slane %v8930_v37, 4 }
 0x710   :  { %3430 = vrot.lane.b32.xlu1 %v3407_v27, %s5096_s24  ;;  %3428 = vrot.lane.b32.xlu0 %v3406_v17, %s5096_s24 }
 0x714   :  { %3434 = vrot.lane.b32.xlu1 %v3409_v50, %s5096_s24  ;;  %3432 = vrot.lane.b32.xlu0 %v3408_v13, %s5096_s24  ;;  %v3593_v50 = vrot.slane %v8842_v28, 5  ;;  %v3592_v13 = vrot.slane %v8844_v32, 5 }
 0x718   :  { %3438 = vrot.lane.b32.xlu1 %v3411_v35, %s5096_s24  ;;  %3436 = vrot.lane.b32.xlu0 %v3410_v44, %s5096_s24 }
 0x71c   :  { %3442 = vrot.lane.b32.xlu1 %v3413_v21, %s5096_s24  ;;  %3440 = vrot.lane.b32.xlu0 %v3412_v63, %s5096_s24  ;;  %v3595_v21 = vrot.slane %v8850_v47, 5  ;;  %v3594_v63 = vrot.slane %v8852_v62, 5 }
 0x720   :  { %3446 = vrot.lane.b32.xlu1 %v3415_v34, %s5096_s24  ;;  %3444 = vrot.lane.b32.xlu0 %v3414_v55, %s5096_s24 }
 0x724   :  { %3482 = vrot.lane.b32.xlu1 %v3465_v4, %s5099_s17  ;;  %3480 = vrot.lane.b32.xlu0 %v3464_v12, %s5099_s17  ;;  %v3597_v4 = vrot.slane %v8864_v53, 5  ;;  %v3596_v12 = vrot.slane %v8866_v33, 5 }
 0x728   :  { %3486 = vrot.lane.b32.xlu1 %v3467_v30, %s5099_s17  ;;  %3484 = vrot.lane.b32.xlu0 %v3466_v9, %s5099_s17 }
 0x72c   :  { %3490 = vrot.lane.b32.xlu1 %v3469_v16, %s5099_s17  ;;  %3488 = vrot.lane.b32.xlu0 %v3468_v18, %s5099_s17  ;;  %v3599_v16 = vrot.slane %v8874_v38, 5  ;;  %v3598_v18 = vrot.slane %v8876_v46, 5 }
 0x730   :  { %3494 = vrot.lane.b32.xlu1 %v3471_v5, %s5099_s17  ;;  %3492 = vrot.lane.b32.xlu0 %v3470_v8, %s5099_s17 }
 0x734   :  { %3498 = vrot.lane.b32.xlu1 %v3473_v7, %s5099_s17  ;;  %3496 = vrot.lane.b32.xlu0 %v3472_v14, %s5099_s17  ;;  %v3601_v7 = vrot.slane %v8890_v11, 5  ;;  %v3600_v14 = vrot.slane %v8892_v0, 5 }
 0x738   :  { %3502 = vrot.lane.b32.xlu1 %v3475_v19, %s5099_s17  ;;  %3500 = vrot.lane.b32.xlu0 %v3474_v43, %s5099_s17 }
 0x73c   :  { %3506 = vrot.lane.b32.xlu1 %v3477_v1, %s5099_s17  ;;  %3504 = vrot.lane.b32.xlu0 %v3476_v22, %s5099_s17  ;;  %v3603_v1 = vrot.slane %v8906_v31, 5  ;;  %v3602_v22 = vrot.slane %v8908_v61, 5 }
 0x740   :  { %3510 = vrot.lane.b32.xlu1 %v3479_v49, %s5099_s17  ;;  %3508 = vrot.lane.b32.xlu0 %v3478_v59, %s5099_s17 }
 0x744   :  { %3546 = vrot.lane.b32.xlu1 %v3529_v6, %s5097_s25  ;;  %3544 = vrot.lane.b32.xlu0 %v3528_v29, %s5097_s25  ;;  %v3605_v6 = vrot.slane %v8920_v40, 5  ;;  %v3604_v29 = vrot.slane %v8922_v10, 5 }
 0x748   :  { %3550 = vrot.lane.b32.xlu1 %v3531_v20, %s5097_s25  ;;  %3548 = vrot.lane.b32.xlu0 %v3530_v36, %s5097_s25 }
 0x74c   :  { %3554 = vrot.lane.b32.xlu1 %v3533_v48, %s5097_s25  ;;  %3552 = vrot.lane.b32.xlu0 %v3532_v39, %s5097_s25  ;;  %v3665_v48 = vrot.slane %v8890_v11, 6  ;;  %v3657_v39 = vrot.slane %v8842_v28, 6 }
 0x750   :  { %3558 = vrot.lane.b32.xlu1 %v3535_v57, %s5097_s25  ;;  %3556 = vrot.lane.b32.xlu0 %v3534_v24, %s5097_s25 }
 0x754   :  { %3562 = vrot.lane.b32.xlu1 %v3537_v45, %s5097_s25  ;;  %3560 = vrot.lane.b32.xlu0 %v3536_v23, %s5097_s25  ;;  %v3666_v45 = vrot.slane %v8908_v61, 6  ;;  %v3658_v23 = vrot.slane %v8852_v62, 6 }
 0x756   :  { %v9022_v60 = vpop.permute.xlu1 %3354  ;;  %v9024_v56 = vpop.permute.xlu0 %3352 }
 0x758   :  { %3566 = vrot.lane.b32.xlu1 %v3539_v25, %s5097_s25  ;;  %3564 = vrot.lane.b32.xlu0 %v3538_v3, %s5097_s25 }
 0x75a   :  { %v9030_v54 = vpop.permute.xlu1 %3358  ;;  %v9032_v51 = vpop.permute.xlu0 %3356 }
 0x75c   :  { %3570 = vrot.lane.b32.xlu1 %v3541_v41, %s5097_s25  ;;  %3568 = vrot.lane.b32.xlu0 %v3540_v2, %s5097_s25  ;;  %v3729_v41 = vrot.slane %v8890_v11, 7  ;;  %v3721_v2 = vrot.slane %v8842_v28, 7 }
 0x75e   :  { %v9038_v15 = vpop.permute.xlu1 %3362  ;;  %v9040_v26 = vpop.permute.xlu0 %3360 }
 0x760   :  { %3574 = vrot.lane.b32.xlu1 %v3543_v58, %s5097_s25  ;;  %3572 = vrot.lane.b32.xlu0 %v3542_v52, %s5097_s25 }
 0x762   :  { %v9046_v27 = vpop.permute.xlu1 %3366  ;;  %v9048_v17 = vpop.permute.xlu0 %3364 }
 0x764   :  { %3610 = vrot.lane.b32.xlu1 %v3593_v50, %s5101_s28  ;;  %3608 = vrot.lane.b32.xlu0 %v3592_v13, %s5101_s28  ;;  %v3659_v50 = vrot.slane %v8850_v47, 6  ;;  %v3656_v13 = vrot.slane %v8844_v32, 6 }
 0x766   :  { %v9054_v35 = vpop.permute.xlu1 %3370  ;;  %v9056_v44 = vpop.permute.xlu0 %3368 }
 0x768   :  { %3614 = vrot.lane.b32.xlu1 %v3595_v21, %s5101_s28  ;;  %3612 = vrot.lane.b32.xlu0 %v3594_v63, %s5101_s28 }
 0x76a   :  { %v9062_v34 = vpop.permute.xlu1 %3374  ;;  %v9064_v55 = vpop.permute.xlu0 %3372 }
 0x76c   :  { %3618 = vrot.lane.b32.xlu1 %v3597_v4, %s5101_s28  ;;  %3616 = vrot.lane.b32.xlu0 %v3596_v12, %s5101_s28  ;;  %v3667_v4 = vrot.slane %v8906_v31, 6  ;;  %v3664_v12 = vrot.slane %v8892_v0, 6 }
 0x76e   :  { %v9070_v30 = vpop.permute.xlu1 %3378  ;;  %v9072_v9 = vpop.permute.xlu0 %3376 }
 0x770   :  { %3622 = vrot.lane.b32.xlu1 %v3599_v16, %s5101_s28  ;;  %3620 = vrot.lane.b32.xlu0 %v3598_v18, %s5101_s28 }
 0x772   :  { %v3383_v5 = vpop.permute.xlu1 %3382  ;;  %v3381_v8 = vpop.permute.xlu0 %3380 }
 0x773   :  { %v3799_v16 = vsel %vm252_vm2, %v8928_v42, %v3383_v5  ;;  %v3798_v18 = vsel %vm252_vm2, %v8930_v37, %v3381_v8  ;;  %v3785_v5 = vsel %vm252_vm2, %v8842_v28, %v9022_v60  ;;  %v3784_v8 = vsel %vm252_vm2, %v8844_v32, %v9024_v56 }
 0x774   :  { %3626 = vrot.lane.b32.xlu1 %v3601_v7, %s5101_s28  ;;  %3624 = vrot.lane.b32.xlu0 %v3600_v14, %s5101_s28  ;;  %v3787_v28 = vsel %vm252_vm2, %v8850_v47, %v9030_v54  ;;  %v3786_v60 = vsel %vm252_vm2, %v8852_v62, %v9032_v51 }
 0x776   :  { %v3419_v19 = vpop.permute.xlu1 %3418  ;;  %v3417_v43 = vpop.permute.xlu0 %3416 }
 0x778   :  { %3630 = vrot.lane.b32.xlu1 %v3603_v1, %s5101_s28  ;;  %3628 = vrot.lane.b32.xlu0 %v3602_v22, %s5101_s28  ;;  %v3730_v1 = vrot.slane %v8908_v61, 7  ;;  %v3722_v22 = vrot.slane %v8852_v62, 7  ;;  %v3789_v62 = vsel %vm252_vm2, %v8864_v53, %v9038_v15 }
 0x77a   :  { %v3423_v49 = vpop.permute.xlu1 %3422  ;;  %v3421_v59 = vpop.permute.xlu0 %3420 }
 0x77b   :  { %v3803_v56 = vsel %vm290_vm4, %v3787_v28, %v3423_v49  ;;  %v3724_v28 = vrot.slane %v8866_v33, 7 }
 0x77c   :  { %3634 = vrot.lane.b32.xlu1 %v3605_v6, %s5101_s28  ;;  %3632 = vrot.lane.b32.xlu0 %v3604_v29, %s5101_s28 }
 0x77e   :  { %v9090_v20 = vpop.permute.xlu1 %3426  ;;  %v9092_v36 = vpop.permute.xlu0 %3424 }
 0x780   :  { %3690 = vrot.lane.b32.xlu1 %v3665_v48, %s5098_s2  ;;  %3674 = vrot.lane.b32.xlu0 %v3657_v39, %s5098_s2  ;;  %v3801_v48 = vsel %vm290_vm4, %v3785_v5, %v3419_v19  ;;  %v3800_v39 = vsel %vm290_vm4, %v3784_v8, %v3417_v43  ;;  %v3802_v19 = vsel %vm290_vm4, %v3786_v60, %v3421_v59  ;;  %v3731_v59 = vrot.slane %v8906_v31, 7 }
 0x781   :  { %v3669_v60 = vrot.slane %v8920_v40, 6 }
 0x782   :  { %v9098_v57 = vpop.permute.xlu1 %3430  ;;  %v9100_v24 = vpop.permute.xlu0 %3428 }
 0x784   :  { %3692 = vrot.lane.b32.xlu1 %v3666_v45, %s5098_s2  ;;  %3676 = vrot.lane.b32.xlu0 %v3658_v23, %s5098_s2 }
 0x786   :  { %v9106_v25 = vpop.permute.xlu1 %3434  ;;  %v9108_v3 = vpop.permute.xlu0 %3432 }
 0x788   :  { %3754 = vrot.lane.b32.xlu1 %v3729_v41, %s5103_s29  ;;  %3738 = vrot.lane.b32.xlu0 %v3721_v2, %s5103_s29  ;;  %v3668_v41 = vrot.slane %v8922_v10, 6  ;;  %v3660_v2 = vrot.slane %v8866_v33, 6 }
 0x78a   :  { %v9114_v58 = vpop.permute.xlu1 %3438  ;;  %v9116_v52 = vpop.permute.xlu0 %3436 }
 0x78c   :  { %3678 = vrot.lane.b32.xlu1 %v3659_v50, %s5098_s2  ;;  %3672 = vrot.lane.b32.xlu0 %v3656_v13, %s5098_s2 }
 0x78e   :  { %v9122_v21 = vpop.permute.xlu1 %3442  ;;  %v9124_v63 = vpop.permute.xlu0 %3440 }
 0x790   :  { %3694 = vrot.lane.b32.xlu1 %v3667_v4, %s5098_s2  ;;  %3688 = vrot.lane.b32.xlu0 %v3664_v12, %s5098_s2  ;;  %v3723_v12 = vrot.slane %v8850_v47, 7  ;;  %v3788_v47 = vsel %vm252_vm2, %v8866_v33, %v9040_v26  ;;  %v3791_v26 = vsel %vm252_vm2, %v8874_v38, %v9046_v27  ;;  %v3794_v33 = vsel %vm252_vm2, %v8908_v61, %v9064_v55 }
 0x791   :  { %v3804_v54 = vsel %vm290_vm4, %v3788_v47, %v9092_v36  ;;  %v3807_v36 = vsel %vm290_vm4, %v3791_v26, %v9098_v57  ;;  %v3792_v57 = vsel %vm252_vm2, %v8892_v0, %v9056_v44  ;;  %v3810_v44 = vsel %vm290_vm4, %v3794_v33, %v9116_v52 }
 0x792   :  { %v3447_v7 = vpop.permute.xlu1 %3446  ;;  %v3445_v14 = vpop.permute.xlu0 %3444  ;;  %v3797_v61 = vsel %vm252_vm2, %v8920_v40, %v9070_v30  ;;  %v3734_v26 = vrot.slane %v8930_v37, 7 }
 0x793   :  { %v9137_v6 = vsel %vm290_vm4, %v3799_v16, %v3447_v7  ;;  %v9140_v29 = vsel %vm290_vm4, %v3798_v18, %v3445_v14  ;;  %v3720_v16 = vrot.slane %v8844_v32, 7  ;;  %v3805_v32 = vsel %vm290_vm4, %v3789_v62, %v9090_v20 }
 0x794   :  { %3756 = vrot.lane.b32.xlu1 %v3730_v1, %s5103_s29  ;;  %3740 = vrot.lane.b32.xlu0 %v3722_v22, %s5103_s29  ;;  %v3728_v14 = vrot.slane %v8892_v0, 7  ;;  %v3790_v20 = vsel %vm252_vm2, %v8876_v46, %v9048_v17  ;;  %v3793_v17 = vsel %vm252_vm2, %v8890_v11, %v9054_v35  ;;  %v3795_v0 = vsel %vm252_vm2, %v8906_v31, %v9062_v34 }
 0x795   :  { %v3806_v22 = vsel %vm290_vm4, %v3790_v20, %v9100_v24  ;;  %v3809_v24 = vsel %vm290_vm4, %v3793_v17, %v9106_v25  ;;  %v3811_v35 = vsel %vm290_vm4, %v3795_v0, %v9114_v58  ;;  %v3796_v34 = vsel %vm252_vm2, %v8922_v10, %v9072_v9 }
 0x796   :  { %v3483_v45 = vpop.permute.xlu1 %3482  ;;  %v3481_v23 = vpop.permute.xlu0 %3480  ;;  %v3813_v55 = vsel %vm290_vm4, %v3797_v61, %v9122_v21  ;;  %v3812_v58 = vsel %vm290_vm4, %v3796_v34, %v9124_v63  ;;  %v3662_v62 = vrot.slane %v8876_v46, 6  ;;  %v3733_v21 = vrot.slane %v8920_v40, 7 }
 0x797   :  { %v9155_v50 = vsel %vm2775_vm10, %v3801_v48, %v3483_v45  ;;  %v9158_v13 = vsel %vm2775_vm10, %v3800_v39, %v3481_v23  ;;  %v3661_v48 = vrot.slane %v8864_v53, 6  ;;  %v3606_v39 = vrot.slane %v8930_v37, 5 }
 0x798   :  { %3696 = vrot.lane.b32.xlu1 %v3668_v41, %s5098_s2  ;;  %3680 = vrot.lane.b32.xlu0 %v3660_v2, %s5098_s2  ;;  %v3808_v23 = vsel %vm290_vm4, %v3792_v57, %v9108_v3  ;;  %v3725_v63 = vrot.slane %v8864_v53, 7  ;;  %v3726_v20 = vrot.slane %v8876_v46, 7  ;;  %vm3916_vm2 = vcmask 1042434  }
 0x799   :  { %vm3919_vm4 = vcmask 1043459  }
 0x79a   :  { %v3487_v43 = vpop.permute.xlu1 %3486  ;;  %v3485_v4 = vpop.permute.xlu0 %3484 }
 0x79b   :  { %v9173_v18 = vsel %vm2775_vm10, %v3803_v56, %v3487_v43  ;;  %v9176_v7 = vsel %vm2775_vm10, %v3802_v19, %v3485_v4  ;;  %v3607_v19 = vrot.slane %v8928_v42, 5  ;;  %v3732_v43 = vrot.slane %v8922_v10, 7 }
 0x79c   :  { %3742 = vrot.lane.b32.xlu1 %v3723_v12, %s5103_s29  ;;  %3736 = vrot.lane.b32.xlu0 %v3720_v16, %s5103_s29  ;;  %v3670_v16 = vrot.slane %v8930_v37, 6 }
 0x79e   :  { %v3491_v51 = vpop.permute.xlu1 %3490  ;;  %v3489_v49 = vpop.permute.xlu0 %3488 }
 0x79f   :  { %v9193_v1 = vsel %vm2775_vm10, %v3805_v32, %v3491_v51  ;;  %v9196_v15 = vsel %vm2775_vm10, %v3804_v54, %v3489_v49 }
 0x7a0   :  { %3758 = vrot.lane.b32.xlu1 %v3731_v59, %s5103_s29  ;;  %3752 = vrot.lane.b32.xlu0 %v3728_v14, %s5103_s29  ;;  %v3671_v59 = vrot.slane %v8928_v42, 6  ;;  %v3663_v14 = vrot.slane %v8874_v38, 6 }
 0x7a2   :  { %v3495_v5 = vpop.permute.xlu1 %3494  ;;  %v3493_v8 = vpop.permute.xlu0 %3492 }
 0x7a3   :  { %v9213_v45 = vsel %vm2775_vm10, %v3807_v36, %v3495_v5  ;;  %v9216_v27 = vsel %vm2775_vm10, %v3806_v22, %v3493_v8  ;;  %v3735_v5 = vrot.slane %v8928_v42, 7  ;;  %v3727_v8 = vrot.slane %v8874_v38, 7 }
 0x7a4   :  { %3682 = vrot.lane.b32.xlu1 %v3661_v48, %s5098_s2  ;;  %3636 = vrot.lane.b32.xlu0 %v3606_v39, %s5101_s28 }
 0x7a6   :  { %v3499_v41 = vpop.permute.xlu1 %3498  ;;  %v3497_v2 = vpop.permute.xlu0 %3496 }
 0x7a7   :  { %v9233_v56 = vsel %vm2775_vm10, %v3809_v24, %v3499_v41  ;;  %v9236_v11 = vsel %vm2775_vm10, %v3808_v23, %v3497_v2 }
 0x7a8   :  { %3744 = vrot.lane.b32.xlu1 %v3724_v28, %s5103_s29  ;;  %3698 = vrot.lane.b32.xlu0 %v3669_v60, %s5098_s2 }
 0x7aa   :  { %v3503_v25 = vpop.permute.xlu1 %3502  ;;  %v3501_v3 = vpop.permute.xlu0 %3500 }
 0x7ab   :  { %v3827_v4 = vsel %vm2775_vm10, %v3811_v35, %v3503_v25  ;;  %v3826_v31 = vsel %vm2775_vm10, %v3810_v44, %v3501_v3 }
 0x7ac   :  { %3638 = vrot.lane.b32.xlu1 %v3607_v19, %s5101_s28  ;;  %3760 = vrot.lane.b32.xlu0 %v3732_v43, %s5103_s29 }
 0x7ae   :  { %v3507_v52 = vpop.permute.xlu1 %3506  ;;  %v3505_v12 = vpop.permute.xlu0 %3504 }
 0x7af   :  { %v3829_v47 = vsel %vm2775_vm10, %v3813_v55, %v3507_v52  ;;  %v3828_v30 = vsel %vm2775_vm10, %v3812_v58, %v3505_v12 }
 0x7b0   :  { %3700 = vrot.lane.b32.xlu1 %v3670_v16, %s5098_s2  ;;  %3684 = vrot.lane.b32.xlu0 %v3662_v62, %s5098_s2 }
 0x7b2   :  { %v3511_v10 = vpop.permute.xlu1 %3510  ;;  %v3509_v9 = vpop.permute.xlu0 %3508 }
 0x7b3   :  { %v3831_v32 = vsel %vm2775_vm10, %v9137_v6, %v3511_v10  ;;  %v3830_v54 = vsel %vm2775_vm10, %v9140_v29, %v3509_v9  ;;  %vm3928_vm10 = vcmask 1046534  }
 0x7b4   :  { %3762 = vrot.lane.b32.xlu1 %v3733_v21, %s5103_s29  ;;  %3746 = vrot.lane.b32.xlu0 %v3725_v63, %s5103_s29 }
 0x7b6   :  { %v3547_v51 = vpop.permute.xlu1 %3546  ;;  %v3545_v49 = vpop.permute.xlu0 %3544 }
 0x7b7   :  { %v3833_v40 = vsel %vm2809_vm12, %v9155_v50, %v3547_v51  ;;  %v3832_v53 = vsel %vm2809_vm12, %v9158_v13, %v3545_v49 }
 0x7b8   :  { %3702 = vrot.lane.b32.xlu1 %v3671_v59, %s5098_s2  ;;  %3686 = vrot.lane.b32.xlu0 %v3663_v14, %s5098_s2 }
 0x7ba   :  { %v3551_v6 = vpop.permute.xlu1 %3550  ;;  %v3549_v29 = vpop.permute.xlu0 %3548 }
 0x7bb   :  { %v3835_v36 = vsel %vm2809_vm12, %v9173_v18, %v3551_v6  ;;  %v3834_v22 = vsel %vm2809_vm12, %v9176_v7, %v3549_v29 }
 0x7bc   :  { %3764 = vrot.lane.b32.xlu1 %v3734_v26, %s5103_s29  ;;  %3748 = vrot.lane.b32.xlu0 %v3726_v20, %s5103_s29 }
 0x7be   :  { %v3555_v50 = vpop.permute.xlu1 %3554  ;;  %v3553_v13 = vpop.permute.xlu0 %3552 }
 0x7bf   :  { %v3837_v37 = vsel %vm2809_vm12, %v9193_v1, %v3555_v50  ;;  %v3836_v46 = vsel %vm2809_vm12, %v9196_v15, %v3553_v13 }
 0x7c0   :  { %3766 = vrot.lane.b32.xlu1 %v3735_v5, %s5103_s29  ;;  %3750 = vrot.lane.b32.xlu0 %v3727_v8, %s5103_s29 }
 0x7c2   :  { %v3559_v18 = vpop.permute.xlu1 %3558  ;;  %v3557_v7 = vpop.permute.xlu0 %3556 }
 0x7c3   :  { %v3839_v48 = vsel %vm2809_vm12, %v9213_v45, %v3559_v18  ;;  %v3838_v42 = vsel %vm2809_vm12, %v9216_v27, %v3557_v7 }
 0x7c6   :  { %v3563_v39 = vpop.permute.xlu1 %3562  ;;  %v3561_v38 = vpop.permute.xlu0 %3560 }
 0x7c7   :  { %v3841_v1 = vsel %vm2809_vm12, %v9233_v56, %v3563_v39  ;;  %v3840_v15 = vsel %vm2809_vm12, %v9236_v11, %v3561_v38 }
 0x7ca   :  { %v3567_v17 = vpop.permute.xlu1 %3566  ;;  %v3565_v57 = vpop.permute.xlu0 %3564 }
 0x7cb   :  { %v3843_v24 = vsel %vm2809_vm12, %v3827_v4, %v3567_v17  ;;  %v3842_v23 = vsel %vm2809_vm12, %v3826_v31, %v3565_v57 }
 0x7ce   :  { %v3571_v41 = vpop.permute.xlu1 %3570  ;;  %v3569_v2 = vpop.permute.xlu0 %3568 }
 0x7cf   :  { %v3845_v45 = vsel %vm2809_vm12, %v3829_v47, %v3571_v41  ;;  %v9316_v27 = vsel %vm2809_vm12, %v3828_v30, %v3569_v2 }
 0x7d2   :  { %v3575_v28 = vpop.permute.xlu1 %3574  ;;  %v3573_v60 = vpop.permute.xlu0 %3572 }
 0x7d3   :  { %v9319_v56 = vsel %vm2809_vm12, %v3831_v32, %v3575_v28  ;;  %v9322_v11 = vsel %vm2809_vm12, %v3830_v54, %v3573_v60 }
 0x7d6   :  { %v3611_v0 = vpop.permute.xlu1 %3610  ;;  %v3609_v33 = vpop.permute.xlu0 %3608 }
 0x7d7   :  { %v3849_v35 = vsel %vm2843_vm14, %v3833_v40, %v3611_v0  ;;  %v3848_v44 = vsel %vm2843_vm14, %v3832_v53, %v3609_v33 }
 0x7da   :  { %v3615_v25 = vpop.permute.xlu1 %3614  ;;  %v3613_v3 = vpop.permute.xlu0 %3612 }
 0x7db   :  { %v3851_v19 = vsel %vm2843_vm14, %v3835_v36, %v3615_v25  ;;  %v3850_v43 = vsel %vm2843_vm14, %v3834_v22, %v3613_v3 }
 0x7de   :  { %v3619_v4 = vpop.permute.xlu1 %3618  ;;  %v3617_v31 = vpop.permute.xlu0 %3616 }
 0x7df   :  { %v9329_v61 = vsel %vm2843_vm14, %v3837_v37, %v3619_v4  ;;  %v9332_v34 = vsel %vm2843_vm14, %v3836_v46, %v3617_v31 }
 0x7e2   :  { %v3623_v55 = vpop.permute.xlu1 %3622  ;;  %v3621_v58 = vpop.permute.xlu0 %3620 }
 0x7e3   :  { %v9335_v52 = vsel %vm2843_vm14, %v3839_v48, %v3623_v55  ;;  %v9338_v12 = vsel %vm2843_vm14, %v3838_v42, %v3621_v58 }
 0x7e6   :  { %v3627_v16 = vpop.permute.xlu1 %3626  ;;  %v3625_v62 = vpop.permute.xlu0 %3624 }
 0x7e7   :  { %v3857_v47 = vsel %vm2843_vm14, %v3841_v1, %v3627_v16  ;;  %v3856_v30 = vsel %vm2843_vm14, %v3840_v15, %v3625_v62 }
 0x7ea   :  { %v3631_v10 = vpop.permute.xlu1 %3630  ;;  %v3629_v9 = vpop.permute.xlu0 %3628 }
 0x7eb   :  { %v3859_v21 = vsel %vm2843_vm14, %v3843_v24, %v3631_v10  ;;  %v3858_v63 = vsel %vm2843_vm14, %v3842_v23, %v3629_v9 }
 0x7ee   :  { %v3635_v32 = vpop.permute.xlu1 %3634  ;;  %v3633_v54 = vpop.permute.xlu0 %3632 }
 0x7ef   :  { %v9345_v51 = vsel %vm2843_vm14, %v3845_v45, %v3635_v32 }
 0x7f2   :  { %v3691_v49 = vpop.permute.xlu1 %3690  ;;  %v3675_v59 = vpop.permute.xlu0 %3674 }
 0x7f3   :  { %v3865_v13 = vsel %vm2877_vm0, %v3849_v35, %v3675_v59  ;;  %v3873_v7 = vsel %vm2877_vm0, %v3857_v47, %v3691_v49 }
 0x7f6   :  { %v3693_v14 = vpop.permute.xlu1 %3692  ;;  %v3677_v40 = vpop.permute.xlu0 %3676 }
 0x7f7   :  { %v3866_v37 = vsel %vm2877_vm0, %v3850_v43, %v3677_v40  ;;  %v3874_v48 = vsel %vm2877_vm0, %v3858_v63, %v3693_v14  ;;  %v3860_v63 = vsel %vm2843_vm14, %v9316_v27, %v3633_v54 }
 0x7fa   :  { %v3755_v53 = vpop.permute.xlu1 %3754  ;;  %v3739_v6 = vpop.permute.xlu0 %3738 }
 0x7fb   :  { %v3881_v46 = vsel %vm2911_vm8, %v3865_v13, %v3739_v6  ;;  %v3889_v17 = vsel %vm2911_vm8, %v3873_v7, %v3755_v53 }
 0x7fc   :  { %v3912_v42 = vrot.slane %v3881_v46, 7  ;;  %v3933_v60 = vrot.slane %v3889_v17, 7 }
 0x7fe   :  { %v3679_v29 = vpop.permute.xlu1 %3678  ;;  %v3673_v26 = vpop.permute.xlu0 %3672 }
 0x7ff   :  { %v3867_v39 = vsel %vm2877_vm0, %v3851_v19, %v3679_v29  ;;  %v3864_v38 = vsel %vm2877_vm0, %v3848_v44, %v3673_v26 }
 0x802   :  { %v3695_v20 = vpop.permute.xlu1 %3694  ;;  %v3689_v36 = vpop.permute.xlu0 %3688 }
 0x803   :  { %v3875_v0 = vsel %vm2877_vm0, %v3859_v21, %v3695_v20  ;;  %v3872_v33 = vsel %vm2877_vm0, %v3856_v30, %v3689_v36 }
 0x806   :  { %v3757_v22 = vpop.permute.xlu1 %3756  ;;  %v3741_v50 = vpop.permute.xlu0 %3740 }
 0x807   :  { %v3882_v18 = vsel %vm2911_vm8, %v3866_v37, %v3741_v50  ;;  %v3890_v41 = vsel %vm2911_vm8, %v3874_v48, %v3757_v22 }
 0x808   :  { %v3915_v57 = vrot.slane %v3882_v18, 6  ;;  %v3935_v3 = vrot.slane %v3890_v41, 6 }
 0x80a   :  { %v3697_v5 = vpop.permute.xlu1 %3696  ;;  %v3681_v8 = vpop.permute.xlu0 %3680 }
 0x80b   :  { %v3868_v47 = vsel %vm2877_vm0, %v9332_v34, %v3681_v8  ;;  %v3876_v32 = vsel %vm2877_vm0, %v3860_v63, %v3697_v5 }
 0x80e   :  { %v3743_v1 = vpop.permute.xlu1 %3742  ;;  %v3737_v15 = vpop.permute.xlu0 %3736 }
 0x80f   :  { %v3883_v24 = vsel %vm2911_vm8, %v3867_v39, %v3743_v1  ;;  %v3880_v23 = vsel %vm2911_vm8, %v3864_v38, %v3737_v15 }
 0x810   :  { %v3918_v2 = vrot.slane %v3883_v24, 5  ;;  %v3914_v45 = vsel %vm3913_vm1, %v3912_v42, %v3880_v23 }
 0x811   :  { %v3917_v28 = vsel %vm3916_vm2, %v3915_v57, %v3914_v45 }
 0x812   :  { %v3920_v35 = vsel %vm3919_vm4, %v3918_v2, %v3917_v28  ;;  %v3759_v44 = vpop.permute.xlu1 %3758  ;;  %v3753_v25 = vpop.permute.xlu0 %3752 }
 0x813   :  { %v3891_v19 = vsel %vm2911_vm8, %v3875_v0, %v3759_v44  ;;  %v3888_v43 = vsel %vm2911_vm8, %v3872_v33, %v3753_v25 }
 0x814   :  { %v3937_v4 = vrot.slane %v3891_v19, 5  ;;  %v3934_v31 = vsel %vm3913_vm1, %v3933_v60, %v3888_v43 }
 0x815   :  { %v3936_v55 = vsel %vm3916_vm2, %v3935_v3, %v3934_v31 }
 0x816   :  { %v3938_v58 = vsel %vm3919_vm4, %v3937_v4, %v3936_v55  ;;  %v3683_v16 = vpop.permute.xlu1 %3682  ;;  %v3637_v62 = vpop.permute.xlu0 %3636 }
 0x817   :  { %v3869_v26 = vsel %vm2877_vm0, %v9329_v61, %v3683_v16  ;;  %v3862_v18 = vsel %vm2843_vm14, %v9322_v11, %v3637_v62 }
 0x81a   :  { %v3745_v30 = vpop.permute.xlu1 %3744  ;;  %v3699_v10 = vpop.permute.xlu0 %3698 }
 0x81b   :  { %v3884_v9 = vsel %vm2911_vm8, %v3868_v47, %v3745_v30  ;;  %v3877_v20 = vsel %vm2877_vm0, %v9345_v51, %v3699_v10 }
 0x81c   :  { %v3921_v21 = vrot.slane %v3884_v9, 4 }
 0x81e   :  { %v3923_v49 = vsel %vm3922_vm5, %v3921_v21, %v3920_v35  ;;  %v3639_v59 = vpop.permute.xlu1 %3638  ;;  %v3761_v14 = vpop.permute.xlu0 %3760 }
 0x81f   :  { %v3892_v40 = vsel %vm2911_vm8, %v3876_v32, %v3761_v14  ;;  %v3863_v15 = vsel %vm2843_vm14, %v9319_v56, %v3639_v59 }
 0x820   :  { %v3939_v53 = vrot.slane %v3892_v40, 4 }
 0x822   :  { %v3940_v6 = vsel %vm3922_vm5, %v3939_v53, %v3938_v58  ;;  %v3701_v29 = vpop.permute.xlu1 %3700  ;;  %v3685_v34 = vpop.permute.xlu0 %3684 }
 0x823   :  { %v3878_v61 = vsel %vm2877_vm0, %v3862_v18, %v3701_v29  ;;  %v3870_v51 = vsel %vm2877_vm0, %v9338_v12, %v3685_v34 }
 0x826   :  { %v3763_v36 = vpop.permute.xlu1 %3762  ;;  %v3747_v22 = vpop.permute.xlu0 %3746 }
 0x827   :  { %v3893_v27 = vsel %vm2911_vm8, %v3877_v20, %v3763_v36  ;;  %v3885_v54 = vsel %vm2911_vm8, %v3869_v26, %v3747_v22 }
 0x828   :  { %v3941_v50 = vrot.slane %v3893_v27, 3  ;;  %v3924_v13 = vrot.slane %v3885_v54, 3 }
 0x82a   :  { %v3942_v5 = vsel %vm3925_vm9, %v3941_v50, %v3940_v6  ;;  %v3926_v8 = vsel %vm3925_vm9, %v3924_v13, %v3923_v49  ;;  %v3703_v37 = vpop.permute.xlu1 %3702  ;;  %v3687_v46 = vpop.permute.xlu0 %3686 }
 0x82b   :  { %v3879_v17 = vsel %vm2877_vm0, %v3863_v15, %v3703_v37  ;;  %v3871_v11 = vsel %vm2877_vm0, %v9335_v52, %v3687_v46 }
 0x82e   :  { %v3765_v7 = vpop.permute.xlu1 %3764  ;;  %v3749_v48 = vpop.permute.xlu0 %3748 }
 0x82f   :  { %v3894_v42 = vsel %vm2911_vm8, %v3878_v61, %v3765_v7  ;;  %v3886_v39 = vsel %vm2911_vm8, %v3870_v51, %v3749_v48 }
 0x830   :  { %v3943_v38 = vrot.slane %v3894_v42, 2  ;;  %v3927_v1 = vrot.slane %v3886_v39, 2 }
 0x832   :  { %v3944_v57 = vsel %vm3928_vm10, %v3943_v38, %v3942_v5  ;;  %v3929_v24 = vsel %vm3928_vm10, %v3927_v1, %v3926_v8  ;;  %v3767_v12 = vpop.permute.xlu1 %3766  ;;  %v3751_v23 = vpop.permute.xlu0 %3750 }
 0x833   :  { %v3895_v41 = vsel %vm2911_vm8, %v3879_v17, %v3767_v12  ;;  %v3887_v2 = vsel %vm2911_vm8, %v3871_v11, %v3751_v23 }
 0x834   :  { %v3945_v45 = vrot.slane %v3895_v41, 1  ;;  %v3930_v28 = vrot.slane %v3887_v2, 1 }
 0x836   :  { %v3946_v60 = vsel %vm3931_vm11, %v3945_v45, %v3944_v57  ;;  %v3932_v0 = vsel %vm3931_vm11, %v3930_v28, %v3929_v24 }
 0x837   :  { %3950 = vst [vmem:[%s9410_s8 + $0x8] sm:$0xff] %v3946_v60  ;;  %3949 = vst [vmem:[%s9410_s8] sm:$0xff] %v3932_v0 }

</bundles_post_ra>
